<compile_context>
chip_gen: v7x
topology: tpu7x:2x2x1
jax: 0.10.0
libtpu: 0.0.40
codegen_flags: <defaults>
</compile_context>

<pallas_src>
import functools
import math

import jax
import jax.numpy as jnp
from jax import lax
from jax.experimental import pallas as pl
from jax.experimental.pallas import tpu as pltpu


# Matmul operand dtype.  bf16 is native on the v5e/v6e/v7x MXU (f32 matmul is a
# multi-pass emulation); accumulation is always f32 (preferred_element_type).
MATMUL_DTYPE = jnp.bfloat16

# ---- column offsets (in units of D) into the packed weight / bias slabs -----
C_FFCA_Q = 0          # cols [0D,1D)=q, [1D,2D)=qv   (fused x-projection)
C_FFCA_K = 2          # cols [2D,3D)=k, [3D,4D)=kv   (fused y-projection)
C_FFCA_FFN = 4
C_FFN_L1, C_FFN_L2, C_FFN_L3 = 5, 6, 7
C_SA1_QKV, C_SA1_FFN = 8, 11   # cols [8D,11D)  = q|k|v
C_SA2_QKV, C_SA2_FFN = 12, 15  # cols [12D,15D) = q|k|v
C_LN_ALPHA, C_LN_BIAS = 16, 17  # bias slab only
N_WCOLS, N_BCOLS = 16, 18

_LN_EPS = 1e-6
_LEAKY_SLOPE = 0.01  # F.leaky_relu default


# -----------------------------------------------------------------------------
# Fused kernel: one grid step == `batch_block` batch elements, everything VMEM
# -----------------------------------------------------------------------------
def _fused_kernel(x_ref, y_ref, pex_ref, pey_ref, w_ref, b_ref, o_ref,
                  *, n_head, sa_scale):
    bb, S, D = x_ref.shape
    hd = D // n_head
    M = bb * S
    mm_dtype = w_ref.dtype

    def lin(h, col, n=1, act=False):
        # h @ W[:, col*D:(col+n)*D] + b  — fused projections use n=2 / n=3.
        lo = col * D
        out = jnp.dot(h.astype(mm_dtype), w_ref[:, lo:lo + n * D],
                      preferred_element_type=jnp.float32)
        out = out + b_ref[:, lo:lo + n * D]
        if act:
            out = jnp.where(out >= 0, out, _LEAKY_SLOPE * out)
        return out

    def mha(q, k, v, scale):
        # (M, D) -> (bb*H, S, hd); heads are contiguous hd-slices of the last
        # dim, matching torch's view(B,S,H,hd).transpose(1,2) layout.
        def split(t):
            t = jnp.transpose(t.reshape(bb, S, n_head, hd), (0, 2, 1, 3))
            return t.reshape(bb * n_head, S, hd).astype(mm_dtype)

        qh, kh, vh = split(q), split(k), split(v)
        # One batched q @ k^T over all (batch, head) pairs — no per-head loop.
        logits = lax.dot_general(qh, kh, (((2,), (2,)), ((0,), (0,))),
                                 preferred_element_type=jnp.float32)
        if scale != 1.0:
            logits = logits * scale
        mx = jnp.max(logits, axis=-1, keepdims=True)
        e = jnp.exp(logits - mx)
        p = e * pl.reciprocal(jnp.sum(e, axis=-1, keepdims=True), approx=True)
        out = lax.dot_general(p.astype(mm_dtype), vh,
                              (((2,), (1,)), ((0,), (0,))),
                              preferred_element_type=jnp.float32)
        out = jnp.transpose(out.reshape(bb, n_head, S, hd), (0, 2, 1, 3))
        return out.reshape(M, D)

    # ---- positional embeddings (broadcast over batch block), fold batch -> M
    x = (x_ref[...] + pex_ref[...]).reshape(M, D)
    y = (y_ref[...] + pey_ref[...]).reshape(M, D)

    # ---- FlowFace cross-attention layer ----
    q_qv = lin(x, C_FFCA_Q, n=2)          # (M, 2D): q | qv
    k_kv = lin(y, C_FFCA_K, n=2)          # (M, 2D): k | kv
    # Reference adds +sqrt(hd) to every logit pre-softmax: constant shift is
    # cancelled by softmax, so it is dropped (no multiplicative scale in FFCA).
    attn = mha(q_qv[:, :D], k_kv[:, :D], k_kv[:, D:], 1.0) + q_qv[:, D:]
    x = x + lin(attn, C_FFCA_FFN)         # residual

    # ---- LayerNormalization (torch-style: unbiased std, eps added to std) ----
    s1 = jnp.sum(x, axis=-1, keepdims=True)
    s2 = jnp.sum(x * x, axis=-1, keepdims=True)
    mean = s1 * (1.0 / D)
    var = jnp.maximum((s2 - s1 * mean) * (1.0 / (D - 1)), 0.0)
    alpha = b_ref[:, C_LN_ALPHA * D:(C_LN_ALPHA + 1) * D]
    beta = b_ref[:, C_LN_BIAS * D:(C_LN_BIAS + 1) * D]
    x = alpha * (x - mean) * pl.reciprocal(jnp.sqrt(var) + _LN_EPS,
                                           approx=True) + beta

    # ---- FeedForward: 3 x (Linear -> leaky_relu), then residual ----
    h = lin(x, C_FFN_L1, act=True)
    h = lin(h, C_FFN_L2, act=True)
    h = lin(h, C_FFN_L3, act=True)
    x = x + h

    # ---- Two self-attention layers (no residual in the reference) ----
    for c_qkv, c_ffn in ((C_SA1_QKV, C_SA1_FFN), (C_SA2_QKV, C_SA2_FFN)):
        qkv = lin(x, c_qkv, n=3)          # (M, 3D): q | k | v
        x = lin(mha(qkv[:, :D], qkv[:, D:2 * D], qkv[:, 2 * D:], sa_scale),
                c_ffn)

    o_ref[...] = x.reshape(bb, S, D)


# -----------------------------------------------------------------------------
# Wrapper
# -----------------------------------------------------------------------------
def flowface_forward(packed, x_img, y_img, *, n_head, batch_block=1):
    B, C, Wd, Hd = x_img.shape
    S = Wd * Hd
    D = C
    assert B % batch_block == 0, "batch must be divisible by batch_block"

    # Raw row-major reshape == torch .view on the contiguous NCHW tensor.
    x = x_img.reshape(B, S, D)
    y = y_img.reshape(B, S, D)

    kernel = functools.partial(_fused_kernel, n_head=n_head,
                               sa_scale=1.0 / math.sqrt(D // n_head))

    # Grid-invariant inputs: single-buffered (no double-buffer VMEM waste).
    inv = dict(pipeline_mode=pl.Buffered(1))
    bb = batch_block

    return pl.pallas_call(
        kernel,
        out_shape=jax.ShapeDtypeStruct((B, S, D), jnp.float32),
        grid=(B // bb,),
        in_specs=[
            pl.BlockSpec((bb, S, D), lambda i: (i, 0, 0)),            # x
            pl.BlockSpec((bb, S, D), lambda i: (i, 0, 0)),            # y
            pl.BlockSpec((S, D), lambda i: (0, 0), **inv),            # pos_emb_x
            pl.BlockSpec((S, D), lambda i: (0, 0), **inv),            # pos_emb_y
            pl.BlockSpec((D, N_WCOLS * D), lambda i: (0, 0), **inv),  # W slab
            pl.BlockSpec((1, N_BCOLS * D), lambda i: (0, 0), **inv),  # bias slab
        ],
        out_specs=pl.BlockSpec((bb, S, D), lambda i: (i, 0, 0)),
        compiler_params=pltpu.CompilerParams(
            dimension_semantics=("parallel",),
            vmem_limit_bytes=32 * 1024 * 1024),
    )(x, y, packed["pos_emb_x"], packed["pos_emb_y"],
      packed["W"], packed["B"])


# -----------------------------------------------------------------------------
# Parameter init (torch-Linear-like) + host-side packing
# -----------------------------------------------------------------------------
def _init_linear(key, dout, din):
    kw, kb = jax.random.split(key)
    bound = 1.0 / math.sqrt(din)
    w = jax.random.uniform(kw, (dout, din), jnp.float32, -bound, bound)
    b = jax.random.uniform(kb, (dout,), jnp.float32, -bound, bound)
    return (w, b)


def init_params(key, seq_len, q_dim, k_dim, kv_dim):
    keys = iter(jax.random.split(key, 20))
    lin = lambda dout, din: _init_linear(next(keys), dout, din)
    return {
        "pos_emb_x": jax.random.normal(next(keys), (seq_len, q_dim), jnp.float32),
        "pos_emb_y": jax.random.normal(next(keys), (seq_len, q_dim), jnp.float32),
        "ffca": {"q": lin(q_dim, q_dim), "qv": lin(q_dim, q_dim),
                 "k": lin(q_dim, k_dim), "kv": lin(q_dim, kv_dim),
                 "ffn": lin(q_dim, q_dim)},
        "ln_alpha": jnp.ones((q_dim,), jnp.float32),
        "ln_bias": jnp.zeros((q_dim,), jnp.float32),
        "ffn": {"l1": lin(q_dim, q_dim), "l2": lin(q_dim, q_dim),
                "l3": lin(q_dim, q_dim)},
        "sa1": {"q": lin(q_dim, q_dim), "k": lin(q_dim, q_dim),
                "v": lin(q_dim, q_dim), "ffn": lin(q_dim, q_dim)},
        "sa2": {"q": lin(q_dim, q_dim), "k": lin(q_dim, q_dim),
                "v": lin(q_dim, q_dim), "ffn": lin(q_dim, q_dim)},
    }


def pack_params(params):
    """Pre-transpose every Linear weight to (Din, Dout) and column-concatenate
    into one (D, 16D) slab (bf16); biases + LN alpha/beta into one (1, 18D)
    f32 slab.  Column order matches the C_* constants; fused groups (FFCA q|qv,
    FFCA k|kv, SA q|k|v) are adjacent so one wide matmul serves each group.
    The reference forward itself requires k_dim == kv_dim == q_dim."""
    order = [("ffca", "q"), ("ffca", "qv"), ("ffca", "k"), ("ffca", "kv"),
             ("ffca", "ffn"),
             ("ffn", "l1"), ("ffn", "l2"), ("ffn", "l3"),
             ("sa1", "q"), ("sa1", "k"), ("sa1", "v"), ("sa1", "ffn"),
             ("sa2", "q"), ("sa2", "k"), ("sa2", "v"), ("sa2", "ffn")]
    ws = [params[a][b][0].T for a, b in order]          # each (Din, Dout)
    d = ws[0].shape[0]
    assert all(w.shape == (d, d) for w in ws), "q_dim, k_dim, kv_dim must match"
    w_slab = jnp.concatenate(ws, axis=1).astype(MATMUL_DTYPE)      # (D, 16D)
    bs = [params[a][b][1] for a, b in order]
    bs = bs + [params["ln_alpha"], params["ln_bias"]]
    b_slab = jnp.concatenate(bs, axis=0)[None, :].astype(jnp.float32)  # (1,18D)
    return {"pos_emb_x": params["pos_emb_x"], "pos_emb_y": params["pos_emb_y"],
            "W": w_slab, "B": b_slab}


# -----------------------------------------------------------------------------
if __name__ == "__main__":
    # Shapes consistent with the module: NCHW input with C == q_dim and
    # W*H == seq_len; q_dim == k_dim == kv_dim is required by the reference
    # forward itself.
    B, n_head = 2, 4
    q_dim = k_dim = kv_dim = 32
    w = h = 4
    seq_len = w * h

    key = jax.random.PRNGKey(0)
    k_params, k_x, k_y = jax.random.split(key, 3)

    params = init_params(k_params, seq_len, q_dim, k_dim, kv_dim)
    packed = pack_params(params)

    x_img = jax.random.normal(k_x, (B, q_dim, w, h), jnp.float32)
    y_img = jax.random.normal(k_y, (B, q_dim, w, h), jnp.float32)

    # batch_block=1 keeps 2 grid steps (both v7x TensorCores busy); on a
    # single-TC chip (v5e/v6e) batch_block=B folds the batch into one step.
    fwd = jax.jit(functools.partial(flowface_forward, n_head=n_head,
                                    batch_block=1))
    out = fwd(packed, x_img, y_img)
    jax.block_until_ready(out)

    assert out.shape == (B, seq_len, q_dim), out.shape
    assert out.dtype == jnp.float32
    assert bool(jnp.all(jnp.isfinite(out)))
    print("KERNEL_OK")
</pallas_src>

<mosaic_0001>
module attributes {stable_mosaic.version = 11 : i64} {
  func.func @_fused_kernel(%arg0: i32, %arg1: memref<1x16x32xf32, #tpu.memory_space<vmem>>, %arg2: memref<1x16x32xf32, #tpu.memory_space<vmem>>, %arg3: memref<16x32xf32, #tpu.memory_space<vmem>>, %arg4: memref<16x32xf32, #tpu.memory_space<vmem>>, %arg5: memref<32x512xbf16, #tpu.memory_space<vmem>>, %arg6: memref<1x576xf32, #tpu.memory_space<vmem>>, %arg7: memref<1x16x32xf32, #tpu.memory_space<vmem>>) attributes {dimension_semantics = [#tpu.dimension_semantics<parallel>], iteration_bounds = array<i64: 2>, scalar_prefetch = 0 : i64, scratch_operands = 0 : i64, tpu.core_type = #tpu.core_type<tc>, window_params = [{transform_indices = @transform_0, window_bounds = array<i64: 1, 16, 32>}, {transform_indices = @transform_1, window_bounds = array<i64: 1, 16, 32>}, {pipeline_mode = #tpu.pipeline_mode<synchronous>, transform_indices = @transform_2, window_bounds = array<i64: 16, 32>}, {pipeline_mode = #tpu.pipeline_mode<synchronous>, transform_indices = @transform_3, window_bounds = array<i64: 16, 32>}, {pipeline_mode = #tpu.pipeline_mode<synchronous>, transform_indices = @transform_4, window_bounds = array<i64: 32, 512>}, {pipeline_mode = #tpu.pipeline_mode<synchronous>, transform_indices = @transform_5, window_bounds = array<i64: 1, 576>}, {transform_indices = @transform_6, window_bounds = array<i64: 1, 16, 32>}]} {
    %c0 = arith.constant 0 : index
    %c0_0 = arith.constant 0 : index
    %c0_1 = arith.constant 0 : index
    %0 = vector.load %arg1[%c0, %c0_0, %c0_1] : memref<1x16x32xf32, #tpu.memory_space<vmem>>, vector<1x16x32xf32>
    %c0_2 = arith.constant 0 : index
    %c0_3 = arith.constant 0 : index
    %1 = vector.load %arg3[%c0_2, %c0_3] : memref<16x32xf32, #tpu.memory_space<vmem>>, vector<16x32xf32>
    %2 = vector.shape_cast %1 : vector<16x32xf32> to vector<1x16x32xf32>
    %3 = arith.addf %0, %2 : vector<1x16x32xf32>
    %4 = vector.shape_cast %3 : vector<1x16x32xf32> to vector<16x32xf32>
    %c0_4 = arith.constant 0 : index
    %c0_5 = arith.constant 0 : index
    %c0_6 = arith.constant 0 : index
    %5 = vector.load %arg2[%c0_4, %c0_5, %c0_6] : memref<1x16x32xf32, #tpu.memory_space<vmem>>, vector<1x16x32xf32>
    %c0_7 = arith.constant 0 : index
    %c0_8 = arith.constant 0 : index
    %6 = vector.load %arg4[%c0_7, %c0_8] : memref<16x32xf32, #tpu.memory_space<vmem>>, vector<16x32xf32>
    %7 = vector.shape_cast %6 : vector<16x32xf32> to vector<1x16x32xf32>
    %8 = arith.addf %5, %7 : vector<1x16x32xf32>
    %9 = vector.shape_cast %8 : vector<1x16x32xf32> to vector<16x32xf32>
    %10 = arith.truncf %4 : vector<16x32xf32> to vector<16x32xbf16>
    %c0_9 = arith.constant 0 : index
    %c0_10 = arith.constant 0 : index
    %11 = vector.load %arg5[%c0_9, %c0_10] : memref<32x512xbf16, #tpu.memory_space<vmem>>, vector<32x64xbf16>
    %cst = arith.constant dense<0.000000e+00> : vector<16x64xf32>
    %12 = tpu.matmul %10, %11, %cst {dimension_numbers = #tpu.dot_dimension_numbers<[1], [0], [0], [1], [0, 0, 1, 1], [], []>} : vector<16x32xbf16>, vector<32x64xbf16>, vector<16x64xf32> -> vector<16x64xf32>
    %c0_11 = arith.constant 0 : index
    %c0_12 = arith.constant 0 : index
    %13 = vector.load %arg6[%c0_11, %c0_12] : memref<1x576xf32, #tpu.memory_space<vmem>>, vector<1x64xf32>
    %14 = vector.broadcast %13 : vector<1x64xf32> to vector<16x64xf32>
    %15 = arith.addf %12, %14 : vector<16x64xf32>
    %16 = arith.truncf %9 : vector<16x32xf32> to vector<16x32xbf16>
    %c0_13 = arith.constant 0 : index
    %c64 = arith.constant 64 : index
    %17 = vector.load %arg5[%c0_13, %c64] : memref<32x512xbf16, #tpu.memory_space<vmem>>, vector<32x64xbf16>
    %cst_14 = arith.constant dense<0.000000e+00> : vector<16x64xf32>
    %18 = tpu.matmul %16, %17, %cst_14 {dimension_numbers = #tpu.dot_dimension_numbers<[1], [0], [0], [1], [0, 0, 1, 1], [], []>} : vector<16x32xbf16>, vector<32x64xbf16>, vector<16x64xf32> -> vector<16x64xf32>
    %c0_15 = arith.constant 0 : index
    %c64_16 = arith.constant 64 : index
    %19 = vector.load %arg6[%c0_15, %c64_16] : memref<1x576xf32, #tpu.memory_space<vmem>>, vector<1x64xf32>
    %20 = vector.broadcast %19 : vector<1x64xf32> to vector<16x64xf32>
    %21 = arith.addf %18, %20 : vector<16x64xf32>
    %22 = vector.extract_strided_slice %15 {offsets = [0, 0], sizes = [16, 32], strides = [1, 1]} : vector<16x64xf32> to vector<16x32xf32>
    %23 = vector.extract_strided_slice %21 {offsets = [0, 0], sizes = [16, 32], strides = [1, 1]} : vector<16x64xf32> to vector<16x32xf32>
    %24 = vector.extract_strided_slice %21 {offsets = [0, 32], sizes = [16, 32], strides = [1, 1]} : vector<16x64xf32> to vector<16x32xf32>
    %25 = vector.shape_cast %22 : vector<16x32xf32> to vector<1x16x4x8xf32>
    %26 = tpu.transpose %25, [0, 2, 1, 3] : vector<1x16x4x8xf32> -> vector<1x4x16x8xf32>
    %27 = vector.shape_cast %26 : vector<1x4x16x8xf32> to vector<4x16x8xf32>
    %28 = arith.truncf %27 : vector<4x16x8xf32> to vector<4x16x8xbf16>
    %29 = vector.shape_cast %23 : vector<16x32xf32> to vector<1x16x4x8xf32>
    %30 = tpu.transpose %29, [0, 2, 1, 3] : vector<1x16x4x8xf32> -> vector<1x4x16x8xf32>
    %31 = vector.shape_cast %30 : vector<1x4x16x8xf32> to vector<4x16x8xf32>
    %32 = arith.truncf %31 : vector<4x16x8xf32> to vector<4x16x8xbf16>
    %33 = vector.shape_cast %24 : vector<16x32xf32> to vector<1x16x4x8xf32>
    %34 = tpu.transpose %33, [0, 2, 1, 3] : vector<1x16x4x8xf32> -> vector<1x4x16x8xf32>
    %35 = vector.shape_cast %34 : vector<1x4x16x8xf32> to vector<4x16x8xf32>
    %36 = arith.truncf %35 : vector<4x16x8xf32> to vector<4x16x8xbf16>
    %cst_17 = arith.constant dense<0.000000e+00> : vector<4x16x16xf32>
    %37 = tpu.matmul %28, %32, %cst_17 {dimension_numbers = #tpu.dot_dimension_numbers<[2], [2], [1], [1], [0, 0, 0, 1, 1, 1], [0], [0]>} : vector<4x16x8xbf16>, vector<4x16x8xbf16>, vector<4x16x16xf32> -> vector<4x16x16xf32>
    %cst_18 = arith.constant dense<0xFF800000> : vector<4x16xf32>
    %38 = vector.multi_reduction <maximumf>, %37, %cst_18 [2] : vector<4x16x16xf32> to vector<4x16xf32>
    %39 = vector.shape_cast %38 : vector<4x16xf32> to vector<4x16x1xf32>
    %40 = vector.broadcast %39 : vector<4x16x1xf32> to vector<4x16x16xf32>
    %41 = arith.subf %37, %40 : vector<4x16x16xf32>
    %42 = math.exp %41 : vector<4x16x16xf32>
    %cst_19 = arith.constant dense<0.000000e+00> : vector<4x16xf32>
    %43 = vector.multi_reduction <add>, %42, %cst_19 [2] : vector<4x16x16xf32> to vector<4x16xf32>
    %44 = vector.shape_cast %43 : vector<4x16xf32> to vector<4x16x1xf32>
    %45 = tpu.reciprocal %44 {approx = true} : vector<4x16x1xf32> -> vector<4x16x1xf32>
    %46 = vector.broadcast %45 : vector<4x16x1xf32> to vector<4x16x16xf32>
    %47 = arith.mulf %42, %46 : vector<4x16x16xf32>
    %48 = arith.truncf %47 : vector<4x16x16xf32> to vector<4x16x16xbf16>
    %cst_20 = arith.constant dense<0.000000e+00> : vector<4x16x8xf32>
    %49 = tpu.matmul %48, %36, %cst_20 {dimension_numbers = #tpu.dot_dimension_numbers<[2], [1], [1], [2], [0, 0, 0, 1, 1, 2], [0], [0]>} : vector<4x16x16xbf16>, vector<4x16x8xbf16>, vector<4x16x8xf32> -> vector<4x16x8xf32>
    %50 = vector.shape_cast %49 : vector<4x16x8xf32> to vector<1x4x16x8xf32>
    %51 = tpu.transpose %50, [0, 2, 1, 3] : vector<1x4x16x8xf32> -> vector<1x16x4x8xf32>
    %52 = vector.shape_cast %51 : vector<1x16x4x8xf32> to vector<16x32xf32>
    %53 = vector.extract_strided_slice %15 {offsets = [0, 32], sizes = [16, 32], strides = [1, 1]} : vector<16x64xf32> to vector<16x32xf32>
    %54 = arith.addf %52, %53 : vector<16x32xf32>
    %55 = arith.truncf %54 : vector<16x32xf32> to vector<16x32xbf16>
    %c0_21 = arith.constant 0 : index
    %c128 = arith.constant 128 : index
    %56 = vector.load %arg5[%c0_21, %c128] : memref<32x512xbf16, #tpu.memory_space<vmem>>, vector<32x32xbf16>
    %cst_22 = arith.constant dense<0.000000e+00> : vector<16x32xf32>
    %57 = tpu.matmul %55, %56, %cst_22 {dimension_numbers = #tpu.dot_dimension_numbers<[1], [0], [0], [1], [0, 0, 1, 1], [], []>} : vector<16x32xbf16>, vector<32x32xbf16>, vector<16x32xf32> -> vector<16x32xf32>
    %c0_23 = arith.constant 0 : index
    %c128_24 = arith.constant 128 : index
    %58 = vector.load %arg6[%c0_23, %c128_24] : memref<1x576xf32, #tpu.memory_space<vmem>>, vector<1x32xf32>
    %59 = vector.broadcast %58 : vector<1x32xf32> to vector<16x32xf32>
    %60 = arith.addf %57, %59 : vector<16x32xf32>
    %61 = arith.addf %4, %60 : vector<16x32xf32>
    %cst_25 = arith.constant dense<0.000000e+00> : vector<16xf32>
    %62 = vector.multi_reduction <add>, %61, %cst_25 [1] : vector<16x32xf32> to vector<16xf32>
    %63 = vector.shape_cast %62 : vector<16xf32> to vector<16x1xf32>
    %64 = arith.mulf %61, %61 : vector<16x32xf32>
    %cst_26 = arith.constant dense<0.000000e+00> : vector<16xf32>
    %65 = vector.multi_reduction <add>, %64, %cst_26 [1] : vector<16x32xf32> to vector<16xf32>
    %66 = vector.shape_cast %65 : vector<16xf32> to vector<16x1xf32>
    %cst_27 = arith.constant 3.125000e-02 : f32
    %67 = vector.broadcast %cst_27 : f32 to vector<16x1xf32>
    %68 = arith.mulf %63, %67 : vector<16x1xf32>
    %69 = arith.mulf %63, %68 : vector<16x1xf32>
    %70 = arith.subf %66, %69 : vector<16x1xf32>
    %cst_28 = arith.constant 0.0322580636 : f32
    %71 = vector.broadcast %cst_28 : f32 to vector<16x1xf32>
    %72 = arith.mulf %70, %71 : vector<16x1xf32>
    %cst_29 = arith.constant 0.000000e+00 : f32
    %73 = vector.broadcast %cst_29 : f32 to vector<16x1xf32>
    %74 = arith.maximumf %72, %73 : vector<16x1xf32>
    %c0_30 = arith.constant 0 : index
    %c512 = arith.constant 512 : index
    %75 = vector.load %arg6[%c0_30, %c512] : memref<1x576xf32, #tpu.memory_space<vmem>>, vector<1x32xf32>
    %c0_31 = arith.constant 0 : index
    %c544 = arith.constant 544 : index
    %76 = vector.load %arg6[%c0_31, %c544] : memref<1x576xf32, #tpu.memory_space<vmem>>, vector<1x32xf32>
    %77 = vector.broadcast %68 : vector<16x1xf32> to vector<16x32xf32>
    %78 = arith.subf %61, %77 : vector<16x32xf32>
    %79 = vector.broadcast %75 : vector<1x32xf32> to vector<16x32xf32>
    %80 = arith.mulf %79, %78 : vector<16x32xf32>
    %81 = math.sqrt %74 : vector<16x1xf32>
    %cst_32 = arith.constant 9.99999997E-7 : f32
    %82 = vector.broadcast %cst_32 : f32 to vector<16x1xf32>
    %83 = arith.addf %81, %82 : vector<16x1xf32>
    %84 = tpu.reciprocal %83 {approx = true} : vector<16x1xf32> -> vector<16x1xf32>
    %85 = vector.broadcast %84 : vector<16x1xf32> to vector<16x32xf32>
    %86 = arith.mulf %80, %85 : vector<16x32xf32>
    %87 = vector.broadcast %76 : vector<1x32xf32> to vector<16x32xf32>
    %88 = arith.addf %86, %87 : vector<16x32xf32>
    %89 = arith.truncf %88 : vector<16x32xf32> to vector<16x32xbf16>
    %c0_33 = arith.constant 0 : index
    %c160 = arith.constant 160 : index
    %90 = vector.load %arg5[%c0_33, %c160] : memref<32x512xbf16, #tpu.memory_space<vmem>>, vector<32x32xbf16>
    %cst_34 = arith.constant dense<0.000000e+00> : vector<16x32xf32>
    %91 = tpu.matmul %89, %90, %cst_34 {dimension_numbers = #tpu.dot_dimension_numbers<[1], [0], [0], [1], [0, 0, 1, 1], [], []>} : vector<16x32xbf16>, vector<32x32xbf16>, vector<16x32xf32> -> vector<16x32xf32>
    %c0_35 = arith.constant 0 : index
    %c160_36 = arith.constant 160 : index
    %92 = vector.load %arg6[%c0_35, %c160_36] : memref<1x576xf32, #tpu.memory_space<vmem>>, vector<1x32xf32>
    %93 = vector.broadcast %92 : vector<1x32xf32> to vector<16x32xf32>
    %94 = arith.addf %91, %93 : vector<16x32xf32>
    %cst_37 = arith.constant 0.000000e+00 : f32
    %95 = vector.broadcast %cst_37 : f32 to vector<16x32xf32>
    %96 = arith.cmpf oge, %94, %95 : vector<16x32xf32>
    %cst_38 = arith.constant 0.00999999977 : f32
    %97 = vector.broadcast %cst_38 : f32 to vector<16x32xf32>
    %98 = arith.mulf %97, %94 : vector<16x32xf32>
    %99 = arith.select %96, %94, %98 : vector<16x32xi1>, vector<16x32xf32>
    %100 = arith.truncf %99 : vector<16x32xf32> to vector<16x32xbf16>
    %c0_39 = arith.constant 0 : index
    %c192 = arith.constant 192 : index
    %101 = vector.load %arg5[%c0_39, %c192] : memref<32x512xbf16, #tpu.memory_space<vmem>>, vector<32x32xbf16>
    %cst_40 = arith.constant dense<0.000000e+00> : vector<16x32xf32>
    %102 = tpu.matmul %100, %101, %cst_40 {dimension_numbers = #tpu.dot_dimension_numbers<[1], [0], [0], [1], [0, 0, 1, 1], [], []>} : vector<16x32xbf16>, vector<32x32xbf16>, vector<16x32xf32> -> vector<16x32xf32>
    %c0_41 = arith.constant 0 : index
    %c192_42 = arith.constant 192 : index
    %103 = vector.load %arg6[%c0_41, %c192_42] : memref<1x576xf32, #tpu.memory_space<vmem>>, vector<1x32xf32>
    %104 = vector.broadcast %103 : vector<1x32xf32> to vector<16x32xf32>
    %105 = arith.addf %102, %104 : vector<16x32xf32>
    %cst_43 = arith.constant 0.000000e+00 : f32
    %106 = vector.broadcast %cst_43 : f32 to vector<16x32xf32>
    %107 = arith.cmpf oge, %105, %106 : vector<16x32xf32>
    %cst_44 = arith.constant 0.00999999977 : f32
    %108 = vector.broadcast %cst_44 : f32 to vector<16x32xf32>
    %109 = arith.mulf %108, %105 : vector<16x32xf32>
    %110 = arith.select %107, %105, %109 : vector<16x32xi1>, vector<16x32xf32>
    %111 = arith.truncf %110 : vector<16x32xf32> to vector<16x32xbf16>
    %c0_45 = arith.constant 0 : index
    %c224 = arith.constant 224 : index
    %112 = vector.load %arg5[%c0_45, %c224] : memref<32x512xbf16, #tpu.memory_space<vmem>>, vector<32x32xbf16>
    %cst_46 = arith.constant dense<0.000000e+00> : vector<16x32xf32>
    %113 = tpu.matmul %111, %112, %cst_46 {dimension_numbers = #tpu.dot_dimension_numbers<[1], [0], [0], [1], [0, 0, 1, 1], [], []>} : vector<16x32xbf16>, vector<32x32xbf16>, vector<16x32xf32> -> vector<16x32xf32>
    %c0_47 = arith.constant 0 : index
    %c224_48 = arith.constant 224 : index
    %114 = vector.load %arg6[%c0_47, %c224_48] : memref<1x576xf32, #tpu.memory_space<vmem>>, vector<1x32xf32>
    %115 = vector.broadcast %114 : vector<1x32xf32> to vector<16x32xf32>
    %116 = arith.addf %113, %115 : vector<16x32xf32>
    %cst_49 = arith.constant 0.000000e+00 : f32
    %117 = vector.broadcast %cst_49 : f32 to vector<16x32xf32>
    %118 = arith.cmpf oge, %116, %117 : vector<16x32xf32>
    %cst_50 = arith.constant 0.00999999977 : f32
    %119 = vector.broadcast %cst_50 : f32 to vector<16x32xf32>
    %120 = arith.mulf %119, %116 : vector<16x32xf32>
    %121 = arith.select %118, %116, %120 : vector<16x32xi1>, vector<16x32xf32>
    %122 = arith.addf %88, %121 : vector<16x32xf32>
    %123 = arith.truncf %122 : vector<16x32xf32> to vector<16x32xbf16>
    %c0_51 = arith.constant 0 : index
    %c256 = arith.constant 256 : index
    %124 = vector.load %arg5[%c0_51, %c256] : memref<32x512xbf16, #tpu.memory_space<vmem>>, vector<32x96xbf16>
    %cst_52 = arith.constant dense<0.000000e+00> : vector<16x96xf32>
    %125 = tpu.matmul %123, %124, %cst_52 {dimension_numbers = #tpu.dot_dimension_numbers<[1], [0], [0], [1], [0, 0, 1, 1], [], []>} : vector<16x32xbf16>, vector<32x96xbf16>, vector<16x96xf32> -> vector<16x96xf32>
    %c0_53 = arith.constant 0 : index
    %c256_54 = arith.constant 256 : index
    %126 = vector.load %arg6[%c0_53, %c256_54] : memref<1x576xf32, #tpu.memory_space<vmem>>, vector<1x96xf32>
    %127 = vector.broadcast %126 : vector<1x96xf32> to vector<16x96xf32>
    %128 = arith.addf %125, %127 : vector<16x96xf32>
    %129 = vector.extract_strided_slice %128 {offsets = [0, 0], sizes = [16, 32], strides = [1, 1]} : vector<16x96xf32> to vector<16x32xf32>
    %130 = vector.extract_strided_slice %128 {offsets = [0, 32], sizes = [16, 32], strides = [1, 1]} : vector<16x96xf32> to vector<16x32xf32>
    %131 = vector.extract_strided_slice %128 {offsets = [0, 64], sizes = [16, 32], strides = [1, 1]} : vector<16x96xf32> to vector<16x32xf32>
    %132 = vector.shape_cast %129 : vector<16x32xf32> to vector<1x16x4x8xf32>
    %133 = tpu.transpose %132, [0, 2, 1, 3] : vector<1x16x4x8xf32> -> vector<1x4x16x8xf32>
    %134 = vector.shape_cast %133 : vector<1x4x16x8xf32> to vector<4x16x8xf32>
    %135 = arith.truncf %134 : vector<4x16x8xf32> to vector<4x16x8xbf16>
    %136 = vector.shape_cast %130 : vector<16x32xf32> to vector<1x16x4x8xf32>
    %137 = tpu.transpose %136, [0, 2, 1, 3] : vector<1x16x4x8xf32> -> vector<1x4x16x8xf32>
    %138 = vector.shape_cast %137 : vector<1x4x16x8xf32> to vector<4x16x8xf32>
    %139 = arith.truncf %138 : vector<4x16x8xf32> to vector<4x16x8xbf16>
    %140 = vector.shape_cast %131 : vector<16x32xf32> to vector<1x16x4x8xf32>
    %141 = tpu.transpose %140, [0, 2, 1, 3] : vector<1x16x4x8xf32> -> vector<1x4x16x8xf32>
    %142 = vector.shape_cast %141 : vector<1x4x16x8xf32> to vector<4x16x8xf32>
    %143 = arith.truncf %142 : vector<4x16x8xf32> to vector<4x16x8xbf16>
    %cst_55 = arith.constant dense<0.000000e+00> : vector<4x16x16xf32>
    %144 = tpu.matmul %135, %139, %cst_55 {dimension_numbers = #tpu.dot_dimension_numbers<[2], [2], [1], [1], [0, 0, 0, 1, 1, 1], [0], [0]>} : vector<4x16x8xbf16>, vector<4x16x8xbf16>, vector<4x16x16xf32> -> vector<4x16x16xf32>
    %cst_56 = arith.constant 0.353553385 : f32
    %145 = vector.broadcast %cst_56 : f32 to vector<4x16x16xf32>
    %146 = arith.mulf %144, %145 : vector<4x16x16xf32>
    %cst_57 = arith.constant dense<0xFF800000> : vector<4x16xf32>
    %147 = vector.multi_reduction <maximumf>, %146, %cst_57 [2] : vector<4x16x16xf32> to vector<4x16xf32>
    %148 = vector.shape_cast %147 : vector<4x16xf32> to vector<4x16x1xf32>
    %149 = vector.broadcast %148 : vector<4x16x1xf32> to vector<4x16x16xf32>
    %150 = arith.subf %146, %149 : vector<4x16x16xf32>
    %151 = math.exp %150 : vector<4x16x16xf32>
    %cst_58 = arith.constant dense<0.000000e+00> : vector<4x16xf32>
    %152 = vector.multi_reduction <add>, %151, %cst_58 [2] : vector<4x16x16xf32> to vector<4x16xf32>
    %153 = vector.shape_cast %152 : vector<4x16xf32> to vector<4x16x1xf32>
    %154 = tpu.reciprocal %153 {approx = true} : vector<4x16x1xf32> -> vector<4x16x1xf32>
    %155 = vector.broadcast %154 : vector<4x16x1xf32> to vector<4x16x16xf32>
    %156 = arith.mulf %151, %155 : vector<4x16x16xf32>
    %157 = arith.truncf %156 : vector<4x16x16xf32> to vector<4x16x16xbf16>
    %cst_59 = arith.constant dense<0.000000e+00> : vector<4x16x8xf32>
    %158 = tpu.matmul %157, %143, %cst_59 {dimension_numbers = #tpu.dot_dimension_numbers<[2], [1], [1], [2], [0, 0, 0, 1, 1, 2], [0], [0]>} : vector<4x16x16xbf16>, vector<4x16x8xbf16>, vector<4x16x8xf32> -> vector<4x16x8xf32>
    %159 = vector.shape_cast %158 : vector<4x16x8xf32> to vector<1x4x16x8xf32>
    %160 = tpu.transpose %159, [0, 2, 1, 3] : vector<1x4x16x8xf32> -> vector<1x16x4x8xf32>
    %161 = vector.shape_cast %160 : vector<1x16x4x8xf32> to vector<16x32xf32>
    %162 = arith.truncf %161 : vector<16x32xf32> to vector<16x32xbf16>
    %c0_60 = arith.constant 0 : index
    %c352 = arith.constant 352 : index
    %163 = vector.load %arg5[%c0_60, %c352] : memref<32x512xbf16, #tpu.memory_space<vmem>>, vector<32x32xbf16>
    %cst_61 = arith.constant dense<0.000000e+00> : vector<16x32xf32>
    %164 = tpu.matmul %162, %163, %cst_61 {dimension_numbers = #tpu.dot_dimension_numbers<[1], [0], [0], [1], [0, 0, 1, 1], [], []>} : vector<16x32xbf16>, vector<32x32xbf16>, vector<16x32xf32> -> vector<16x32xf32>
    %c0_62 = arith.constant 0 : index
    %c352_63 = arith.constant 352 : index
    %165 = vector.load %arg6[%c0_62, %c352_63] : memref<1x576xf32, #tpu.memory_space<vmem>>, vector<1x32xf32>
    %166 = vector.broadcast %165 : vector<1x32xf32> to vector<16x32xf32>
    %167 = arith.addf %164, %166 : vector<16x32xf32>
    %168 = arith.truncf %167 : vector<16x32xf32> to vector<16x32xbf16>
    %c0_64 = arith.constant 0 : index
    %c384 = arith.constant 384 : index
    %169 = vector.load %arg5[%c0_64, %c384] : memref<32x512xbf16, #tpu.memory_space<vmem>>, vector<32x96xbf16>
    %cst_65 = arith.constant dense<0.000000e+00> : vector<16x96xf32>
    %170 = tpu.matmul %168, %169, %cst_65 {dimension_numbers = #tpu.dot_dimension_numbers<[1], [0], [0], [1], [0, 0, 1, 1], [], []>} : vector<16x32xbf16>, vector<32x96xbf16>, vector<16x96xf32> -> vector<16x96xf32>
    %c0_66 = arith.constant 0 : index
    %c384_67 = arith.constant 384 : index
    %171 = vector.load %arg6[%c0_66, %c384_67] : memref<1x576xf32, #tpu.memory_space<vmem>>, vector<1x96xf32>
    %172 = vector.broadcast %171 : vector<1x96xf32> to vector<16x96xf32>
    %173 = arith.addf %170, %172 : vector<16x96xf32>
    %174 = vector.extract_strided_slice %173 {offsets = [0, 0], sizes = [16, 32], strides = [1, 1]} : vector<16x96xf32> to vector<16x32xf32>
    %175 = vector.extract_strided_slice %173 {offsets = [0, 32], sizes = [16, 32], strides = [1, 1]} : vector<16x96xf32> to vector<16x32xf32>
    %176 = vector.extract_strided_slice %173 {offsets = [0, 64], sizes = [16, 32], strides = [1, 1]} : vector<16x96xf32> to vector<16x32xf32>
    %177 = vector.shape_cast %174 : vector<16x32xf32> to vector<1x16x4x8xf32>
    %178 = tpu.transpose %177, [0, 2, 1, 3] : vector<1x16x4x8xf32> -> vector<1x4x16x8xf32>
    %179 = vector.shape_cast %178 : vector<1x4x16x8xf32> to vector<4x16x8xf32>
    %180 = arith.truncf %179 : vector<4x16x8xf32> to vector<4x16x8xbf16>
    %181 = vector.shape_cast %175 : vector<16x32xf32> to vector<1x16x4x8xf32>
    %182 = tpu.transpose %181, [0, 2, 1, 3] : vector<1x16x4x8xf32> -> vector<1x4x16x8xf32>
    %183 = vector.shape_cast %182 : vector<1x4x16x8xf32> to vector<4x16x8xf32>
    %184 = arith.truncf %183 : vector<4x16x8xf32> to vector<4x16x8xbf16>
    %185 = vector.shape_cast %176 : vector<16x32xf32> to vector<1x16x4x8xf32>
    %186 = tpu.transpose %185, [0, 2, 1, 3] : vector<1x16x4x8xf32> -> vector<1x4x16x8xf32>
    %187 = vector.shape_cast %186 : vector<1x4x16x8xf32> to vector<4x16x8xf32>
    %188 = arith.truncf %187 : vector<4x16x8xf32> to vector<4x16x8xbf16>
    %cst_68 = arith.constant dense<0.000000e+00> : vector<4x16x16xf32>
    %189 = tpu.matmul %180, %184, %cst_68 {dimension_numbers = #tpu.dot_dimension_numbers<[2], [2], [1], [1], [0, 0, 0, 1, 1, 1], [0], [0]>} : vector<4x16x8xbf16>, vector<4x16x8xbf16>, vector<4x16x16xf32> -> vector<4x16x16xf32>
    %cst_69 = arith.constant 0.353553385 : f32
    %190 = vector.broadcast %cst_69 : f32 to vector<4x16x16xf32>
    %191 = arith.mulf %189, %190 : vector<4x16x16xf32>
    %cst_70 = arith.constant dense<0xFF800000> : vector<4x16xf32>
    %192 = vector.multi_reduction <maximumf>, %191, %cst_70 [2] : vector<4x16x16xf32> to vector<4x16xf32>
    %193 = vector.shape_cast %192 : vector<4x16xf32> to vector<4x16x1xf32>
    %194 = vector.broadcast %193 : vector<4x16x1xf32> to vector<4x16x16xf32>
    %195 = arith.subf %191, %194 : vector<4x16x16xf32>
    %196 = math.exp %195 : vector<4x16x16xf32>
    %cst_71 = arith.constant dense<0.000000e+00> : vector<4x16xf32>
    %197 = vector.multi_reduction <add>, %196, %cst_71 [2] : vector<4x16x16xf32> to vector<4x16xf32>
    %198 = vector.shape_cast %197 : vector<4x16xf32> to vector<4x16x1xf32>
    %199 = tpu.reciprocal %198 {approx = true} : vector<4x16x1xf32> -> vector<4x16x1xf32>
    %200 = vector.broadcast %199 : vector<4x16x1xf32> to vector<4x16x16xf32>
    %201 = arith.mulf %196, %200 : vector<4x16x16xf32>
    %202 = arith.truncf %201 : vector<4x16x16xf32> to vector<4x16x16xbf16>
    %cst_72 = arith.constant dense<0.000000e+00> : vector<4x16x8xf32>
    %203 = tpu.matmul %202, %188, %cst_72 {dimension_numbers = #tpu.dot_dimension_numbers<[2], [1], [1], [2], [0, 0, 0, 1, 1, 2], [0], [0]>} : vector<4x16x16xbf16>, vector<4x16x8xbf16>, vector<4x16x8xf32> -> vector<4x16x8xf32>
    %204 = vector.shape_cast %203 : vector<4x16x8xf32> to vector<1x4x16x8xf32>
    %205 = tpu.transpose %204, [0, 2, 1, 3] : vector<1x4x16x8xf32> -> vector<1x16x4x8xf32>
    %206 = vector.shape_cast %205 : vector<1x16x4x8xf32> to vector<16x32xf32>
    %207 = arith.truncf %206 : vector<16x32xf32> to vector<16x32xbf16>
    %c0_73 = arith.constant 0 : index
    %c480 = arith.constant 480 : index
    %208 = vector.load %arg5[%c0_73, %c480] : memref<32x512xbf16, #tpu.memory_space<vmem>>, vector<32x32xbf16>
    %cst_74 = arith.constant dense<0.000000e+00> : vector<16x32xf32>
    %209 = tpu.matmul %207, %208, %cst_74 {dimension_numbers = #tpu.dot_dimension_numbers<[1], [0], [0], [1], [0, 0, 1, 1], [], []>} : vector<16x32xbf16>, vector<32x32xbf16>, vector<16x32xf32> -> vector<16x32xf32>
    %c0_75 = arith.constant 0 : index
    %c480_76 = arith.constant 480 : index
    %210 = vector.load %arg6[%c0_75, %c480_76] : memref<1x576xf32, #tpu.memory_space<vmem>>, vector<1x32xf32>
    %211 = vector.broadcast %210 : vector<1x32xf32> to vector<16x32xf32>
    %212 = arith.addf %209, %211 : vector<16x32xf32>
    %213 = vector.shape_cast %212 : vector<16x32xf32> to vector<1x16x32xf32>
    %c0_77 = arith.constant 0 : index
    %c0_78 = arith.constant 0 : index
    %c0_79 = arith.constant 0 : index
    %214 = vector.load %arg7[%c0_77, %c0_78, %c0_79] : memref<1x16x32xf32, #tpu.memory_space<vmem>>, vector<1x16x32xf32>
    tpu.vector_store %arg7[%c0_77, %c0_78, %c0_79], %213 {strides = array<i32>} : memref<1x16x32xf32, #tpu.memory_space<vmem>>, vector<1x16x32xf32>,
    return
  }
  func.func @transform_0(%arg0: i32) -> (i32, i32, i32) {
    %c0_i32 = arith.constant 0 : i32
    %c0_i32_0 = arith.constant 0 : i32
    %c0_i32_1 = arith.constant 0 : i32
    return %arg0, %c0_i32, %c0_i32_0 : i32, i32, i32
  }
  func.func @transform_1(%arg0: i32) -> (i32, i32, i32) {
    %c0_i32 = arith.constant 0 : i32
    %c0_i32_0 = arith.constant 0 : i32
    %c0_i32_1 = arith.constant 0 : i32
    return %arg0, %c0_i32, %c0_i32_0 : i32, i32, i32
  }
  func.func @transform_2(%arg0: i32) -> (i32, i32) {
    %c0_i32 = arith.constant 0 : i32
    %c0_i32_0 = arith.constant 0 : i32
    %c0_i32_1 = arith.constant 0 : i32
    return %c0_i32, %c0_i32_0 : i32, i32
  }
  func.func @transform_3(%arg0: i32) -> (i32, i32) {
    %c0_i32 = arith.constant 0 : i32
    %c0_i32_0 = arith.constant 0 : i32
    %c0_i32_1 = arith.constant 0 : i32
    return %c0_i32, %c0_i32_0 : i32, i32
  }
  func.func @transform_4(%arg0: i32) -> (i32, i32) {
    %c0_i32 = arith.constant 0 : i32
    %c0_i32_0 = arith.constant 0 : i32
    %c0_i32_1 = arith.constant 0 : i32
    return %c0_i32, %c0_i32_0 : i32, i32
  }
  func.func @transform_5(%arg0: i32) -> (i32, i32) {
    %c0_i32 = arith.constant 0 : i32
    %c0_i32_0 = arith.constant 0 : i32
    %c0_i32_1 = arith.constant 0 : i32
    return %c0_i32, %c0_i32_0 : i32, i32
  }
  func.func @transform_6(%arg0: i32) -> (i32, i32, i32) {
    %c0_i32 = arith.constant 0 : i32
    %c0_i32_0 = arith.constant 0 : i32
    %c0_i32_1 = arith.constant 0 : i32
    return %arg0, %c0_i32, %c0_i32_0 : i32, i32, i32
  }
}

</mosaic_0001>

<bundles_post_ra>
// kernel: flowface_forward.1
= control target key start
LH: loop header
LB: loop body
LE: loop exit
PB: predicated region body
PF: predicated region fallthrough
CT: control target
= control target key end

     0   :  { %11 = vsyncpa [#allocation3], 0  ;;  %s8130_s0 = inlined_call_operand.vmem [shape: f32[2,16,32], index: 0, kind: input, shape index: {}]   ;;  %s8131_s1 = inlined_call_operand.vmem [shape: f32[2,16,32], index: 1, kind: input, shape index: {}]   ;;  %s8132_s2 = inlined_call_operand.vmem [shape: f32[16,32], index: 2, kind: input, shape index: {}]   ;;  %s8133_s3 = inlined_call_operand.vmem [shape: f32[16,32], index: 3, kind: input, shape index: {}]   ;;  %s8134_s4 = inlined_call_operand.vmem [shape: bf16[32,512], index: 4, kind: input, shape index: {}]   ;;  %s8135_s5 = inlined_call_operand.vmem [shape: f32[1,576], index: 5, kind: input, shape index: {}]   ;;  %s8136_s6 = inlined_call_operand.hbm [shape: f32[2,16,32], index: 6, kind: output, shape index: {}]  }
   0x1   :  { %13 = vsyncpa [#allocation3 + $0x1], 0  ;;  %s6810_s21 = smov 0   ;;  %s6812_s22 = smov 0  }
   0x2   :  { %s6814_s23 = smov 0   ;;  %s6816_s24 = smov 0  }
   0x3 LB: > { %s6831_s25 = sadd.s32 4294967295, %s6758_s24   ;;  %s6077_s26 = sadd.s32 4294967294, %s6758_s24   ;;  %s6758_s24 = sphi %s6816_s24, %s8142_s24   ;;  %s6754_s23 = sphi %s6814_s23, %s8141_s23   ;;  %s6750_s22 = sphi %s6812_s22, %s8140_s22   ;;  %s6746_s21 = sphi %s6810_s21, %s8139_s21  }
   0x4   : > { %s6835_s27 = sadd.s32 1, %s6758_s24   ;;  %s162_s28 = sadd.s32 1, %s6754_s23 }
   0x5   : > { %s159_s29 = ssub.s32 %s6758_s24, %s6835_s27  ;;  %p172_p0 = scmp.ne.s32.totalorder %s6754_s23, %s6750_s22 }
   0x6   : > { %p160_p1 = scmp.eq.s32.totalorder %s159_s29, 0  ;;  %p173_p2 = scmp.eq.s32.totalorder %s6831_s25, 1 }
   0x7   : > { %p178_p3 = scmp.ne.s32.totalorder %s6750_s22, %s6746_s21  ;;  %p179_p4 = scmp.eq.s32.totalorder %s6077_s26, 1 }
   0x8   : > { %s6846_s30 = scalar_select %p160_p1, %s6754_s23, %s162_s28  }
   0x9   : > { %p6848_p5 = por %p173_p2, %p172_p0  ;;  %p6852_p6 = por %p179_p4, %p178_p3 }
   0xa   : > { %p6080_p7 = scmp.ge.s32.totalorder %s6758_s24, 1  ;;  %p225_p8 = scmp.lt.s32.totalorder %s6758_s24, 3 }
   0xc   : > { %p226_p9 = pnand %p6080_p7, %p225_p8 }
   0xd   : > { %v6580_v0 = vld [vmem:[%s8134_s4] ss:$16 sps:$4 sm:$0xff] (!%p226_p9)   ;;  %s6760_s11 = smov (!%p226_p9), 64   ;;  %v6761_v2 = vmov (!%p226_p9), 0.0   ;;  %p260_p10 = scmp.lt.s32.totalorder (!%p226_p9), %s6831_s25, 1  ;;  %vm6762_vm0 = vmmov (!%p226_p9), 0   ;;  %v431_v37 = vlaneseq (!%p226_p9) }
   0xe   : > { %229 = sbr.rel (%p226_p9) target bundleno = 5722 (0x165a), region = 44  ;;  %353 = vrot.lane.b32.xlu0 (!%p226_p9), %v6580_v0, %s6760_s11  ;;  %v6581_v1 = vld [vmem:[%s8134_s4 + $0x20] ss:$16 sps:$4 sm:$0xff] (!%p226_p9)   ;;  %6273 = vmatprep.subr.bf16.mxu0 (!%p226_p9), %v6761_v2  ;;  %v274_v5 = vld [vmem:[%s8132_s2 + $0x8] sm:$0xff] (!%p226_p9)  ;;  %vm307_vm1 = vcmask (!%p226_p9), 261120   ;;  %s6763_s18 = smov (!%p226_p9), 120  }
   0xf   : > { %6274 = vmatpush3.bf16.msra.mxu0 (!%p226_p9), %v6580_v0  ;;  %6277 = vmatprep.mubr.msk.bf16.mxu0 (!%p226_p9), %vm6762_vm0, %v6761_v2  ;;  %v6086_v3 = vld [vmem:[%s8135_s5] ss:$0 sm:$0xff] (!%p226_p9)  ;;  %v280_v14 = vld [vmem:[%s8133_s3 + $0x8] sm:$0xff] (!%p226_p9)  ;;  %s6765_s20 = smov (!%p226_p9), 104   ;;  %v6766_v35 = vmov (!%p226_p9), 1983009808  }
  0x10   : > { %6275 = vmatprep.subr.bf16.mxu0 (!%p226_p9), %v6761_v2  ;;  %6281 = vmatprep.subr.bf16.mxu1 (!%p226_p9), %v6761_v2  ;;  %v273_v4 = vld [vmem:[%s8132_s2] sm:$0xff] (!%p226_p9)  ;;  %v429_v36 = vunpack.c.l.s4 (!%p226_p9), %v6766_v35  ;;  %v6767_v39 = vmov (!%p226_p9), 1934713408   ;;  %v432_v43 = vshrl.u32 (!%p226_p9), %v431_v37, 7  ;;  %vm1298_vm2 = vcmask (!%p226_p9), 64512   ;;  %s6768_s26 = smov (!%p226_p9), 96  }
  0x11   : > { %6285 = vmatprep.mubr.msk.bf16.mxu1 (!%p226_p9), %vm6762_vm0, %v6761_v2  ;;  %359 = vrot.lane.b32.xlu1 (!%p226_p9), %v6086_v3, %s6760_s11  ;;  %v279_v11 = vld [vmem:[%s8133_s3] sm:$0xff] (!%p226_p9)  ;;  %v461_v40 = vunpack.c.l.s4 (!%p226_p9), %v6767_v39  ;;  %vm1487_vm3 = vcmask (!%p226_p9), 130048   ;;  %s6770_s10 = smov (!%p226_p9), 8   ;;  %s6771_s14 = smov (!%p226_p9), 24   ;;  %vm2056_vm4 = vcmask (!%p226_p9), 195584  }
  0x12   : > { %355 = vrot.lane.b32.xlu0 (!%p226_p9), %v6581_v1, %s6760_s11  ;;  %v430_v42 = vunpack.c.0.s8 (!%p226_p9), %v429_v36  ;;  %s6772_s29 = smov (!%p226_p9), 32   ;;  %s6194_s15 = sshll.u32 (!%p226_p9), %s6831_s25, 8 }
  0x13   : > { %6276 = vmatpush3.bf16.msra.mxu0 (!%p226_p9), %v6581_v1  ;;  %v462_v45 = vunpack.c.0.s8 (!%p226_p9), %v461_v40  ;;  %s8085_s28 = scalar_lea.hbm (!%p226_p9), %s8136_s6, %s6194_s15 }
  0x14   : > { %6289 = vmatprep.subr.bf16.mxu0 (!%p226_p9), %v6761_v2  ;;  %v6954_v46 = vsub.s32 (!%p226_p9), %v430_v42, %v432_v43 }
  0x15   : > { %s261_s16 = scalar_select %p260_p10, %s6831_s25, 1  ;;  %v6964_v51 = vsub.s32 %v462_v45, %v432_v43 }
  0x17   : > { %s6192_s19 = sshll.u32 %s261_s16, 4 }
  0x18   : > { %s264_s9 = scalar_lea.vmem %s8130_s0, %s6192_s19  ;;  %s269_s13 = scalar_lea.vmem %s8131_s1, %s6192_s19 }
  0x19   : > { %v271_v6 = vld [vmem:[%s264_s9] sm:$0xff]  ;;  %v272_v7 = vld [vmem:[%s264_s9 + $0x8] sm:$0xff]  ;;  %s6764_s19 = smov 112   ;;  %s6769_s9 = smov 16  }
  0x1a   : > { %v6889_v8 = vadd.f32 %v273_v4, %v271_v6  ;;  %v6891_v9 = vadd.f32 %v274_v5, %v272_v7  ;;  %v277_v12 = vld [vmem:[%s269_s13] sm:$0xff]  ;;  %v278_v13 = vld [vmem:[%s269_s13 + $0x8] sm:$0xff] }
  0x1b   : > { %v281_v16 = vadd.f32 %v279_v11, %v277_v12  ;;  %v282_v17 = vadd.f32 %v280_v14, %v278_v13 }
  0x1c   : > { %v283_v10 = vpack.c.bf16 %v6891_v9, %v6889_v8 }
  0x1d   : > { %v352_v19 = vpack.c.bf16 %v282_v17, %v281_v16 }
  0x1e   : > { %6278 = vmatmul.mubr.msk.bf16.vlgmr.msra.gmra.mrb[0].mxu0 %vm307_vm1, %v283_v10 }
  0x1f   : > { %6291 = vmatprep.mubr.msk.bf16.mxu0 %vm6762_vm0, %v6761_v2 }
  0x80   : > { %v354_v15 = vpop.permute.xlu0 %353 }
  0x81   : > { %6282 = vmatpush3.bf16.msra.mxu1 %v354_v15 }
  0x82   : > { %6283 = vmatprep.subr.bf16.mxu1 %v6761_v2 }
  0x83   : > { %v360_v26 = vpop.permute.xlu1 %359 }
  0x84   : > { %v356_v18 = vpop.permute.xlu0 %355 }
  0x85   : > { %6284 = vmatpush3.bf16.msra.mxu1 %v356_v18 }
  0x86   : > { %6295 = vmatprep.subr.bf16.mxu1 %v6761_v2 }
  0x88   : > { %6286 = vmatmul.mubr.msk.bf16.vlgmr.msra.gmra.mrb[0].mxu1 %vm307_vm1, %v352_v19 }
  0x89   : > { %6297 = vmatprep.mubr.msk.bf16.mxu1 %vm6762_vm0, %v6761_v2 }
  0xf1   : > { %v345_v20 = vpop.f32.mrb[0].mxu0 }
  0xf2   : > { %v6912_v21 = vadd.f32 %v6086_v3, %v345_v20  ;;  %v6279_v22 = vpop.f32.mrb[1].mxu0 }
  0xf3   : > { %v348_v23 = vpop.f32.mrb[2].mxu0 }
  0xf4   : > { %v6914_v24 = vadd.f32 %v6086_v3, %v348_v23  ;;  %v6280_v25 = vpop.f32.mrb[3].mxu0  ;;  %408 = vrot.lane.b32.xlu1 %v6912_v21, %s6763_s18 }
  0xf6   : > { %410 = vrot.lane.b32.xlu0 %v6914_v24, %s6763_s18 }
 0x15b   : > { %v399_v27 = vpop.f32.mrb[0].mxu1 }
 0x15c   : > { %v6920_v28 = vadd.f32 %v399_v27, %v360_v26  ;;  %v6287_v29 = vpop.f32.mrb[1].mxu1 }
 0x15d   : > { %v402_v30 = vpop.f32.mrb[2].mxu1 }
 0x15e   : > { %v6922_v31 = vadd.f32 %v402_v30, %v360_v26  ;;  %v6288_v32 = vpop.f32.mrb[3].mxu1  ;;  %704 = vrot.lane.b32.xlu1 %v6920_v28, %s6763_s18 }
 0x160   : > { %706 = vrot.lane.b32.xlu0 %v6922_v31, %s6763_s18 }
 0x162   : > { %710 = vrot.lane.b32.xlu1 %v6920_v28, %s6764_s19 }
 0x164   : > { %712 = vrot.lane.b32.xlu0 %v6922_v31, %s6764_s19 }
 0x166   : > { %716 = vrot.lane.b32.xlu1 %v6920_v28, %s6765_s20  ;;  %v6944_v33 = vpop.permute.xlu1 %408 }
 0x168   : > { %718 = vrot.lane.b32.xlu0 %v6922_v31, %s6765_s20  ;;  %v6946_v34 = vpop.permute.xlu0 %410 }
 0x16a   : > { %414 = vrot.lane.b32.xlu1 %v6912_v21, %s6764_s19 }
 0x16c   : > { %416 = vrot.lane.b32.xlu0 %v6914_v24, %s6764_s19 }
 0x16e   : > { %420 = vrot.lane.b32.xlu1 %v6912_v21, %s6765_s20 }
 0x170   : > { %422 = vrot.lane.b32.xlu0 %v6914_v24, %s6765_s20 }
 0x1d0   : > { %v6948_v38 = vpop.permute.xlu1 %704 }
 0x1d2   : > { %v6950_v41 = vpop.permute.xlu0 %706 }
 0x1d4   : > { %v6952_v44 = vpop.permute.xlu1 %710 }
 0x1d5   : > { %v722_v47 = vcombine.low %v6920_v28, %v6952_v44  ;;  %v723_v48 = vcombine.high %v6920_v28, %v6952_v44 }
 0x1d6   : > { %v6960_v49 = vpop.permute.xlu0 %712 }
 0x1d7   : > { %v730_v54 = vrot.slane %v722_v47, %v6954_v46  ;;  %v737_v55 = vrot.slane %v723_v48, %v6954_v46  ;;  %v790_v56 = vcombine.low %v6922_v31, %v6960_v49  ;;  %v791_v57 = vcombine.high %v6922_v31, %v6960_v49 }
 0x1d8   : > { %v6962_v50 = vpop.permute.xlu1 %716 }
 0x1d9   : > { %v738_v52 = vcombine.low %v6948_v38, %v6962_v50  ;;  %v739_v53 = vcombine.high %v6948_v38, %v6962_v50  ;;  %v798_v5 = vrot.slane %v790_v56, %v6954_v46  ;;  %v805_v6 = vrot.slane %v791_v57, %v6954_v46 }
 0x1da   : > { %v6976_v58 = vpop.permute.xlu0 %718 }
 0x1db   : > { %v746_v59 = vrot.slane %v738_v52, %v6954_v46  ;;  %v753_v60 = vrot.slane %v739_v53, %v6954_v46  ;;  %v806_v61 = vcombine.low %v6950_v41, %v6976_v58  ;;  %v807_v62 = vcombine.high %v6950_v41, %v6976_v58 }
 0x1dc   : > { %v415_v63 = vpop.permute.xlu1 %414 }
 0x1dd   : > { %v754_v0 = vcombine.low %v730_v54, %v746_v59  ;;  %v755_v1 = vcombine.high %v730_v54, %v746_v59  ;;  %v770_v3 = vcombine.low %v737_v55, %v753_v60  ;;  %v771_v4 = vcombine.high %v737_v55, %v753_v60 }
 0x1de   : > { %v814_v7 = vrot.slane %v806_v61, %v6954_v46  ;;  %v821_v10 = vrot.slane %v807_v62, %v6954_v46  ;;  %v417_v11 = vpop.permute.xlu0 %416  ;;  %v426_v20 = vcombine.low %v6912_v21, %v415_v63  ;;  %v427_v25 = vcombine.high %v6912_v21, %v415_v63 }
 0x1df   : > { %v762_v12 = vrot.slane %v754_v0, %v6964_v51  ;;  %v769_v13 = vrot.slane %v755_v1, %v6964_v51  ;;  %v6991_v14 = vrot.slane %v770_v3, %v6964_v51  ;;  %v785_v15 = vrot.slane %v771_v4, %v6964_v51 }
 0x1e0   : > { %v822_v16 = vcombine.low %v798_v5, %v814_v7  ;;  %v823_v17 = vcombine.high %v798_v5, %v814_v7  ;;  %v838_v18 = vcombine.low %v805_v6, %v821_v10  ;;  %v839_v19 = vcombine.high %v805_v6, %v821_v10  ;;  %v421_v26 = vpop.permute.xlu1 %420 }
 0x1e1   : > { %v858_v27 = vcombine.low %v762_v12, %v769_v13  ;;  %v6095_v29 = vcombine.high %v762_v12, %v769_v13  ;;  %v494_v30 = vcombine.low %v6914_v24, %v417_v11  ;;  %v874_v35 = vcombine.low %v6991_v14, %v785_v15 }
 0x1e2   : > { %v6996_v22 = vrot.slane %v822_v16, %v6964_v51  ;;  %v6999_v23 = vrot.slane %v823_v17, %v6964_v51  ;;  %v423_v32 = vpop.permute.xlu0 %422  ;;  %v6096_v36 = vcombine.high %v6991_v14, %v785_v15  ;;  %v846_v37 = vrot.slane %v838_v18, %v6964_v51 }
 0x1e3   : > { %v495_v39 = vcombine.high %v6914_v24, %v417_v11  ;;  %v853_v40 = vrot.slane %v839_v19, %v6964_v51  ;;  %v434_v42 = vrot.slane %v426_v20, %v6954_v46  ;;  %v442_v43 = vcombine.low %v6944_v33, %v421_v26 }
 0x1e4   : > { %v443_v45 = vcombine.high %v6944_v33, %v421_v26  ;;  %v926_v47 = vcombine.low %v6996_v22, %v6999_v23  ;;  %v441_v48 = vrot.slane %v427_v25, %v6954_v46  ;;  %v510_v52 = vcombine.low %v6946_v34, %v423_v32 }
 0x1e5   : > { %v511_v53 = vcombine.high %v6946_v34, %v423_v32  ;;  %v6097_v54 = vcombine.high %v6996_v22, %v6999_v23  ;;  %v502_v55 = vrot.slane %v494_v30, %v6954_v46  ;;  %v450_v56 = vrot.slane %v442_v43, %v6954_v46 }
 0x1e6   : > { %v457_v57 = vrot.slane %v443_v45, %v6954_v46  ;;  %v509_v33 = vrot.slane %v495_v39, %v6954_v46  ;;  %v518_v59 = vrot.slane %v510_v52, %v6954_v46  ;;  %v7025_v61 = vrot.slane %v858_v27, %v6954_v46 }
 0x1e7   : > { %v525_v60 = vrot.slane %v511_v53, %v6954_v46  ;;  %v458_v62 = vcombine.low %v434_v42, %v450_v56  ;;  %v459_v34 = vcombine.high %v434_v42, %v450_v56  ;;  %v873_v19 = vrot.slane %v6095_v29, %v6954_v46 }
 0x1e8   : > { %v474_v63 = vcombine.low %v441_v48, %v457_v57  ;;  %v475_v0 = vcombine.high %v441_v48, %v457_v57  ;;  %v526_v1 = vcombine.low %v502_v55, %v518_v59  ;;  %v527_v3 = vcombine.high %v502_v55, %v518_v59 }
 0x1e9   : > { %v542_v4 = vcombine.low %v509_v33, %v525_v60  ;;  %v543_v5 = vcombine.high %v509_v33, %v525_v60  ;;  %v466_v6 = vrot.slane %v458_v62, %v6964_v51  ;;  %v473_v7 = vrot.slane %v459_v34, %v6964_v51 }
 0x1ea   : > { %v482_v10 = vrot.slane %v474_v63, %v6964_v51  ;;  %v489_v11 = vrot.slane %v475_v0, %v6964_v51  ;;  %v534_v12 = vrot.slane %v526_v1, %v6964_v51  ;;  %v541_v13 = vrot.slane %v527_v3, %v6964_v51 }
 0x1eb   : > { %v550_v14 = vrot.slane %v542_v4, %v6964_v51  ;;  %v557_v15 = vrot.slane %v543_v5, %v6964_v51  ;;  %v562_v16 = vcombine.low %v466_v6, %v473_v7  ;;  %v6091_v17 = vcombine.high %v466_v6, %v473_v7 }
 0x1ec   : > { %v578_v18 = vcombine.low %v482_v10, %v489_v11  ;;  %v630_v20 = vcombine.low %v534_v12, %v541_v13  ;;  %v6093_v22 = vcombine.high %v534_v12, %v541_v13  ;;  %v942_v26 = vcombine.low %v846_v37, %v853_v40 }
 0x1ed   : > { %v646_v23 = vcombine.low %v550_v14, %v557_v15  ;;  %v6094_v25 = vcombine.high %v550_v14, %v557_v15  ;;  %v6092_v27 = vcombine.high %v482_v10, %v489_v11  ;;  %v881_v30 = vrot.slane %v874_v35, %v6954_v46 }
 0x1ee   : > { %v889_v32 = vrot.slane %v6096_v36, %v6954_v46  ;;  %v6098_v39 = vcombine.high %v846_v37, %v853_v40  ;;  %v933_v42 = vrot.slane %v926_v47, %v6954_v46  ;;  %v7040_v43 = vrot.slane %v630_v20, %v6954_v46 }
 0x1ef   : > { %v7043_v45 = vrot.slane %v6093_v22, %v6954_v46  ;;  %v7046_v29 = vrot.slane %v646_v23, %v6954_v46  ;;  %v7049_v48 = vrot.slane %v6094_v25, %v6954_v46  ;;  %v7052_v52 = vrot.slane %v562_v16, %v6954_v46 }
 0x1f0   : > { %v7055_v35 = vrot.slane %v6091_v17, %v6954_v46  ;;  %v7058_v36 = vrot.slane %v578_v18, %v6954_v46  ;;  %v890_v37 = vcombine.low %v7025_v61, %v873_v19  ;;  %v7062_v40 = vrot.slane %v6092_v27, %v6954_v46 }
 0x1f1   : > { %v906_v47 = vcombine.low %v881_v30, %v889_v32  ;;  %v941_v53 = vrot.slane %v6097_v54, %v6954_v46  ;;  %v949_v55 = vrot.slane %v942_v26, %v6954_v46  ;;  %v957_v56 = vrot.slane %v6098_v39, %v6954_v46 }
 0x1f2   : > { %v662_v57 = vcombine.low %v7040_v43, %v7043_v45  ;;  %v678_v33 = vcombine.low %v7046_v29, %v7049_v48  ;;  %v898_v60 = vrot.slane %v890_v37, %v6964_v51  ;;  %v594_v63 = vcombine.low %v7052_v52, %v7055_v35 }
 0x1f3   : > { %v958_v59 = vcombine.low %v933_v42, %v941_v53  ;;  %v914_v62 = vrot.slane %v906_v47, %v6964_v51  ;;  %v974_v34 = vcombine.low %v949_v55, %v957_v56  ;;  %v610_v54 = vcombine.low %v7058_v36, %v7062_v40 }
 0x1f4   : > { %v891_v3 = vcombine.high %v7025_v61, %v873_v19  ;;  %v907_v4 = vcombine.high %v881_v30, %v889_v32  ;;  %v670_v5 = vrot.slane %v662_v57, %v6964_v51  ;;  %v686_v6 = vrot.slane %v678_v33, %v6964_v51 }
 0x1f5   : > { %v966_v0 = vrot.slane %v958_v59, %v6964_v51  ;;  %v982_v1 = vrot.slane %v974_v34, %v6964_v51  ;;  %v959_v7 = vcombine.high %v933_v42, %v941_v53  ;;  %v975_v10 = vcombine.high %v949_v55, %v957_v56 }
 0x1f6   : > { %v922_v11 = vcombine.low %v898_v60, %v914_v62  ;;  %v923_v13 = vcombine.high %v898_v60, %v914_v62  ;;  %v602_v15 = vrot.slane %v594_v63, %v6964_v51  ;;  %v618_v16 = vrot.slane %v610_v54, %v6964_v51 }
 0x1f7   : > { %v990_v12 = vcombine.low %v966_v0, %v982_v1  ;;  %v991_v14 = vcombine.high %v966_v0, %v982_v1  ;;  %v973_v17 = vrot.slane %v959_v7, %v6964_v51  ;;  %v989_v18 = vrot.slane %v975_v10, %v6964_v51 }
 0x1f8   : > { %v905_v20 = vrot.slane %v891_v3, %v6964_v51  ;;  %v921_v22 = vrot.slane %v907_v4, %v6964_v51  ;;  %v694_v23 = vcombine.low %v670_v5, %v686_v6  ;;  %v695_v25 = vcombine.high %v670_v5, %v686_v6 }
 0x1f9   : > { %v994_v61 = vpack.c.bf16 %v990_v12, %v922_v11  ;;  %v995_v19 = vpack.c.bf16 %v991_v14, %v923_v13  ;;  %v992_v30 = vcombine.low %v973_v17, %v989_v18  ;;  %v993_v32 = vcombine.high %v973_v17, %v989_v18 }
 0x1fa   : > { %v663_v39 = vcombine.high %v7040_v43, %v7043_v45  ;;  %v679_v42 = vcombine.high %v7046_v29, %v7049_v48  ;;  %v626_v37 = vcombine.low %v602_v15, %v618_v16  ;;  %v627_v47 = vcombine.high %v602_v15, %v618_v16 }
 0x1fb   : > { %v1303_v26 = vsel %vm1298_vm2, %v994_v61, 0  ;;  %v1350_v27 = vsel %vm1298_vm2, %v995_v19, 0  ;;  %v924_v53 = vcombine.low %v905_v20, %v921_v22  ;;  %v925_v55 = vcombine.high %v905_v20, %v921_v22 }
 0x1fc   : > { %6290 = vmatpush3.bf16.xpose.msra.mxu0 %v1303_v26  ;;  %6296 = vmatpush3.bf16.xpose.msra.mxu1 %v1350_v27  ;;  %v595_v56 = vcombine.high %v7052_v52, %v7055_v35  ;;  %v611_v57 = vcombine.high %v7058_v36, %v7062_v40  ;;  %v698_v43 = vpack.c.bf16 %v694_v23, %v626_v37 }
 0x1fd   : > { %6301 = vmatprep.subr.bf16.mxu0 %v6761_v2  ;;  %6307 = vmatprep.subr.bf16.mxu1 %v6761_v2  ;;  %v699_v45 = vpack.c.bf16 %v695_v25, %v627_v47  ;;  %v996_v33 = vpack.c.bf16 %v992_v30, %v924_v53  ;;  %v997_v29 = vpack.c.bf16 %v993_v32, %v925_v55 }
 0x1fe   : > { %v677_v48 = vrot.slane %v663_v39, %v6964_v51  ;;  %v693_v59 = vrot.slane %v679_v42, %v6964_v51  ;;  %v609_v52 = vrot.slane %v595_v56, %v6964_v51  ;;  %v625_v35 = vrot.slane %v611_v57, %v6964_v51 }
 0x1ff   : > { %v1397_v60 = vsel %vm1298_vm2, %v996_v33, 0  ;;  %v1444_v62 = vsel %vm1298_vm2, %v997_v29, 0 }
 0x200   : > { %v696_v36 = vcombine.low %v677_v48, %v693_v59  ;;  %v697_v40 = vcombine.high %v677_v48, %v693_v59  ;;  %v628_v34 = vcombine.low %v609_v52, %v625_v35  ;;  %v629_v63 = vcombine.high %v609_v52, %v625_v35 }
 0x202   : > { %v700_v54 = vpack.c.bf16 %v696_v36, %v628_v34  ;;  %v701_v0 = vpack.c.bf16 %v697_v40, %v629_v63 }
 0x203   : > { %6292 = vmatmul.mubr.msk.bf16.vlgmr.msra.gmra.mrb[4].mxu0 %vm1298_vm2, %v698_v43  ;;  %6298 = vmatmul.mubr.msk.bf16.vlgmr.msra.gmra.mrb[4].mxu1 %vm1298_vm2, %v699_v45 }
 0x204   : > { %6302 = vmatpush3.bf16.xpose.msra.mxu0 %v1397_v60  ;;  %6308 = vmatpush3.bf16.xpose.msra.mxu1 %v1444_v62 }
 0x205   : > { %6303 = vmatprep.mubr.msk.bf16.mxu0 %vm6762_vm0, %v6761_v2  ;;  %6309 = vmatprep.mubr.msk.bf16.mxu1 %vm6762_vm0, %v6761_v2 }
 0x206   : > { %6313 = vmatprep.subr.bf16.mxu0 %v6761_v2  ;;  %6319 = vmatprep.subr.bf16.mxu1 %v6761_v2 }
 0x20b   : > { %6304 = vmatmul.mubr.msk.bf16.vlgmr.msra.gmra.mrb[8].mxu0 %vm1298_vm2, %v700_v54  ;;  %6310 = vmatmul.mubr.msk.bf16.vlgmr.msra.gmra.mrb[8].mxu1 %vm1298_vm2, %v701_v0 }
 0x20c   : > { %6315 = vmatprep.mubr.msk.bf16.mxu0 %vm6762_vm0, %v6761_v2  ;;  %6321 = vmatprep.mubr.msk.bf16.mxu1 %vm6762_vm0, %v6761_v2 }
 0x2d6   : > { %v1339_v1 = vpop.f32.mrb[4].mxu0  ;;  %v1386_v3 = vpop.f32.mrb[4].mxu1 }
 0x2d7   : > { %v6293_v4 = vpop.f32.mrb[5].mxu0  ;;  %v6299_v5 = vpop.f32.mrb[5].mxu1  ;;  %v1494_v6 = vsel %vm1487_vm3, %v1386_v3, -inf  ;;  %v1488_v7 = vsel %vm1487_vm3, %v1339_v1, -inf }
 0x2d8   : > { %1495 = vmax.xlane.f32.xlu0 %v1494_v6  ;;  %v1389_v10 = vpop.f32.mrb[6].mxu1  ;;  %1489 = vmax.xlane.f32.xlu1 %v1488_v7  ;;  %v1342_v11 = vpop.f32.mrb[6].mxu0 }
 0x2d9   : > { %v6294_v12 = vpop.f32.mrb[7].mxu0  ;;  %v6300_v13 = vpop.f32.mrb[7].mxu1  ;;  %v1497_v14 = vsel %vm1487_vm3, %v1389_v10, -inf  ;;  %v1491_v15 = vsel %vm1487_vm3, %v1342_v11, -inf }
 0x2dc   : > { %1498 = vmax.xlane.f32.xlu1 %v1497_v14  ;;  %1492 = vmax.xlane.f32.xlu0 %v1491_v15 }
 0x2de   : > { %v1433_v16 = vpop.f32.mrb[8].mxu0  ;;  %v1480_v17 = vpop.f32.mrb[8].mxu1 }
 0x2df   : > { %v6305_v18 = vpop.f32.mrb[9].mxu0  ;;  %v6311_v61 = vpop.f32.mrb[9].mxu1  ;;  %v1500_v19 = vsel %vm1487_vm3, %v1433_v16, -inf  ;;  %v1506_v27 = vsel %vm1487_vm3, %v1480_v17, -inf }
 0x2e0   : > { %v1483_v20 = vpop.f32.mrb[10].mxu1  ;;  %1501 = vmax.xlane.f32.xlu0 %v1500_v19  ;;  %v1436_v22 = vpop.f32.mrb[10].mxu0 }
 0x2e1   : > { %v6306_v23 = vpop.f32.mrb[11].mxu0  ;;  %v6312_v25 = vpop.f32.mrb[11].mxu1  ;;  %v1503_v26 = vsel %vm1487_vm3, %v1436_v22, -inf  ;;  %v1509_v30 = vsel %vm1487_vm3, %v1483_v20, -inf }
 0x2e2   : > { %1504 = vmax.xlane.f32.xlu1 %v1503_v26 }
 0x2e4   : > { %1507 = vmax.xlane.f32.xlu0 %v1506_v27 }
 0x2e6   : > { %1510 = vmax.xlane.f32.xlu1 %v1509_v30 }
 0x2f7   : > { %1000 = vrot.lane.b32.xlu1 %v6922_v31, %s6768_s26 }
 0x2fa   : > { %998 = vrot.lane.b32.xlu0 %v6920_v28, %s6768_s26 }
 0x2fb   : > { %1002 = vrot.lane.b32.xlu1 %v6948_v38, %s6768_s26 }
 0x2fe   : > { %1004 = vrot.lane.b32.xlu0 %v6950_v41, %s6768_s26 }
 0x2ff   : > { %1006 = vrot.lane.b32.xlu1 %v6952_v44, %s6768_s26 }
 0x302   : > { %1008 = vrot.lane.b32.xlu0 %v6960_v49, %s6768_s26 }
 0x303   : > { %1010 = vrot.lane.b32.xlu1 %v6962_v50, %s6768_s26 }
 0x306   : > { %1012 = vrot.lane.b32.xlu0 %v6976_v58, %s6768_s26 }
 0x365   : > { %v1496_v31 = vpop.xlane.xlu0 %1495  ;;  %v1490_v28 = vpop.xlane.xlu1 %1489 }
 0x366   : > { %v1514_v32 = vsub.f32 %v1386_v3, %v1496_v31  ;;  %v1512_v39 = vsub.f32 %v1339_v1, %v1490_v28 }
 0x368   : > { %v1520_v38 = vmul.f32 1.442695, %v1512_v39  ;;  %v1524_v42 = vmul.f32 1.442695, %v1514_v32 }
 0x369   : > { %v1499_v37 = vpop.xlane.xlu1 %1498  ;;  %v1493_v41 = vpop.xlane.xlu0 %1492 }
 0x36a   : > { %v1515_v47 = vsub.f32 %v1389_v10, %v1499_v37  ;;  %v1513_v53 = vsub.f32 %v1342_v11, %v1493_v41  ;;  %6592 = vpow2.f32 %v1520_v38 }
 0x36b   : > { %6594 = vpow2.f32 %v1524_v42 }
 0x36c   : > { %v1522_v44 = vmul.f32 1.442695, %v1513_v53  ;;  %v1526_v49 = vmul.f32 1.442695, %v1515_v47 }
 0x36d   : > { %v1502_v55 = vpop.xlane.xlu0 %1501 }
 0x36e   : > { %v1516_v56 = vsub.f32 %v1433_v16, %v1502_v55  ;;  %6596 = vpow2.f32 %v1522_v44 }
 0x36f   : > { %v1505_v50 = vpop.xlane.xlu1 %1504  ;;  %6598 = vpow2.f32 %v1526_v49 }
 0x370   : > { %v1517_v57 = vsub.f32 %v1436_v22, %v1505_v50  ;;  %v1528_v58 = vmul.f32 1.442695, %v1516_v56 }
 0x371   : > { %v1508_v43 = vpop.xlane.xlu0 %1507 }
 0x372   : > { %v1530_v45 = vmul.f32 1.442695, %v1517_v57  ;;  %v1518_v33 = vsub.f32 %v1480_v17, %v1508_v43 }
 0x373   : > { %v1511_v29 = vpop.xlane.xlu1 %1510 }
 0x374   : > { %6600 = vpow2.f32 %v1530_v45  ;;  %v1532_v48 = vmul.f32 1.442695, %v1518_v33  ;;  %v1519_v59 = vsub.f32 %v1483_v20, %v1511_v29  ;;  %v7144_v60 = vpop.eup %6592 }
 0x375   : > { %6602 = vpow2.f32 %v1528_v58  ;;  %v999_v62 = vpop.permute.xlu0 %998  ;;  %v1536_v35 = vsel %vm1487_vm3, %v7144_v60, 0.0  ;;  %v7148_v36 = vpop.eup %6594 }
 0x376   : > { %6604 = vpow2.f32 %v1532_v48  ;;  %v1534_v52 = vmul.f32 1.442695, %v1519_v59  ;;  %1537 = vadd.xlane.f32.xlu0 %v1536_v35  ;;  %v1542_v54 = vsel %vm1487_vm3, %v7148_v36, 0.0 }
 0x377   : > { %v1001_v40 = vpop.permute.xlu1 %1000 }
 0x378   : > { %6606 = vpow2.f32 %v1534_v52  ;;  %v7150_v34 = vpop.eup %6596 }
 0x379   : > { %v1005_v63 = vpop.permute.xlu0 %1004  ;;  %v1539_v0 = vsel %vm1487_vm3, %v7150_v34, 0.0  ;;  %v7156_v1 = vpop.eup %6598 }
 0x37a   : > { %1543 = vadd.xlane.f32.xlu0 %v1542_v54  ;;  %1540 = vadd.xlane.f32.xlu1 %v1539_v0  ;;  %v1545_v7 = vsel %vm1487_vm3, %v7156_v1, 0.0 }
 0x37b   : > { %v1003_v3 = vpop.permute.xlu1 %1002 }
 0x37d   : > { %v1009_v4 = vpop.permute.xlu0 %1008 }
 0x37e   : > { %v7158_v5 = vpop.eup %6600  ;;  %v1090_v6 = vcombine.low %v1001_v40, %v1009_v4  ;;  %v1091_v11 = vcombine.high %v1001_v40, %v1009_v4  ;;  %1546 = vadd.xlane.f32.xlu1 %v1545_v7 }
 0x37f   : > { %v7162_v10 = vpop.eup %6602  ;;  %v1007_v12 = vpop.permute.xlu1 %1006  ;;  %v1551_v13 = vsel %vm1487_vm3, %v7158_v5, 0.0 }
 0x380   : > { %v7166_v14 = vpop.eup %6604  ;;  %1552 = vadd.xlane.f32.xlu0 %v1551_v13  ;;  %v1098_v17 = vrot.slane %v1090_v6, %v6954_v46  ;;  %v1548_v19 = vsel %vm1487_vm3, %v7162_v10, 0.0  ;;  %v1105_v20 = vrot.slane %v1091_v11, %v6954_v46  ;;  %v1022_v22 = vcombine.low %v999_v62, %v1007_v12 }
 0x381   : > { %v1013_v15 = vpop.permute.xlu0 %1012  ;;  %v1023_v23 = vcombine.high %v999_v62, %v1007_v12  ;;  %v1554_v26 = vsel %vm1487_vm3, %v7166_v14, 0.0 }
 0x382   : > { %v7168_v16 = vpop.eup %6606  ;;  %v1106_v18 = vcombine.low %v1005_v63, %v1013_v15  ;;  %v1107_v61 = vcombine.high %v1005_v63, %v1013_v15  ;;  %1549 = vadd.xlane.f32.xlu1 %v1548_v19  ;;  %v1030_v41 = vrot.slane %v1022_v22, %v6954_v46 }
 0x383   : > { %v1011_v25 = vpop.permute.xlu1 %1010  ;;  %v1557_v32 = vsel %vm1487_vm3, %v7168_v16, 0.0  ;;  %v1037_v47 = vrot.slane %v1023_v23, %v6954_v46 }
 0x384   : > { %v1114_v27 = vrot.slane %v1106_v18, %v6954_v46  ;;  %v1121_v30 = vrot.slane %v1107_v61, %v6954_v46  ;;  %v1038_v31 = vcombine.low %v1003_v3, %v1011_v25  ;;  %v1039_v28 = vcombine.high %v1003_v3, %v1011_v25  ;;  %1555 = vadd.xlane.f32.xlu0 %v1554_v26 }
 0x386   : > { %v1122_v39 = vcombine.low %v1098_v17, %v1114_v27  ;;  %v1123_v38 = vcombine.high %v1098_v17, %v1114_v27  ;;  %v1138_v42 = vcombine.low %v1105_v20, %v1121_v30  ;;  %v1139_v37 = vcombine.high %v1105_v20, %v1121_v30  ;;  %1558 = vadd.xlane.f32.xlu1 %v1557_v32 }
 0x387   : > { %v1046_v53 = vrot.slane %v1038_v31, %v6954_v46  ;;  %v1053_v44 = vrot.slane %v1039_v28, %v6954_v46 }
 0x388   : > { %v1130_v49 = vrot.slane %v1122_v39, %v6964_v51  ;;  %v1137_v55 = vrot.slane %v1123_v38, %v6964_v51  ;;  %v1146_v56 = vrot.slane %v1138_v42, %v6964_v51  ;;  %v1153_v50 = vrot.slane %v1139_v37, %v6964_v51 }
 0x389   : > { %v1054_v57 = vcombine.low %v1030_v41, %v1046_v53  ;;  %v1055_v58 = vcombine.high %v1030_v41, %v1046_v53  ;;  %v1070_v43 = vcombine.low %v1037_v47, %v1053_v44  ;;  %v1071_v45 = vcombine.high %v1037_v47, %v1053_v44 }
 0x38a   : > { %v1226_v33 = vcombine.low %v1130_v49, %v1137_v55  ;;  %v6101_v29 = vcombine.high %v1130_v49, %v1137_v55  ;;  %v1242_v48 = vcombine.low %v1146_v56, %v1153_v50  ;;  %v6102_v59 = vcombine.high %v1146_v56, %v1153_v50 }
 0x38b   : > { %v1062_v62 = vrot.slane %v1054_v57, %v6964_v51  ;;  %v1069_v52 = vrot.slane %v1055_v58, %v6964_v51  ;;  %v1078_v35 = vrot.slane %v1070_v43, %v6964_v51  ;;  %v1085_v40 = vrot.slane %v1071_v45, %v6964_v51 }
 0x38c   : > { %v1233_v63 = vrot.slane %v1226_v33, %v6954_v46  ;;  %v1241_v54 = vrot.slane %v6101_v29, %v6954_v46  ;;  %v1249_v0 = vrot.slane %v1242_v48, %v6954_v46  ;;  %v1257_v3 = vrot.slane %v6102_v59, %v6954_v46 }
 0x38d   : > { %v1158_v4 = vcombine.low %v1062_v62, %v1069_v52  ;;  %v6099_v6 = vcombine.high %v1062_v62, %v1069_v52  ;;  %v1174_v7 = vcombine.low %v1078_v35, %v1085_v40  ;;  %v6100_v11 = vcombine.high %v1078_v35, %v1085_v40 }
 0x38e   : > { %v1258_v12 = vcombine.low %v1233_v63, %v1241_v54  ;;  %v1274_v13 = vcombine.low %v1249_v0, %v1257_v3  ;;  %v1259_v15 = vcombine.high %v1233_v63, %v1241_v54  ;;  %v1275_v17 = vcombine.high %v1249_v0, %v1257_v3 }
 0x38f   : > { %v1165_v18 = vrot.slane %v1158_v4, %v6954_v46  ;;  %v1173_v61 = vrot.slane %v6099_v6, %v6954_v46  ;;  %v1181_v19 = vrot.slane %v1174_v7, %v6954_v46  ;;  %v1189_v20 = vrot.slane %v6100_v11, %v6954_v46 }
 0x390   : > { %v1266_v22 = vrot.slane %v1258_v12, %v6964_v51  ;;  %v1282_v23 = vrot.slane %v1274_v13, %v6964_v51  ;;  %v1273_v25 = vrot.slane %v1259_v15, %v6964_v51  ;;  %v1289_v26 = vrot.slane %v1275_v17, %v6964_v51 }
 0x391   : > { %v1190_v27 = vcombine.low %v1165_v18, %v1173_v61  ;;  %v1206_v30 = vcombine.low %v1181_v19, %v1189_v20  ;;  %v1191_v31 = vcombine.high %v1165_v18, %v1173_v61  ;;  %v1207_v28 = vcombine.high %v1181_v19, %v1189_v20 }
 0x392   : > { %v1292_v32 = vcombine.low %v1273_v25, %v1289_v26  ;;  %v1293_v39 = vcombine.high %v1273_v25, %v1289_v26  ;;  %v1290_v47 = vcombine.low %v1266_v22, %v1282_v23  ;;  %v1291_v53 = vcombine.high %v1266_v22, %v1282_v23 }
 0x393   : > { %v1198_v38 = vrot.slane %v1190_v27, %v6964_v51  ;;  %v1214_v42 = vrot.slane %v1206_v30, %v6964_v51  ;;  %v1205_v37 = vrot.slane %v1191_v31, %v6964_v51  ;;  %v1221_v41 = vrot.slane %v1207_v28, %v6964_v51 }
 0x395   : > { %v1222_v44 = vcombine.low %v1198_v38, %v1214_v42  ;;  %v1223_v49 = vcombine.high %v1198_v38, %v1214_v42  ;;  %v1224_v55 = vcombine.low %v1205_v37, %v1221_v41  ;;  %v1225_v56 = vcombine.high %v1205_v37, %v1221_v41 }
 0x397   : > { %v1294_v50 = vpack.c.bf16 %v1290_v47, %v1222_v44  ;;  %v1295_v57 = vpack.c.bf16 %v1291_v53, %v1223_v49  ;;  %v1296_v58 = vpack.c.bf16 %v1292_v32, %v1224_v55  ;;  %v1297_v43 = vpack.c.bf16 %v1293_v39, %v1225_v56 }
 0x399   : > { %6314 = vmatpush3.bf16.msra.mxu0 %v1294_v50  ;;  %6320 = vmatpush3.bf16.msra.mxu1 %v1295_v57 }
 0x39a   : > { %6325 = vmatprep.subr.bf16.mxu0 %v6761_v2  ;;  %6331 = vmatprep.subr.bf16.mxu1 %v6761_v2 }
 0x403   : > { %v1538_v45 = vpop.xlane.xlu0 %1537 }
 0x404   : > { %6608 = vrcp.f32 %v1538_v45 }
 0x407   : > { %v1544_v33 = vpop.xlane.xlu0 %1543  ;;  %v1541_v29 = vpop.xlane.xlu1 %1540 }
 0x408   : > { %6610 = vrcp.f32 %v1541_v29 }
 0x409   : > { %6612 = vrcp.f32 %v1544_v33 }
 0x40b   : > { %v1547_v48 = vpop.xlane.xlu1 %1546 }
 0x40c   : > { %6614 = vrcp.f32 %v1547_v48 }
 0x40d   : > { %v1553_v59 = vpop.xlane.xlu0 %1552 }
 0x40e   : > { %6616 = vrcp.f32 %v1553_v59  ;;  %v6609_v35 = vpop.eup %6608 }
 0x40f   : > { %v1550_v62 = vpop.xlane.xlu1 %1549  ;;  %v1568_v0 = vmul.f32 %v6609_v35, %v7144_v60 }
 0x410   : > { %6618 = vrcp.f32 %v1550_v62 }
 0x411   : > { %v1556_v52 = vpop.xlane.xlu0 %1555 }
 0x412   : > { %6620 = vrcp.f32 %v1556_v52  ;;  %v6611_v40 = vpop.eup %6610 }
 0x413   : > { %v1559_v63 = vpop.xlane.xlu1 %1558  ;;  %v6613_v54 = vpop.eup %6612  ;;  %v1569_v3 = vmul.f32 %v6611_v40, %v7150_v34 }
 0x414   : > { %6622 = vrcp.f32 %v1559_v63  ;;  %v1570_v7 = vmul.f32 %v6613_v54, %v7148_v36 }
 0x415   : > { %v1576_v6 = vpack.c.bf16 %v1569_v3, %v1568_v0 }
 0x416   : > { %v6615_v4 = vpop.eup %6614 }
 0x417   : > { %v1571_v11 = vmul.f32 %v6615_v4, %v7156_v1  ;;  %6316 = vmatmul.mubr.msk.bf16.vlgmr.msra.gmra.mrb[12].mxu0 %vm1487_vm3, %v1576_v6 }
 0x418   : > { %v6617_v12 = vpop.eup %6616  ;;  %6326 = vmatpush3.bf16.msra.mxu0 %v1296_v58  ;;  %6327 = vmatprep.mubr.msk.bf16.mxu0 %vm6762_vm0, %v6761_v2 }
 0x419   : > { %v1577_v13 = vpack.c.bf16 %v1571_v11, %v1570_v7  ;;  %6337 = vmatprep.subr.bf16.mxu0 %v6761_v2  ;;  %v1573_v60 = vmul.f32 %v6617_v12, %v7158_v5 }
 0x41a   : > { %v6619_v15 = vpop.eup %6618 }
 0x41b   : > { %v1572_v34 = vmul.f32 %v6619_v15, %v7162_v10  ;;  %6322 = vmatmul.mubr.msk.bf16.vlgmr.msra.gmra.mrb[12].mxu1 %vm1487_vm3, %v1577_v13 }
 0x41c   : > { %v6621_v36 = vpop.eup %6620  ;;  %6332 = vmatpush3.bf16.msra.mxu1 %v1297_v43  ;;  %6333 = vmatprep.mubr.msk.bf16.mxu1 %vm6762_vm0, %v6761_v2 }
 0x41d   : > { %v1578_v1 = vpack.c.bf16 %v1573_v60, %v1572_v34  ;;  %6345 = vmatprep.subr.bf16.mxu1 %v6761_v2  ;;  %v1574_v18 = vmul.f32 %v6621_v36, %v7166_v14 }
 0x41e   : > { %v6623_v17 = vpop.eup %6622 }
 0x41f   : > { %v1575_v61 = vmul.f32 %v6623_v17, %v7168_v16  ;;  %6328 = vmatmul.mubr.msk.bf16.vlgmr.msra.gmra.mrb[16].mxu0 %vm1487_vm3, %v1578_v1 }
 0x420   : > { %6341 = vmatprep.mubr.msk.bf16.mxu0 %vm6762_vm0, %v6761_v2 }
 0x421   : > { %v1579_v5 = vpack.c.bf16 %v1575_v61, %v1574_v18 }
 0x423   : > { %6334 = vmatmul.mubr.msk.bf16.vlgmr.msra.gmra.mrb[16].mxu1 %vm1487_vm3, %v1579_v5 }
 0x424   : > { %6349 = vmatprep.mubr.msk.bf16.mxu1 %vm6762_vm0, %v6761_v2 }
 0x4ea   : > { %v1617_v10 = vpop.f32.mrb[12].mxu0 }
 0x4eb   : > { %v6317_v19 = vpop.f32.mrb[13].mxu0 }
 0x4ec   : > { %v1620_v20 = vpop.f32.mrb[14].mxu0 }
 0x4ed   : > { %v6318_v22 = vpop.f32.mrb[15].mxu0 }
 0x4ee   : > { %v1661_v23 = vpop.f32.mrb[12].mxu1 }
 0x4ef   : > { %v6323_v25 = vpop.f32.mrb[13].mxu1 }
 0x4f0   : > { %v1664_v14 = vpop.f32.mrb[14].mxu1 }
 0x4f1   : > { %v6324_v26 = vpop.f32.mrb[15].mxu1 }
 0x4f2   : > { %v1705_v16 = vpop.f32.mrb[16].mxu0 }
 0x4f3   : > { %v1756_v27 = vcombine.low %v1617_v10, %v1705_v16  ;;  %v1757_v30 = vcombine.high %v1617_v10, %v1705_v16  ;;  %v6329_v31 = vpop.f32.mrb[17].mxu0 }
 0x4f4   : > { %v1708_v28 = vpop.f32.mrb[18].mxu0 }
 0x4f5   : > { %v1824_v32 = vcombine.low %v1620_v20, %v1708_v28  ;;  %v1825_v39 = vcombine.high %v1620_v20, %v1708_v28  ;;  %v6330_v38 = vpop.f32.mrb[19].mxu0  ;;  %v1764_v53 = vrot.slane %v1756_v27, %v6954_v46  ;;  %v1771_v44 = vrot.slane %v1757_v30, %v6954_v46 }
 0x4f6   : > { %v1749_v42 = vpop.f32.mrb[16].mxu1  ;;  %v7263_v38 = vld [vmem:[%s8134_s4 + $0x4] ss:$16 sps:$4 sm:$0xff]  }
 0x4f7   : > { %v1772_v37 = vcombine.low %v1661_v23, %v1749_v42  ;;  %v1773_v41 = vcombine.high %v1661_v23, %v1749_v42  ;;  %v6335_v47 = vpop.f32.mrb[17].mxu1  ;;  %v1832_v48 = vrot.slane %v1824_v32, %v6954_v46  ;;  %v1839_v59 = vrot.slane %v1825_v39, %v6954_v46  ;;  %6338 = vmatpush3.bf16.msra.mxu0 %v7263_v38 }
 0x4f8   : > { %v1752_v49 = vpop.f32.mrb[18].mxu1  ;;  %6339 = vmatprep.subr.bf16.mxu0 %v6761_v2 }
 0x4f9   : > { %v1780_v55 = vrot.slane %v1772_v37, %v6954_v46  ;;  %v1787_v56 = vrot.slane %v1773_v41, %v6954_v46  ;;  %v1840_v50 = vcombine.low %v1664_v14, %v1752_v49  ;;  %v1841_v57 = vcombine.high %v1664_v14, %v1752_v49  ;;  %v6336_v58 = vpop.f32.mrb[19].mxu1 }
 0x4fb   : > { %v1788_v43 = vcombine.low %v1764_v53, %v1780_v55  ;;  %v1789_v45 = vcombine.high %v1764_v53, %v1780_v55  ;;  %v1804_v33 = vcombine.low %v1771_v44, %v1787_v56  ;;  %v1805_v29 = vcombine.high %v1771_v44, %v1787_v56 }
 0x4fc   : > { %v1848_v62 = vrot.slane %v1840_v50, %v6954_v46  ;;  %v1855_v52 = vrot.slane %v1841_v57, %v6954_v46 }
 0x4fd   : > { %v1796_v35 = vrot.slane %v1788_v43, %v6964_v51  ;;  %v1803_v40 = vrot.slane %v1789_v45, %v6964_v51  ;;  %v1812_v63 = vrot.slane %v1804_v33, %v6964_v51  ;;  %v1819_v54 = vrot.slane %v1805_v29, %v6964_v51  ;;  %v7276_v43 = vld [vmem:[%s8134_s4 + $0x24] ss:$16 sps:$4 sm:$0xff]  }
 0x4fe   : > { %v1856_v0 = vcombine.low %v1832_v48, %v1848_v62  ;;  %v1857_v3 = vcombine.high %v1832_v48, %v1848_v62  ;;  %v1872_v4 = vcombine.low %v1839_v59, %v1855_v52  ;;  %v1873_v6 = vcombine.high %v1839_v59, %v1855_v52  ;;  %6340 = vmatpush3.bf16.msra.mxu0 %v7276_v43 }
 0x4ff   : > { %v1892_v7 = vcombine.low %v1796_v35, %v1803_v40  ;;  %v6111_v11 = vcombine.high %v1796_v35, %v1803_v40  ;;  %v1908_v12 = vcombine.low %v1812_v63, %v1819_v54  ;;  %v6112_v13 = vcombine.high %v1812_v63, %v1819_v54  ;;  %6353 = vmatprep.subr.bf16.mxu0 %v6761_v2 }
 0x500   : > { %v1864_v15 = vrot.slane %v1856_v0, %v6964_v51  ;;  %v1871_v60 = vrot.slane %v1857_v3, %v6964_v51  ;;  %v1880_v34 = vrot.slane %v1872_v4, %v6964_v51  ;;  %v1887_v36 = vrot.slane %v1873_v6, %v6964_v51 }
 0x501   : > { %v1899_v1 = vrot.slane %v1892_v7, %v6954_v46  ;;  %v1907_v17 = vrot.slane %v6111_v11, %v6954_v46  ;;  %v1915_v18 = vrot.slane %v1908_v12, %v6954_v46  ;;  %v1923_v61 = vrot.slane %v6112_v13, %v6954_v46 }
 0x502   : > { %v1960_v5 = vcombine.low %v1864_v15, %v1871_v60  ;;  %v6113_v10 = vcombine.high %v1864_v15, %v1871_v60  ;;  %v1976_v19 = vcombine.low %v1880_v34, %v1887_v36  ;;  %v6114_v20 = vcombine.high %v1880_v34, %v1887_v36  ;;  %v7300_v15 = vld [vmem:[%s8135_s5 + $0x1] ss:$0 sm:$0xff] }
 0x503   : > { %v1925_v22 = vcombine.high %v1899_v1, %v1907_v17  ;;  %v1941_v23 = vcombine.high %v1915_v18, %v1923_v61  ;;  %v1924_v25 = vcombine.low %v1899_v1, %v1907_v17  ;;  %v1940_v14 = vcombine.low %v1915_v18, %v1923_v61 }
 0x504   : > { %v1967_v26 = vrot.slane %v1960_v5, %v6954_v46  ;;  %v1975_v16 = vrot.slane %v6113_v10, %v6954_v46  ;;  %v1983_v27 = vrot.slane %v1976_v19, %v6954_v46  ;;  %v1991_v30 = vrot.slane %v6114_v20, %v6954_v46 }
 0x505   : > { %v1939_v31 = vrot.slane %v1925_v22, %v6964_v51  ;;  %v1955_v28 = vrot.slane %v1941_v23, %v6964_v51  ;;  %v1932_v32 = vrot.slane %v1924_v25, %v6964_v51  ;;  %v1948_v39 = vrot.slane %v1940_v14, %v6964_v51  ;;  %v6119_v23 = vld [vmem:[%s8135_s5 + $0x4] ss:$0 sm:$0xff] }
 0x506   : > { %v1993_v42 = vcombine.high %v1967_v26, %v1975_v16  ;;  %v2009_v37 = vcombine.high %v1983_v27, %v1991_v30  ;;  %v1992_v41 = vcombine.low %v1967_v26, %v1975_v16  ;;  %v2008_v47 = vcombine.low %v1983_v27, %v1991_v30 }
 0x507   : > { %v1958_v53 = vcombine.low %v1939_v31, %v1955_v28  ;;  %v1957_v44 = vcombine.high %v1932_v32, %v1948_v39  ;;  %v1959_v49 = vcombine.high %v1939_v31, %v1955_v28  ;;  %v1956_v55 = vcombine.low %v1932_v32, %v1948_v39 }
 0x508   : > { %v2007_v56 = vrot.slane %v1993_v42, %v6964_v51  ;;  %v2023_v50 = vrot.slane %v2009_v37, %v6964_v51  ;;  %v2000_v57 = vrot.slane %v1992_v41, %v6964_v51  ;;  %v2016_v58 = vrot.slane %v2008_v47, %v6964_v51 }
 0x509   : > { %2038 = vrot.lane.b32.xlu1 %v1958_v53, %s6769_s9  ;;  %2030 = vrot.lane.b32.xlu0 %v1957_v44, %s6770_s10 }
 0x50a   : > { %v2026_v45 = vcombine.low %v2007_v56, %v2023_v50  ;;  %v2027_v33 = vcombine.high %v2007_v56, %v2023_v50  ;;  %v2025_v29 = vcombine.high %v2000_v57, %v2016_v58  ;;  %v2024_v48 = vcombine.low %v2000_v57, %v2016_v58 }
 0x50d   : > { %2046 = vrot.lane.b32.xlu1 %v1959_v49, %s6771_s14  ;;  %2040 = vrot.lane.b32.xlu0 %v2026_v45, %s6769_s9 }
 0x511   : > { %2048 = vrot.lane.b32.xlu0 %v2027_v33, %s6771_s14  ;;  %2032 = vrot.lane.b32.xlu1 %v2025_v29, %s6770_s10 }
 0x515   : > { %2061 = vrot.lane.b32.xlu0 %v6914_v24, %s6768_s26  ;;  %2059 = vrot.lane.b32.xlu1 %v6912_v21, %s6768_s26 }
 0x57b   : > { %v2039_v59 = vpop.permute.xlu1 %2038  ;;  %v2031_v62 = vpop.permute.xlu0 %2030 }
 0x57c   : > { %v2052_v40 = vsel %vm1298_vm2, %v1956_v55, %v2031_v62 }
 0x57d   : > { %v2054_v4 = vsel %vm1487_vm3, %v2052_v40, %v2039_v59 }
 0x57f   : > { %v2047_v52 = vpop.permute.xlu1 %2046  ;;  %v2041_v35 = vpop.permute.xlu0 %2040 }
 0x580   : > { %v2057_v6 = vsel %vm2056_vm4, %v2054_v4, %v2047_v52 }
 0x583   : > { %v2049_v63 = vpop.permute.xlu0 %2048  ;;  %v2033_v54 = vpop.permute.xlu1 %2032 }
 0x584   : > { %v2053_v0 = vsel %vm1298_vm2, %v2024_v48, %v2033_v54 }
 0x585   : > { %v2055_v3 = vsel %vm1487_vm3, %v2053_v0, %v2041_v35 }
 0x586   : > { %v2058_v24 = vsel %vm2056_vm4, %v2055_v3, %v2049_v63 }
 0x587   : > { %v2062_v21 = vpop.permute.xlu0 %2061  ;;  %v2060_v7 = vpop.permute.xlu1 %2059 }
 0x588   : > { %v2066_v11 = vadd.f32 %v2062_v21, %v2058_v24  ;;  %v2065_v12 = vadd.f32 %v2060_v7, %v2057_v6 }
 0x58a   : > { %v2067_v13 = vpack.c.bf16 %v2066_v11, %v2065_v12 }
 0x58c   : > { %6342 = vmatmul.mubr.msk.bf16.vlgmr.msra.gmra.mrb[20].mxu0 %vm307_vm1, %v2067_v13 }
 0x58d   : > { %6357 = vmatprep.mubr.msk.bf16.mxu0 %vm6762_vm0, %v6761_v2 }
 0x65f   : > { %v2128_v60 = vpop.f32.mrb[20].mxu0 }
 0x660   : > { %v2129_v34 = vadd.f32 %v7300_v15, %v2128_v60  ;;  %v6343_v36 = vpop.f32.mrb[21].mxu0 }
 0x661   : > { %v2131_v1 = vpop.f32.mrb[22].mxu0 }
 0x662   : > { %v7304_v17 = vadd.f32 %v2129_v34, %v6889_v8  ;;  %v2132_v18 = vadd.f32 %v7300_v15, %v2131_v1  ;;  %v6344_v61 = vpop.f32.mrb[23].mxu0 }
 0x664   : > { %v7308_v5 = vadd.f32 %v2132_v18, %v6891_v9  ;;  %v2137_v10 = vsel %vm307_vm1, %v7304_v17, 0.0  ;;  %v2143_v8 = vmul.f32 %v7304_v17, %v7304_v17 }
 0x665   : > { %2138 = vadd.xlane.f32.xlu1 %v2137_v10 }
 0x666   : > { %v2140_v19 = vsel %vm307_vm1, %v7308_v5, 0.0  ;;  %v2144_v20 = vmul.f32 %v7308_v5, %v7308_v5  ;;  %v2145_v9 = vsel %vm307_vm1, %v2143_v8, 0.0 }
 0x667   : > { %2141 = vadd.xlane.f32.xlu0 %v2140_v19 }
 0x668   : > { %v2148_v22 = vsel %vm307_vm1, %v2144_v20, 0.0 }
 0x669   : > { %2149 = vadd.xlane.f32.xlu1 %v2148_v22 }
 0x66b   : > { %2146 = vadd.xlane.f32.xlu0 %v2145_v9 }
 0x67a   : > { %2192 = vrot.lane.b32.xlu1 %v6119_v23, %s6768_s26 }
 0x67e   : > { %2200 = vrot.lane.b32.xlu1 %v7276_v43, %s6768_s26 }
 0x681   : > { %2198 = vrot.lane.b32.xlu0 %v7263_v38, %s6768_s26 }
 0x682   : > { %2258 = vrot.lane.b32.xlu1 %v7263_v38, %s6760_s11 }
 0x685   : > { %2204 = vrot.lane.b32.xlu0 %v7300_v15, %s6768_s26 }
 0x686   : > { %2264 = vrot.lane.b32.xlu1 %v7300_v15, %s6760_s11 }
 0x689   : > { %2260 = vrot.lane.b32.xlu0 %v7276_v43, %s6760_s11 }
 0x68a   : > { %2320 = vrot.lane.b32.xlu1 %v7276_v43, %s6772_s29 }
 0x68d   : > { %2318 = vrot.lane.b32.xlu0 %v7263_v38, %s6772_s29 }
 0x691   : > { %2324 = vrot.lane.b32.xlu0 %v7300_v15, %s6772_s29 }
 0x6f2   : > { %v2139_v25 = vpop.xlane.xlu1 %2138 }
 0x6f3   : > { %v2151_v14 = vmul.f32 0.03125, %v2139_v25 }
 0x6f4   : > { %v2142_v26 = vpop.xlane.xlu0 %2141 }
 0x6f5   : > { %v2152_v16 = vmul.f32 0.03125, %v2142_v26  ;;  %v2153_v30 = vmul.f32 %v2151_v14, %v2139_v25  ;;  %v2162_v40 = vsub.f32 %v7304_v17, %v2151_v14 }
 0x6f6   : > { %v2150_v27 = vpop.xlane.xlu1 %2149 }
 0x6f7   : > { %v2154_v31 = vmul.f32 %v2152_v16, %v2142_v26  ;;  %v2163_v35 = vsub.f32 %v7308_v5, %v2152_v16  ;;  %v2170_v0 = vmul.f32 %v6119_v23, %v2162_v40 }
 0x6f8   : > { %v2147_v28 = vpop.xlane.xlu0 %2146 }
 0x6f9   : > { %v2156_v32 = vsub.f32 %v2150_v27, %v2154_v31  ;;  %v2155_v39 = vsub.f32 %v2147_v28, %v2153_v30  ;;  %v2171_v63 = vmul.f32 %v6119_v23, %v2163_v35  ;;  %v6584_v28 = vld [vmem:[%s8134_s4 + $0x8] ss:$16 sps:$4 sm:$0xff]  }
 0x6fa   : > { %v2193_v42 = vpop.permute.xlu1 %2192 }
 0x6fb   : > { %v2158_v37 = vmul.f32 0.032258064, %v2156_v32  ;;  %v2157_v41 = vmul.f32 0.032258064, %v2155_v39  ;;  %v6585_v32 = vld [vmem:[%s8134_s4 + $0x28] ss:$16 sps:$4 sm:$0xff]  }
 0x6fc   : > { %v2199_v47 = vpop.permute.xlu0 %2198 }
 0x6fd   : > { %v2160_v53 = vmax.f32 %v2158_v37, 0.0  ;;  %v2159_v44 = vmax.f32 %v2157_v41, 0.0  ;;  %6346 = vmatpush3.bf16.msra.mxu1 %v2199_v47 }
 0x6fe   : > { %v2201_v49 = vpop.permute.xlu1 %2200  ;;  %6347 = vmatprep.subr.bf16.mxu1 %v6761_v2 }
 0x6ff   : > { %6624 = vrsqrt.f32 %v2160_v53  ;;  %vm2181_vm5 = vcmp.eq.f32.partialorder %v2160_v53, inf  ;;  %v2184_v58 = vand.u32 2147483648, %v2160_v53  ;;  %vm2174_vm6 = vcmp.eq.f32.partialorder %v2159_v44, inf }
 0x700   : > { %6626 = vrsqrt.f32 %v2159_v44  ;;  %v2177_v45 = vand.u32 2147483648, %v2159_v44  ;;  %vm2183_vm7 = vcmp.eq.f32.partialorder %v2160_v53, 0.0  ;;  %vm2176_vm8 = vcmp.eq.f32.partialorder %v2159_v44, 0.0  ;;  %v2205_v11 = vpop.permute.xlu0 %2204 }
 0x701   : > { %6348 = vmatpush3.bf16.msra.mxu1 %v2201_v49 }
 0x702   : > { %6361 = vmatprep.subr.bf16.mxu1 %v6761_v2  ;;  %v2259_v12 = vpop.permute.xlu1 %2258 }
 0x703   : > { %6354 = vmatpush3.bf16.msra.mxu0 %v2259_v12 }
 0x704   : > { %6355 = vmatprep.subr.bf16.mxu0 %v6761_v2  ;;  %v2261_v13 = vpop.permute.xlu0 %2260 }
 0x706   : > { %v2265_v38 = vpop.permute.xlu1 %2264 }
 0x707   : > { %6356 = vmatpush3.bf16.msra.mxu0 %v2261_v13 }
 0x708   : > { %6369 = vmatprep.subr.bf16.mxu0 %v6761_v2  ;;  %v2319_v43 = vpop.permute.xlu0 %2318 }
 0x709   : > { %v6625_v55 = vpop.eup %6624 }
 0x70a   : > { %v6627_v56 = vpop.eup %6626  ;;  %v2180_v50 = vmul.f32 %v6625_v55, %v2160_v53  ;;  %v2321_v15 = vpop.permute.xlu1 %2320 }
 0x70b   : > { %v2173_v57 = vmul.f32 %v6627_v56, %v2159_v44 }
 0x70c   : > { %v2182_v33 = vsel %vm2181_vm5, %v2160_v53, %v2180_v50  ;;  %v2325_v39 = vpop.permute.xlu0 %2324 }
 0x70d   : > { %v2175_v29 = vsel %vm2174_vm6, %v2159_v44, %v2173_v57  ;;  %v2185_v48 = vsel %vm2183_vm7, %v2184_v58, %v2182_v33  ;;  %v6123_v33 = vld [vmem:[%s8135_s5 + $0x2] ss:$0 sm:$0xff] }
 0x70e   : > { %v2178_v59 = vsel %vm2176_vm8, %v2177_v45, %v2175_v29  ;;  %v2187_v62 = vadd.f32 1e-06, %v2185_v48 }
 0x70f   : > { %v2186_v52 = vadd.f32 1e-06, %v2178_v59 }
 0x710   : > { %6628 = vrcp.f32 %v2187_v62 }
 0x711   : > { %6630 = vrcp.f32 %v2186_v52 }
 0x71a   : > { %v6629_v54 = vpop.eup %6628 }
 0x71b   : > { %v6631_v3 = vpop.eup %6630  ;;  %v2191_v4 = vmul.f32 %v6629_v54, %v2171_v63 }
 0x71c   : > { %v2190_v24 = vmul.f32 %v6631_v3, %v2170_v0 }
 0x71d   : > { %v7340_v6 = vadd.f32 %v2193_v42, %v2191_v4 }
 0x71e   : > { %v7342_v21 = vadd.f32 %v2193_v42, %v2190_v24 }
 0x720   : > { %v2197_v7 = vpack.c.bf16 %v7340_v6, %v7342_v21 }
 0x722   : > { %6350 = vmatmul.mubr.msk.bf16.vlgmr.msra.gmra.mrb[20].mxu1 %vm307_vm1, %v2197_v7 }
 0x723   : > { %6365 = vmatprep.mubr.msk.bf16.mxu1 %vm6762_vm0, %v6761_v2  ;;  %6362 = vmatpush3.bf16.msra.mxu1 %v2319_v43 }
 0x724   : > { %6363 = vmatprep.subr.bf16.mxu1 %v6761_v2 }
 0x727   : > { %6364 = vmatpush3.bf16.msra.mxu1 %v2321_v15 }
 0x728   : > { %6377 = vmatprep.subr.bf16.mxu1 %v6761_v2 }
 0x7f5   : > { %v2244_v60 = vpop.f32.mrb[20].mxu1 }
 0x7f6   : > { %v2245_v34 = vadd.f32 %v2244_v60, %v2205_v11  ;;  %v6351_v36 = vpop.f32.mrb[21].mxu1 }
 0x7f7   : > { %v2247_v1 = vpop.f32.mrb[22].mxu1 }
 0x7f8   : > { %v2253_v17 = vmul.f32 0.01, %v2245_v34  ;;  %v2248_v18 = vadd.f32 %v2247_v1, %v2205_v11  ;;  %v6352_v61 = vpop.f32.mrb[23].mxu1  ;;  %vm2251_vm9 = vcmp.ge.f32.partialorder %v2245_v34, 0.0 }
 0x7fa   : > { %vm2252_vm10 = vcmp.ge.f32.partialorder %v2248_v18, 0.0  ;;  %v2254_v5 = vmul.f32 0.01, %v2248_v18  ;;  %v2255_v10 = vsel %vm2251_vm9, %v2245_v34, %v2253_v17 }
 0x7fc   : > { %v2256_v19 = vsel %vm2252_vm10, %v2248_v18, %v2254_v5 }
 0x7fd   : > { %v2257_v20 = vpack.c.bf16 %v2256_v19, %v2255_v10 }
 0x7ff   : > { %6358 = vmatmul.mubr.msk.bf16.vlgmr.msra.gmra.mrb[24].mxu0 %vm307_vm1, %v2257_v20 }
 0x800   : > { %6373 = vmatprep.mubr.msk.bf16.mxu0 %vm6762_vm0, %v6761_v2  ;;  %6370 = vmatpush3.bf16.msra.mxu0 %v6584_v28 }
 0x801   : > { %6371 = vmatprep.subr.bf16.mxu0 %v6761_v2 }
 0x804   : > { %6372 = vmatpush3.bf16.msra.mxu0 %v6585_v32 }
 0x805   : > { %6383 = vmatprep.subr.bf16.mxu0 %v6761_v2 }
 0x8d2   : > { %v2304_v8 = vpop.f32.mrb[24].mxu0 }
 0x8d3   : > { %v2305_v22 = vadd.f32 %v2304_v8, %v2265_v38  ;;  %v6359_v9 = vpop.f32.mrb[25].mxu0 }
 0x8d4   : > { %v2307_v23 = vpop.f32.mrb[26].mxu0 }
 0x8d5   : > { %v2313_v25 = vmul.f32 0.01, %v2305_v22  ;;  %v2308_v14 = vadd.f32 %v2307_v23, %v2265_v38  ;;  %v6360_v26 = vpop.f32.mrb[27].mxu0  ;;  %vm2311_vm11 = vcmp.ge.f32.partialorder %v2305_v22, 0.0 }
 0x8d7   : > { %vm2312_vm12 = vcmp.ge.f32.partialorder %v2308_v14, 0.0  ;;  %v2314_v16 = vmul.f32 0.01, %v2308_v14  ;;  %v2315_v27 = vsel %vm2311_vm11, %v2305_v22, %v2313_v25 }
 0x8d9   : > { %v2316_v30 = vsel %vm2312_vm12, %v2308_v14, %v2314_v16 }
 0x8da   : > { %v2317_v31 = vpack.c.bf16 %v2316_v30, %v2315_v27 }
 0x8dc   : > { %6366 = vmatmul.mubr.msk.bf16.vlgmr.msra.gmra.mrb[24].mxu1 %vm307_vm1, %v2317_v31 }
 0x8dd   : > { %6379 = vmatprep.mubr.msk.bf16.mxu1 %vm6762_vm0, %v6761_v2 }
 0x9af   : > { %v2364_v42 = vpop.f32.mrb[24].mxu1 }
 0x9b0   : > { %v2365_v37 = vadd.f32 %v2364_v42, %v2325_v39  ;;  %v6367_v41 = vpop.f32.mrb[25].mxu1 }
 0x9b1   : > { %v2367_v47 = vpop.f32.mrb[26].mxu1 }
 0x9b2   : > { %vm2371_vm13 = vcmp.ge.f32.partialorder %v2365_v37, 0.0  ;;  %v2373_v53 = vmul.f32 0.01, %v2365_v37  ;;  %v2368_v44 = vadd.f32 %v2367_v47, %v2325_v39  ;;  %v6368_v49 = vpop.f32.mrb[27].mxu1 }
 0x9b4   : > { %v2375_v55 = vsel %vm2371_vm13, %v2365_v37, %v2373_v53  ;;  %vm2372_vm14 = vcmp.ge.f32.partialorder %v2368_v44, 0.0  ;;  %v2374_v56 = vmul.f32 0.01, %v2368_v44 }
 0x9b5   : > { %v2377_v57 = vadd.f32 %v2375_v55, %v7342_v21 }
 0x9b6   : > { %v2376_v50 = vsel %vm2372_vm14, %v2368_v44, %v2374_v56 }
 0x9b7   : > { %v2378_v58 = vadd.f32 %v2376_v50, %v7340_v6 }
 0x9b9   : > { %v2379_v45 = vpack.c.bf16 %v2378_v58, %v2377_v57 }
 0x9bb   : > { %6374 = vmatmul.mubr.msk.bf16.vlgmr.msra.gmra.mrb[28].mxu0 %vm307_vm1, %v2379_v45 }
 0x9bc   : > { %6385 = vmatprep.mubr.msk.bf16.mxu0 %vm6762_vm0, %v6761_v2 }
 0xa8e   : > { %v2440_v29 = vpop.f32.mrb[28].mxu0 }
 0xa8f   : > { %v7381_v48 = vadd.f32 %v6123_v33, %v2440_v29  ;;  %v6375_v59 = vpop.f32.mrb[29].mxu0 }
 0xa90   : > { %v2443_v62 = vpop.f32.mrb[30].mxu0 }
 0xa91   : > { %v7383_v52 = vadd.f32 %v6123_v33, %v2443_v62  ;;  %2449 = vrot.lane.b32.xlu1 %v7381_v48, %s6763_s18  ;;  %v6376_v35 = vpop.f32.mrb[31].mxu0 }
 0xa93   : > { %2451 = vrot.lane.b32.xlu0 %v7383_v52, %s6763_s18 }
 0xa95   : > { %2455 = vrot.lane.b32.xlu1 %v7381_v48, %s6764_s19 }
 0xa97   : > { %2457 = vrot.lane.b32.xlu0 %v7383_v52, %s6764_s19 }
 0xa99   : > { %2461 = vrot.lane.b32.xlu1 %v7381_v48, %s6765_s20 }
 0xa9b   : > { %2463 = vrot.lane.b32.xlu0 %v7383_v52, %s6765_s20 }
 0xa9d   : > { %2743 = vrot.lane.b32.xlu1 %v7381_v48, %s6768_s26 }
 0xa9f   : > { %2745 = vrot.lane.b32.xlu0 %v7383_v52, %s6768_s26 }
 0xb03   : > { %v7401_v40 = vpop.permute.xlu1 %2449 }
 0xb04   : > { %2747 = vrot.lane.b32.xlu1 %v7401_v40, %s6768_s26 }
 0xb05   : > { %v7405_v63 = vpop.permute.xlu0 %2451 }
 0xb06   : > { %2749 = vrot.lane.b32.xlu0 %v7405_v63, %s6768_s26 }
 0xb07   : > { %v7409_v54 = vpop.permute.xlu1 %2455 }
 0xb08   : > { %2751 = vrot.lane.b32.xlu1 %v7409_v54, %s6768_s26  ;;  %v2467_v6 = vcombine.low %v7381_v48, %v7409_v54  ;;  %v2468_v11 = vcombine.high %v7381_v48, %v7409_v54 }
 0xb09   : > { %v7413_v0 = vpop.permute.xlu0 %2457 }
 0xb0a   : > { %2753 = vrot.lane.b32.xlu0 %v7413_v0, %s6768_s26  ;;  %v2535_v13 = vcombine.low %v7383_v52, %v7413_v0  ;;  %v2475_v60 = vrot.slane %v2467_v6, %v6954_v46  ;;  %v2482_v18 = vrot.slane %v2468_v11, %v6954_v46  ;;  %v2536_v10 = vcombine.high %v7383_v52, %v7413_v0 }
 0xb0b   : > { %v7417_v3 = vpop.permute.xlu1 %2461 }
 0xb0c   : > { %2755 = vrot.lane.b32.xlu1 %v7417_v3, %s6768_s26  ;;  %v2483_v24 = vcombine.low %v7401_v40, %v7417_v3  ;;  %v2484_v21 = vcombine.high %v7401_v40, %v7417_v3  ;;  %v2543_v19 = vrot.slane %v2535_v13, %v6954_v46  ;;  %v2550_v14 = vrot.slane %v2536_v10, %v6954_v46 }
 0xb0d   : > { %v7421_v4 = vpop.permute.xlu0 %2463 }
 0xb0e   : > { %2757 = vrot.lane.b32.xlu0 %v7421_v4, %s6768_s26  ;;  %v2551_v7 = vcombine.low %v7405_v63, %v7421_v4  ;;  %v2491_v12 = vrot.slane %v2483_v24, %v6954_v46  ;;  %v2498_v34 = vrot.slane %v2484_v21, %v6954_v46  ;;  %v2552_v36 = vcombine.high %v7405_v63, %v7421_v4 }
 0xb0f   : > { %v2744_v17 = vpop.permute.xlu1 %2743 }
 0xb10   : > { %v2559_v1 = vrot.slane %v2551_v7, %v6954_v46  ;;  %v2499_v61 = vcombine.low %v2475_v60, %v2491_v12  ;;  %v2500_v5 = vcombine.high %v2475_v60, %v2491_v12  ;;  %v2515_v38 = vcombine.low %v2482_v18, %v2498_v34 }
 0xb11   : > { %v2746_v20 = vpop.permute.xlu0 %2745  ;;  %v2516_v43 = vcombine.high %v2482_v18, %v2498_v34  ;;  %v2566_v15 = vrot.slane %v2552_v36, %v6954_v46 }
 0xb12   : > { %v2567_v8 = vcombine.low %v2543_v19, %v2559_v1  ;;  %v2568_v22 = vcombine.high %v2543_v19, %v2559_v1  ;;  %v2507_v23 = vrot.slane %v2499_v61, %v6964_v51  ;;  %v2514_v25 = vrot.slane %v2500_v5, %v6964_v51 }
 0xb13   : > { %v7452_v16 = vrot.slane %v2515_v38, %v6964_v51  ;;  %v7455_v27 = vrot.slane %v2516_v43, %v6964_v51  ;;  %v2583_v28 = vcombine.low %v2550_v14, %v2566_v15  ;;  %v2584_v32 = vcombine.high %v2550_v14, %v2566_v15 }
 0xb14   : > { %v2575_v30 = vrot.slane %v2567_v8, %v6964_v51  ;;  %v2582_v31 = vrot.slane %v2568_v22, %v6964_v51  ;;  %v2603_v42 = vcombine.low %v2507_v23, %v2514_v25  ;;  %v6127_v37 = vcombine.high %v2507_v23, %v2514_v25 }
 0xb15   : > { %v2619_v44 = vcombine.low %v7452_v16, %v7455_v27  ;;  %v6128_v49 = vcombine.high %v7452_v16, %v7455_v27  ;;  %v2591_v55 = vrot.slane %v2583_v28, %v6964_v51  ;;  %v2598_v56 = vrot.slane %v2584_v32, %v6964_v51 }
 0xb16   : > { %v2671_v50 = vcombine.low %v2575_v30, %v2582_v31  ;;  %v6129_v57 = vcombine.high %v2575_v30, %v2582_v31  ;;  %v7466_v45 = vrot.slane %v2603_v42, %v6954_v46  ;;  %v7469_v33 = vrot.slane %v6127_v37, %v6954_v46 }
 0xb17   : > { %v2687_v36 = vcombine.low %v2591_v55, %v2598_v56  ;;  %v6130_v1 = vcombine.high %v2591_v55, %v2598_v56 }
 0xb18   : > { %v7476_v60 = vrot.slane %v2671_v50, %v6954_v46  ;;  %v7479_v34 = vrot.slane %v6129_v57, %v6954_v46  ;;  %v2635_v16 = vcombine.low %v7466_v45, %v7469_v33 }
 0xb76   : > { %v2748_v9 = vpop.permute.xlu1 %2747 }
 0xb78   : > { %v2750_v26 = vpop.permute.xlu0 %2749 }
 0xb7a   : > { %v2752_v39 = vpop.permute.xlu1 %2751 }
 0xb7b   : > { %v2767_v41 = vcombine.low %v2744_v17, %v2752_v39  ;;  %v2768_v47 = vcombine.high %v2744_v17, %v2752_v39 }
 0xb7c   : > { %v2754_v53 = vpop.permute.xlu0 %2753 }
 0xb7d   : > { %v2775_v62 = vrot.slane %v2767_v41, %v6954_v46  ;;  %v2782_v35 = vrot.slane %v2768_v47, %v6954_v46  ;;  %v2835_v24 = vcombine.low %v2746_v20, %v2754_v53  ;;  %v2836_v6 = vcombine.high %v2746_v20, %v2754_v53 }
 0xb7e   : > { %v2756_v58 = vpop.permute.xlu1 %2755 }
 0xb7f   : > { %v2783_v29 = vcombine.low %v2748_v9, %v2756_v58  ;;  %v2784_v59 = vcombine.high %v2748_v9, %v2756_v58  ;;  %v2843_v10 = vrot.slane %v2835_v24, %v6954_v46  ;;  %v2850_v19 = vrot.slane %v2836_v6, %v6954_v46 }
 0xb80   : > { %v2758_v21 = vpop.permute.xlu0 %2757 }
 0xb81   : > { %v2791_v7 = vrot.slane %v2783_v29, %v6954_v46  ;;  %v2798_v11 = vrot.slane %v2784_v59, %v6954_v46  ;;  %v2851_v12 = vcombine.low %v2750_v26, %v2758_v21  ;;  %v2852_v13 = vcombine.high %v2750_v26, %v2758_v21 }
 0xb82   : > { %v2694_v29 = vrot.slane %v2687_v36, %v6954_v46  ;;  %v2702_v59 = vrot.slane %v6130_v1, %v6954_v46 }
 0xb83   : > { %v2799_v17 = vcombine.low %v2775_v62, %v2791_v7  ;;  %v2800_v18 = vcombine.high %v2775_v62, %v2791_v7  ;;  %v2815_v61 = vcombine.low %v2782_v35, %v2798_v11  ;;  %v2816_v5 = vcombine.high %v2782_v35, %v2798_v11 }
 0xb84   : > { %v2859_v20 = vrot.slane %v2851_v12, %v6954_v46  ;;  %v2866_v38 = vrot.slane %v2852_v13, %v6954_v46  ;;  %v2626_v11 = vrot.slane %v2619_v44, %v6954_v46  ;;  %v2634_v12 = vrot.slane %v6128_v49, %v6954_v46 }
 0xb85   : > { %v2807_v43 = vrot.slane %v2799_v17, %v6964_v51  ;;  %v2814_v15 = vrot.slane %v2800_v18, %v6964_v51  ;;  %v2823_v8 = vrot.slane %v2815_v61, %v6964_v51  ;;  %v2830_v22 = vrot.slane %v2816_v5, %v6964_v51 }
 0xb86   : > { %v2867_v9 = vcombine.low %v2843_v10, %v2859_v20  ;;  %v2868_v23 = vcombine.high %v2843_v10, %v2859_v20  ;;  %v2883_v25 = vcombine.low %v2850_v19, %v2866_v38  ;;  %v2884_v14 = vcombine.high %v2850_v19, %v2866_v38 }
 0xb87   : > { %v2903_v26 = vcombine.low %v2807_v43, %v2814_v15  ;;  %v6131_v30 = vcombine.high %v2807_v43, %v2814_v15  ;;  %v2919_v31 = vcombine.low %v2823_v8, %v2830_v22  ;;  %v6132_v28 = vcombine.high %v2823_v8, %v2830_v22 }
 0xb88   : > { %v2875_v32 = vrot.slane %v2867_v9, %v6964_v51  ;;  %v2882_v39 = vrot.slane %v2868_v23, %v6964_v51  ;;  %v2891_v42 = vrot.slane %v2883_v25, %v6964_v51  ;;  %v2898_v37 = vrot.slane %v2884_v14, %v6964_v51 }
 0xb89   : > { %v2910_v41 = vrot.slane %v2903_v26, %v6954_v46  ;;  %v2918_v47 = vrot.slane %v6131_v30, %v6954_v46  ;;  %v2926_v53 = vrot.slane %v2919_v31, %v6954_v46  ;;  %v2934_v55 = vrot.slane %v6132_v28, %v6954_v46 }
 0xb8a   : > { %v2971_v56 = vcombine.low %v2875_v32, %v2882_v39  ;;  %v6133_v50 = vcombine.high %v2875_v32, %v2882_v39  ;;  %v2987_v57 = vcombine.low %v2891_v42, %v2898_v37  ;;  %v6134_v58 = vcombine.high %v2891_v42, %v2898_v37 }
 0xb8b   : > { %v2935_v62 = vcombine.low %v2910_v41, %v2918_v47  ;;  %v2951_v35 = vcombine.low %v2926_v53, %v2934_v55  ;;  %v2703_v5 = vcombine.low %v7476_v60, %v7479_v34  ;;  %v2719_v10 = vcombine.low %v2694_v29, %v2702_v59 }
 0xb8c   : > { %v2978_v24 = vrot.slane %v2971_v56, %v6954_v46  ;;  %v2986_v6 = vrot.slane %v6133_v50, %v6954_v46  ;;  %v2994_v21 = vrot.slane %v2987_v57, %v6954_v46  ;;  %v3002_v7 = vrot.slane %v6134_v58, %v6954_v46 }
 0xb8d   : > { %v2943_v13 = vrot.slane %v2935_v62, %v6964_v51  ;;  %v2959_v36 = vrot.slane %v2951_v35, %v6964_v51  ;;  %v2936_v20 = vcombine.high %v2910_v41, %v2918_v47  ;;  %v2952_v38 = vcombine.high %v2926_v53, %v2934_v55 }
 0xb8e   : > { %v3003_v1 = vcombine.low %v2978_v24, %v2986_v6  ;;  %v3019_v17 = vcombine.low %v2994_v21, %v3002_v7  ;;  %v3004_v18 = vcombine.high %v2978_v24, %v2986_v6  ;;  %v3020_v61 = vcombine.high %v2994_v21, %v3002_v7 }
 0xb8f   : > { %v2651_v27 = vcombine.low %v2626_v11, %v2634_v12  ;;  %v2967_v49 = vcombine.low %v2943_v13, %v2959_v36  ;;  %v2968_v43 = vcombine.high %v2943_v13, %v2959_v36  ;;  %v2711_v23 = vrot.slane %v2703_v5, %v6964_v51 }
 0xb90   : > { %v3011_v19 = vrot.slane %v3003_v1, %v6964_v51  ;;  %v3027_v44 = vrot.slane %v3019_v17, %v6964_v51  ;;  %v3018_v22 = vrot.slane %v3004_v18, %v6964_v51  ;;  %v3034_v9 = vrot.slane %v3020_v61, %v6964_v51 }
 0xb91   : > { %v2727_v25 = vrot.slane %v2719_v10, %v6964_v51  ;;  %v2950_v30 = vrot.slane %v2936_v20, %v6964_v51  ;;  %v2966_v31 = vrot.slane %v2952_v38, %v6964_v51  ;;  %v2643_v28 = vrot.slane %v2635_v16, %v6964_v51 }
 0xb92   : > { %v3035_v15 = vcombine.low %v3011_v19, %v3027_v44  ;;  %v3036_v8 = vcombine.high %v3011_v19, %v3027_v44  ;;  %v2659_v32 = vrot.slane %v2651_v27, %v6964_v51  ;;  %v3037_v37 = vcombine.low %v3018_v22, %v3034_v9 }
 0xb93   : > { %v3038_v41 = vcombine.high %v3018_v22, %v3034_v9  ;;  %v2704_v47 = vcombine.high %v7476_v60, %v7479_v34  ;;  %v2720_v53 = vcombine.high %v2694_v29, %v2702_v59  ;;  %v2735_v55 = vcombine.low %v2711_v23, %v2727_v25 }
 0xb94   : > { %v3039_v14 = vpack.c.bf16 %v3035_v15, %v2967_v49  ;;  %v3040_v26 = vpack.c.bf16 %v3036_v8, %v2968_v43  ;;  %v2736_v56 = vcombine.high %v2711_v23, %v2727_v25  ;;  %v2969_v50 = vcombine.low %v2950_v30, %v2966_v31 }
 0xb95   : > { %v2970_v57 = vcombine.high %v2950_v30, %v2966_v31  ;;  %v2636_v58 = vcombine.high %v7466_v45, %v7469_v33  ;;  %v2652_v62 = vcombine.high %v2626_v11, %v2634_v12  ;;  %v2667_v35 = vcombine.low %v2643_v28, %v2659_v32 }
 0xb96   : > { %v3347_v39 = vsel %vm1298_vm2, %v3039_v14, 0  ;;  %v3394_v42 = vsel %vm1298_vm2, %v3040_v26, 0  ;;  %v2668_v24 = vcombine.high %v2643_v28, %v2659_v32  ;;  %v3041_v6 = vpack.c.bf16 %v3037_v37, %v2969_v50 }
 0xb97   : > { %6378 = vmatpush3.bf16.xpose.msra.mxu1 %v3347_v39  ;;  %6384 = vmatpush3.bf16.xpose.msra.mxu0 %v3394_v42  ;;  %v3042_v21 = vpack.c.bf16 %v3038_v41, %v2970_v57  ;;  %v2739_v60 = vpack.c.bf16 %v2735_v55, %v2667_v35  ;;  %v2718_v29 = vrot.slane %v2704_v47, %v6964_v51 }
 0xb98   : > { %6389 = vmatprep.subr.bf16.mxu1 %v6761_v2  ;;  %6395 = vmatprep.subr.bf16.mxu0 %v6761_v2  ;;  %v2740_v34 = vpack.c.bf16 %v2736_v56, %v2668_v24  ;;  %v2734_v59 = vrot.slane %v2720_v53, %v6964_v51  ;;  %v3441_v7 = vsel %vm1298_vm2, %v3041_v6, 0  ;;  %v2650_v45 = vrot.slane %v2636_v58, %v6964_v51 }
 0xb99   : > { %v3488_v13 = vsel %vm1298_vm2, %v3042_v21, 0  ;;  %v2666_v33 = vrot.slane %v2652_v62, %v6964_v51 }
 0xb9a   : > { %v2737_v11 = vcombine.low %v2718_v29, %v2734_v59  ;;  %v2738_v12 = vcombine.high %v2718_v29, %v2734_v59 }
 0xb9b   : > { %v2669_v36 = vcombine.low %v2650_v45, %v2666_v33  ;;  %v2670_v1 = vcombine.high %v2650_v45, %v2666_v33 }
 0xb9d   : > { %v2741_v17 = vpack.c.bf16 %v2737_v11, %v2669_v36  ;;  %v2742_v18 = vpack.c.bf16 %v2738_v12, %v2670_v1 }
 0xb9e   : > { %6380 = vmatmul.mubr.msk.bf16.vlgmr.msra.gmra.mrb[28].mxu1 %vm1298_vm2, %v2739_v60  ;;  %6386 = vmatmul.mubr.msk.bf16.vlgmr.msra.gmra.mrb[32].mxu0 %vm1298_vm2, %v2740_v34 }
 0xb9f   : > { %6390 = vmatpush3.bf16.xpose.msra.mxu1 %v3441_v7  ;;  %6396 = vmatpush3.bf16.xpose.msra.mxu0 %v3488_v13 }
 0xba0   : > { %6391 = vmatprep.mubr.msk.bf16.mxu1 %vm6762_vm0, %v6761_v2  ;;  %6397 = vmatprep.mubr.msk.bf16.mxu0 %vm6762_vm0, %v6761_v2 }
 0xba1   : > { %6401 = vmatprep.subr.bf16.mxu1 %v6761_v2  ;;  %6407 = vmatprep.subr.bf16.mxu0 %v6761_v2 }
 0xba6   : > { %6392 = vmatmul.mubr.msk.bf16.vlgmr.msra.gmra.mrb[32].mxu1 %vm1298_vm2, %v2741_v17  ;;  %6398 = vmatmul.mubr.msk.bf16.vlgmr.msra.gmra.mrb[36].mxu0 %vm1298_vm2, %v2742_v18 }
 0xba7   : > { %6403 = vmatprep.mubr.msk.bf16.mxu1 %vm6762_vm0, %v6761_v2  ;;  %6409 = vmatprep.mubr.msk.bf16.mxu0 %vm6762_vm0, %v6761_v2 }
 0xc71   : > { %v3383_v61 = vpop.f32.mrb[28].mxu1  ;;  %v3430_v5 = vpop.f32.mrb[32].mxu0 }
 0xc72   : > { %v3531_v10 = vmul.f32 0.35355338, %v3383_v61  ;;  %v3533_v19 = vmul.f32 0.35355338, %v3430_v5  ;;  %v6381_v44 = vpop.f32.mrb[29].mxu1  ;;  %v6387_v20 = vpop.f32.mrb[33].mxu0 }
 0xc73   : > { %v3386_v38 = vpop.f32.mrb[30].mxu1  ;;  %v3433_v16 = vpop.f32.mrb[34].mxu0 }
 0xc74   : > { %v6382_v27 = vpop.f32.mrb[31].mxu1  ;;  %v6388_v49 = vpop.f32.mrb[35].mxu0  ;;  %v3532_v43 = vmul.f32 0.35355338, %v3386_v38  ;;  %v3534_v15 = vmul.f32 0.35355338, %v3433_v16 }
 0xc75   : > { %v3539_v8 = vsel %vm1487_vm3, %v3531_v10, -inf  ;;  %v3545_v22 = vsel %vm1487_vm3, %v3533_v19, -inf }
 0xc76   : > { %3540 = vmax.xlane.f32.xlu1 %v3539_v8  ;;  %3546 = vmax.xlane.f32.xlu0 %v3545_v22  ;;  %v3542_v23 = vsel %vm1487_vm3, %v3532_v43, -inf  ;;  %v3548_v25 = vsel %vm1487_vm3, %v3534_v15, -inf }
 0xc79   : > { %v3477_v9 = vpop.f32.mrb[32].mxu1  ;;  %v3524_v14 = vpop.f32.mrb[36].mxu0 }
 0xc7a   : > { %v3535_v26 = vmul.f32 0.35355338, %v3477_v9  ;;  %3543 = vmax.xlane.f32.xlu0 %v3542_v23  ;;  %3549 = vmax.xlane.f32.xlu1 %v3548_v25  ;;  %v6393_v30 = vpop.f32.mrb[33].mxu1  ;;  %v6399_v31 = vpop.f32.mrb[37].mxu0  ;;  %v3537_v41 = vmul.f32 0.35355338, %v3524_v14 }
 0xc7b   : > { %v3480_v28 = vpop.f32.mrb[34].mxu1  ;;  %v3527_v32 = vpop.f32.mrb[38].mxu0 }
 0xc7c   : > { %v3536_v39 = vmul.f32 0.35355338, %v3480_v28  ;;  %v6394_v42 = vpop.f32.mrb[35].mxu1  ;;  %v6400_v37 = vpop.f32.mrb[39].mxu0  ;;  %v3551_v47 = vsel %vm1487_vm3, %v3535_v26, -inf  ;;  %v3557_v56 = vsel %vm1487_vm3, %v3537_v41, -inf }
 0xc7d   : > { %v3538_v53 = vmul.f32 0.35355338, %v3527_v32 }
 0xc7e   : > { %3552 = vmax.xlane.f32.xlu0 %v3551_v47  ;;  %v3554_v55 = vsel %vm1487_vm3, %v3536_v39, -inf }
 0xc7f   : > { %3555 = vmax.xlane.f32.xlu1 %v3554_v55  ;;  %v3560_v50 = vsel %vm1487_vm3, %v3538_v53, -inf }
 0xc82   : > { %3558 = vmax.xlane.f32.xlu0 %v3557_v56 }
 0xc83   : > { %3561 = vmax.xlane.f32.xlu1 %v3560_v50 }
 0xc94   : > { %3045 = vrot.lane.b32.xlu1 %v7383_v52, %s6760_s11 }
 0xc98   : > { %3043 = vrot.lane.b32.xlu0 %v7381_v48, %s6760_s11  ;;  %3047 = vrot.lane.b32.xlu1 %v7401_v40, %s6760_s11 }
 0xc9c   : > { %3049 = vrot.lane.b32.xlu0 %v7405_v63, %s6760_s11  ;;  %3051 = vrot.lane.b32.xlu1 %v7409_v54, %s6760_s11 }
 0xca0   : > { %3053 = vrot.lane.b32.xlu0 %v7413_v0, %s6760_s11  ;;  %3055 = vrot.lane.b32.xlu1 %v7417_v3, %s6760_s11 }
 0xca4   : > { %3057 = vrot.lane.b32.xlu0 %v7421_v4, %s6760_s11 }
 0xd03   : > { %v3541_v52 = vpop.xlane.xlu1 %3540  ;;  %v3547_v48 = vpop.xlane.xlu0 %3546 }
 0xd04   : > { %v3563_v57 = vsub.f32 %v3531_v10, %v3541_v52  ;;  %v3565_v58 = vsub.f32 %v3533_v19, %v3547_v48 }
 0xd06   : > { %v3571_v40 = vmul.f32 1.442695, %v3563_v57  ;;  %v3575_v62 = vmul.f32 1.442695, %v3565_v58 }
 0xd07   : > { %v3544_v35 = vpop.xlane.xlu0 %3543  ;;  %v3550_v63 = vpop.xlane.xlu1 %3549 }
 0xd08   : > { %6632 = vpow2.f32 %v3571_v40  ;;  %v3564_v24 = vsub.f32 %v3532_v43, %v3544_v35  ;;  %v3566_v54 = vsub.f32 %v3534_v15, %v3550_v63 }
 0xd09   : > { %6634 = vpow2.f32 %v3575_v62 }
 0xd0a   : > { %v3573_v6 = vmul.f32 1.442695, %v3564_v24  ;;  %v3577_v0 = vmul.f32 1.442695, %v3566_v54 }
 0xd0b   : > { %v3553_v21 = vpop.xlane.xlu0 %3552 }
 0xd0c   : > { %6636 = vpow2.f32 %v3573_v6  ;;  %v3567_v3 = vsub.f32 %v3535_v26, %v3553_v21  ;;  %v3556_v60 = vpop.xlane.xlu1 %3555 }
 0xd0d   : > { %v3568_v34 = vsub.f32 %v3536_v39, %v3556_v60  ;;  %6638 = vpow2.f32 %v3577_v0 }
 0xd0e   : > { %v3579_v4 = vmul.f32 1.442695, %v3567_v3 }
 0xd0f   : > { %v3581_v29 = vmul.f32 1.442695, %v3568_v34  ;;  %v3559_v59 = vpop.xlane.xlu0 %3558 }
 0xd10   : > { %v3569_v7 = vsub.f32 %v3537_v41, %v3559_v59  ;;  %v3562_v13 = vpop.xlane.xlu1 %3561 }
 0xd11   : > { %6640 = vpow2.f32 %v3581_v29  ;;  %v3570_v45 = vsub.f32 %v3538_v53, %v3562_v13 }
 0xd12   : > { %v7579_v33 = vpop.eup %6632  ;;  %6642 = vpow2.f32 %v3579_v4  ;;  %v3583_v11 = vmul.f32 1.442695, %v3569_v7 }
 0xd13   : > { %v3585_v12 = vmul.f32 1.442695, %v3570_v45  ;;  %v3044_v36 = vpop.permute.xlu0 %3043  ;;  %v3587_v1 = vsel %vm1487_vm3, %v7579_v33, 0.0  ;;  %v7583_v17 = vpop.eup %6634 }
 0xd14   : > { %6644 = vpow2.f32 %v3583_v11  ;;  %3588 = vadd.xlane.f32.xlu0 %v3587_v1  ;;  %v3046_v18 = vpop.permute.xlu1 %3045  ;;  %v3593_v10 = vsel %vm1487_vm3, %v7583_v17, 0.0 }
 0xd15   : > { %6646 = vpow2.f32 %v3585_v12 }
 0xd16   : > { %v7585_v61 = vpop.eup %6636 }
 0xd17   : > { %v3050_v5 = vpop.permute.xlu0 %3049  ;;  %v3590_v19 = vsel %vm1487_vm3, %v7585_v61, 0.0  ;;  %v7591_v44 = vpop.eup %6638 }
 0xd18   : > { %3594 = vadd.xlane.f32.xlu0 %v3593_v10  ;;  %3591 = vadd.xlane.f32.xlu1 %v3590_v19  ;;  %v3048_v20 = vpop.permute.xlu1 %3047  ;;  %v3596_v27 = vsel %vm1487_vm3, %v7591_v44, 0.0 }
 0xd1b   : > { %v7593_v38 = vpop.eup %6640  ;;  %v3054_v16 = vpop.permute.xlu0 %3053 }
 0xd1c   : > { %v7597_v49 = vpop.eup %6642  ;;  %3597 = vadd.xlane.f32.xlu1 %v3596_v27  ;;  %v3052_v43 = vpop.permute.xlu1 %3051  ;;  %v3602_v15 = vsel %vm1487_vm3, %v7593_v38, 0.0  ;;  %v3135_v8 = vcombine.low %v3046_v18, %v3054_v16  ;;  %v3136_v9 = vcombine.high %v3046_v18, %v3054_v16 }
 0xd1d   : > { %3603 = vadd.xlane.f32.xlu0 %v3602_v15  ;;  %v3067_v23 = vcombine.low %v3044_v36, %v3052_v43  ;;  %v3068_v25 = vcombine.high %v3044_v36, %v3052_v43  ;;  %v3599_v26 = vsel %vm1487_vm3, %v7597_v49, 0.0 }
 0xd1e   : > { %v7601_v22 = vpop.eup %6644  ;;  %v3143_v42 = vrot.slane %v3135_v8, %v6954_v46  ;;  %v3150_v47 = vrot.slane %v3136_v9, %v6954_v46 }
 0xd1f   : > { %v3058_v14 = vpop.permute.xlu0 %3057  ;;  %v7605_v30 = vpop.eup %6646  ;;  %v3605_v39 = vsel %vm1487_vm3, %v7601_v22, 0.0  ;;  %v3075_v53 = vrot.slane %v3067_v23, %v6954_v46  ;;  %v3082_v50 = vrot.slane %v3068_v25, %v6954_v46 }
 0xd20   : > { %v3151_v31 = vcombine.low %v3050_v5, %v3058_v14  ;;  %v3152_v28 = vcombine.high %v3050_v5, %v3058_v14  ;;  %3600 = vadd.xlane.f32.xlu1 %v3599_v26  ;;  %v3056_v32 = vpop.permute.xlu1 %3055  ;;  %v3608_v57 = vsel %vm1487_vm3, %v7605_v30, 0.0 }
 0xd21   : > { %v3083_v37 = vcombine.low %v3048_v20, %v3056_v32  ;;  %v3084_v41 = vcombine.high %v3048_v20, %v3056_v32  ;;  %3606 = vadd.xlane.f32.xlu0 %v3605_v39 }
 0xd22   : > { %v3159_v55 = vrot.slane %v3151_v31, %v6954_v46  ;;  %v3166_v56 = vrot.slane %v3152_v28, %v6954_v46 }
 0xd23   : > { %v3091_v52 = vrot.slane %v3083_v37, %v6954_v46  ;;  %v3098_v48 = vrot.slane %v3084_v41, %v6954_v46 }
 0xd24   : > { %v3167_v58 = vcombine.low %v3143_v42, %v3159_v55  ;;  %v3168_v40 = vcombine.high %v3143_v42, %v3159_v55  ;;  %v3183_v62 = vcombine.low %v3150_v47, %v3166_v56  ;;  %v3184_v35 = vcombine.high %v3150_v47, %v3166_v56  ;;  %3609 = vadd.xlane.f32.xlu1 %v3608_v57 }
 0xd25   : > { %v3099_v63 = vcombine.low %v3075_v53, %v3091_v52  ;;  %v3100_v24 = vcombine.high %v3075_v53, %v3091_v52  ;;  %v3115_v54 = vcombine.low %v3082_v50, %v3098_v48  ;;  %v3116_v6 = vcombine.high %v3082_v50, %v3098_v48 }
 0xd26   : > { %v3175_v0 = vrot.slane %v3167_v58, %v6964_v51  ;;  %v3182_v21 = vrot.slane %v3168_v40, %v6964_v51  ;;  %v3191_v3 = vrot.slane %v3183_v62, %v6964_v51  ;;  %v3198_v60 = vrot.slane %v3184_v35, %v6964_v51 }
 0xd27   : > { %v3107_v34 = vrot.slane %v3099_v63, %v6964_v51  ;;  %v3114_v4 = vrot.slane %v3100_v24, %v6964_v51  ;;  %v3123_v29 = vrot.slane %v3115_v54, %v6964_v51  ;;  %v3130_v59 = vrot.slane %v3116_v6, %v6964_v51 }
 0xd28   : > { %v3271_v7 = vcombine.low %v3175_v0, %v3182_v21  ;;  %v6137_v13 = vcombine.high %v3175_v0, %v3182_v21  ;;  %v3287_v45 = vcombine.low %v3191_v3, %v3198_v60  ;;  %v6138_v11 = vcombine.high %v3191_v3, %v3198_v60 }
 0xd29   : > { %v3203_v12 = vcombine.low %v3107_v34, %v3114_v4  ;;  %v6135_v36 = vcombine.high %v3107_v34, %v3114_v4  ;;  %v3219_v1 = vcombine.low %v3123_v29, %v3130_v59  ;;  %v6136_v18 = vcombine.high %v3123_v29, %v3130_v59 }
 0xd2a   : > { %v3278_v5 = vrot.slane %v3271_v7, %v6954_v46  ;;  %v3286_v10 = vrot.slane %v6137_v13, %v6954_v46  ;;  %v3294_v19 = vrot.slane %v3287_v45, %v6954_v46  ;;  %v3302_v20 = vrot.slane %v6138_v11, %v6954_v46 }
 0xd2b   : > { %v3210_v16 = vrot.slane %v3203_v12, %v6954_v46  ;;  %v3218_v27 = vrot.slane %v6135_v36, %v6954_v46  ;;  %v3226_v43 = vrot.slane %v3219_v1, %v6954_v46  ;;  %v3234_v15 = vrot.slane %v6136_v18, %v6954_v46 }
 0xd2c   : > { %v3303_v8 = vcombine.low %v3278_v5, %v3286_v10  ;;  %v3319_v9 = vcombine.low %v3294_v19, %v3302_v20  ;;  %v3304_v23 = vcombine.high %v3278_v5, %v3286_v10  ;;  %v3320_v25 = vcombine.high %v3294_v19, %v3302_v20 }
 0xd2d   : > { %v3235_v14 = vcombine.low %v3210_v16, %v3218_v27  ;;  %v3251_v26 = vcombine.low %v3226_v43, %v3234_v15  ;;  %v3236_v31 = vcombine.high %v3210_v16, %v3218_v27  ;;  %v3252_v28 = vcombine.high %v3226_v43, %v3234_v15 }
 0xd2e   : > { %v3311_v32 = vrot.slane %v3303_v8, %v6964_v51  ;;  %v3327_v39 = vrot.slane %v3319_v9, %v6964_v51  ;;  %v3318_v42 = vrot.slane %v3304_v23, %v6964_v51  ;;  %v3334_v37 = vrot.slane %v3320_v25, %v6964_v51 }
 0xd2f   : > { %v3243_v41 = vrot.slane %v3235_v14, %v6964_v51  ;;  %v3259_v47 = vrot.slane %v3251_v26, %v6964_v51  ;;  %v3250_v53 = vrot.slane %v3236_v31, %v6964_v51  ;;  %v3266_v55 = vrot.slane %v3252_v28, %v6964_v51 }
 0xd30   : > { %v3335_v56 = vcombine.low %v3311_v32, %v3327_v39  ;;  %v3336_v50 = vcombine.high %v3311_v32, %v3327_v39  ;;  %v3337_v52 = vcombine.low %v3318_v42, %v3334_v37  ;;  %v3338_v48 = vcombine.high %v3318_v42, %v3334_v37 }
 0xd31   : > { %v3267_v57 = vcombine.low %v3243_v41, %v3259_v47  ;;  %v3268_v58 = vcombine.high %v3243_v41, %v3259_v47  ;;  %v3269_v40 = vcombine.low %v3250_v53, %v3266_v55  ;;  %v3270_v62 = vcombine.high %v3250_v53, %v3266_v55 }
 0xd33   : > { %v3339_v35 = vpack.c.bf16 %v3335_v56, %v3267_v57  ;;  %v3340_v63 = vpack.c.bf16 %v3336_v50, %v3268_v58  ;;  %v3341_v24 = vpack.c.bf16 %v3337_v52, %v3269_v40  ;;  %v3342_v54 = vpack.c.bf16 %v3338_v48, %v3270_v62 }
 0xd35   : > { %6402 = vmatpush3.bf16.msra.mxu1 %v3339_v35  ;;  %6408 = vmatpush3.bf16.msra.mxu0 %v3340_v63 }
 0xd36   : > { %6413 = vmatprep.subr.bf16.mxu1 %v6761_v2  ;;  %6419 = vmatprep.subr.bf16.mxu0 %v6761_v2 }
 0xda1   : > { %v3589_v6 = vpop.xlane.xlu0 %3588 }
 0xda2   : > { %6648 = vrcp.f32 %v3589_v6 }
 0xda5   : > { %v3595_v0 = vpop.xlane.xlu0 %3594  ;;  %v3592_v21 = vpop.xlane.xlu1 %3591 }
 0xda6   : > { %6650 = vrcp.f32 %v3592_v21 }
 0xda7   : > { %6652 = vrcp.f32 %v3595_v0 }
 0xda9   : > { %v3598_v3 = vpop.xlane.xlu1 %3597 }
 0xdaa   : > { %6654 = vrcp.f32 %v3598_v3  ;;  %v3604_v60 = vpop.xlane.xlu0 %3603 }
 0xdab   : > { %6656 = vrcp.f32 %v3604_v60 }
 0xdac   : > { %v6649_v29 = vpop.eup %6648 }
 0xdad   : > { %v3601_v34 = vpop.xlane.xlu1 %3600  ;;  %v3619_v45 = vmul.f32 %v6649_v29, %v7579_v33 }
 0xdae   : > { %6658 = vrcp.f32 %v3601_v34  ;;  %v3607_v4 = vpop.xlane.xlu0 %3606 }
 0xdaf   : > { %6660 = vrcp.f32 %v3607_v4 }
 0xdb0   : > { %v6651_v59 = vpop.eup %6650 }
 0xdb1   : > { %v3610_v7 = vpop.xlane.xlu1 %3609  ;;  %v6653_v13 = vpop.eup %6652  ;;  %v3620_v11 = vmul.f32 %v6651_v59, %v7585_v61 }
 0xdb2   : > { %6662 = vrcp.f32 %v3610_v7  ;;  %v3621_v1 = vmul.f32 %v6653_v13, %v7583_v17 }
 0xdb3   : > { %v3627_v36 = vpack.c.bf16 %v3620_v11, %v3619_v45 }
 0xdb4   : > { %v6655_v12 = vpop.eup %6654 }
 0xdb5   : > { %v3622_v18 = vmul.f32 %v6655_v12, %v7591_v44  ;;  %v6657_v5 = vpop.eup %6656  ;;  %6404 = vmatmul.mubr.msk.bf16.vlgmr.msra.gmra.mrb[36].mxu1 %vm1487_vm3, %v3627_v36 }
 0xdb6   : > { %6414 = vmatpush3.bf16.msra.mxu1 %v3341_v24  ;;  %6415 = vmatprep.mubr.msk.bf16.mxu1 %vm6762_vm0, %v6761_v2  ;;  %v3624_v33 = vmul.f32 %v6657_v5, %v7593_v38 }
 0xdb7   : > { %v3628_v10 = vpack.c.bf16 %v3622_v18, %v3621_v1  ;;  %6425 = vmatprep.subr.bf16.mxu1 %v6761_v2 }
 0xdb8   : > { %v6659_v19 = vpop.eup %6658 }
 0xdb9   : > { %v3623_v61 = vmul.f32 %v6659_v19, %v7597_v49  ;;  %6410 = vmatmul.mubr.msk.bf16.vlgmr.msra.gmra.mrb[40].mxu0 %vm1487_vm3, %v3628_v10  ;;  %v6661_v17 = vpop.eup %6660  ;;  %v6586_v49 = vld [vmem:[%s8134_s4 + $0x8] ss:$16 sps:$4 sm:$0xff]  }
 0xdba   : > { %6420 = vmatpush3.bf16.msra.mxu0 %v3342_v54  ;;  %6421 = vmatprep.mubr.msk.bf16.mxu0 %vm6762_vm0, %v6761_v2  ;;  %v3625_v16 = vmul.f32 %v6661_v17, %v7601_v22 }
 0xdbb   : > { %v3629_v44 = vpack.c.bf16 %v3624_v33, %v3623_v61  ;;  %6433 = vmatprep.subr.bf16.mxu0 %v6761_v2  ;;  %4130 = vrot.lane.b32.xlu0 %v6586_v49, %s6772_s29 }
 0xdbc   : > { %v6663_v20 = vpop.eup %6662 }
 0xdbd   : > { %v3626_v27 = vmul.f32 %v6663_v20, %v7605_v30  ;;  %6416 = vmatmul.mubr.msk.bf16.vlgmr.msra.gmra.mrb[40].mxu1 %vm1487_vm3, %v3629_v44 }
 0xdbe   : > { %6429 = vmatprep.mubr.msk.bf16.mxu1 %vm6762_vm0, %v6761_v2 }
 0xdbf   : > { %v3630_v38 = vpack.c.bf16 %v3626_v27, %v3625_v16 }
 0xdc1   : > { %6422 = vmatmul.mubr.msk.bf16.vlgmr.msra.gmra.mrb[44].mxu0 %vm1487_vm3, %v3630_v38 }
 0xdc2   : > { %6437 = vmatprep.mubr.msk.bf16.mxu0 %vm6762_vm0, %v6761_v2 }
 0xe2d   : > { %v4131_v48 = vpop.permute.xlu0 %4130 }
 0xe2e   : > { %6426 = vmatpush3.bf16.msra.mxu1 %v4131_v48 }
 0xe2f   : > { %6427 = vmatprep.subr.bf16.mxu1 %v6761_v2 }
 0xe88   : > { %v3668_v22 = vpop.f32.mrb[36].mxu1 }
 0xe89   : > { %v6405_v43 = vpop.f32.mrb[37].mxu1 }
 0xe8a   : > { %v3671_v30 = vpop.f32.mrb[38].mxu1 }
 0xe8b   : > { %v6406_v15 = vpop.f32.mrb[39].mxu1 }
 0xe8c   : > { %v3712_v8 = vpop.f32.mrb[40].mxu0 }
 0xe8d   : > { %v6411_v9 = vpop.f32.mrb[41].mxu0 }
 0xe8e   : > { %v3715_v23 = vpop.f32.mrb[42].mxu0 }
 0xe8f   : > { %v6412_v25 = vpop.f32.mrb[43].mxu0 }
 0xe90   : > { %v3756_v14 = vpop.f32.mrb[40].mxu1 }
 0xe91   : > { %v3807_v26 = vcombine.low %v3668_v22, %v3756_v14  ;;  %v3808_v31 = vcombine.high %v3668_v22, %v3756_v14  ;;  %v6417_v28 = vpop.f32.mrb[41].mxu1 }
 0xe92   : > { %v3759_v32 = vpop.f32.mrb[42].mxu1 }
 0xe93   : > { %v3875_v39 = vcombine.low %v3671_v30, %v3759_v32  ;;  %v3876_v42 = vcombine.high %v3671_v30, %v3759_v32  ;;  %v6418_v37 = vpop.f32.mrb[43].mxu1  ;;  %v3815_v56 = vrot.slane %v3807_v26, %v6954_v46  ;;  %v3822_v50 = vrot.slane %v3808_v31, %v6954_v46 }
 0xe94   : > { %v3800_v41 = vpop.f32.mrb[44].mxu0 }
 0xe95   : > { %v3823_v47 = vcombine.low %v3712_v8, %v3800_v41  ;;  %v3824_v53 = vcombine.high %v3712_v8, %v3800_v41  ;;  %v6423_v55 = vpop.f32.mrb[45].mxu0  ;;  %v3883_v0 = vrot.slane %v3875_v39, %v6954_v46  ;;  %v3890_v21 = vrot.slane %v3876_v42, %v6954_v46 }
 0xe96   : > { %v3803_v52 = vpop.f32.mrb[46].mxu0 }
 0xe97   : > { %v3831_v57 = vrot.slane %v3823_v47, %v6954_v46  ;;  %v3838_v58 = vrot.slane %v3824_v53, %v6954_v46  ;;  %v3891_v40 = vcombine.low %v3715_v23, %v3803_v52  ;;  %v3892_v62 = vcombine.high %v3715_v23, %v3803_v52  ;;  %v6424_v35 = vpop.f32.mrb[47].mxu0 }
 0xe99   : > { %v3839_v63 = vcombine.low %v3815_v56, %v3831_v57  ;;  %v3840_v24 = vcombine.high %v3815_v56, %v3831_v57  ;;  %v3855_v54 = vcombine.low %v3822_v50, %v3838_v58  ;;  %v3856_v6 = vcombine.high %v3822_v50, %v3838_v58 }
 0xe9a   : > { %v3899_v3 = vrot.slane %v3891_v40, %v6954_v46  ;;  %v3906_v60 = vrot.slane %v3892_v62, %v6954_v46 }
 0xe9b   : > { %v3847_v34 = vrot.slane %v3839_v63, %v6964_v51  ;;  %v3854_v4 = vrot.slane %v3840_v24, %v6964_v51  ;;  %v3863_v29 = vrot.slane %v3855_v54, %v6964_v51  ;;  %v3870_v59 = vrot.slane %v3856_v6, %v6964_v51  ;;  %v6588_v54 = vld [vmem:[%s8134_s4 + $0xc] ss:$16 sps:$4 sm:$0xff]   ;;  %v6151_v6 = vld [vmem:[%s8135_s5 + $0x2] ss:$0 sm:$0xff] }
 0xe9c   : > { %v3907_v7 = vcombine.low %v3883_v0, %v3899_v3  ;;  %v3908_v13 = vcombine.high %v3883_v0, %v3899_v3  ;;  %v3923_v45 = vcombine.low %v3890_v21, %v3906_v60  ;;  %v3924_v11 = vcombine.high %v3890_v21, %v3906_v60  ;;  %6434 = vmatpush3.bf16.msra.mxu0 %v6588_v54  ;;  %v6587_v0 = vld [vmem:[%s8134_s4 + $0x28] ss:$16 sps:$4 sm:$0xff]  }
 0xe9d   : > { %v3943_v12 = vcombine.low %v3847_v34, %v3854_v4  ;;  %v6147_v36 = vcombine.high %v3847_v34, %v3854_v4  ;;  %v3959_v1 = vcombine.low %v3863_v29, %v3870_v59  ;;  %v6148_v18 = vcombine.high %v3863_v29, %v3870_v59  ;;  %6435 = vmatprep.subr.bf16.mxu0 %v6761_v2 }
 0xe9e   : > { %v3915_v5 = vrot.slane %v3907_v7, %v6964_v51  ;;  %v3922_v10 = vrot.slane %v3908_v13, %v6964_v51  ;;  %v3931_v19 = vrot.slane %v3923_v45, %v6964_v51  ;;  %v3938_v33 = vrot.slane %v3924_v11, %v6964_v51 }
 0xe9f   : > { %v3950_v61 = vrot.slane %v3943_v12, %v6954_v46  ;;  %v3958_v17 = vrot.slane %v6147_v36, %v6954_v46  ;;  %v3966_v44 = vrot.slane %v3959_v1, %v6954_v46  ;;  %v3974_v20 = vrot.slane %v6148_v18, %v6954_v46 }
 0xea0   : > { %v4011_v16 = vcombine.low %v3915_v5, %v3922_v10  ;;  %v6149_v27 = vcombine.high %v3915_v5, %v3922_v10  ;;  %v4027_v38 = vcombine.low %v3931_v19, %v3938_v33  ;;  %v6150_v49 = vcombine.high %v3931_v19, %v3938_v33  ;;  %v6589_v19 = vld [vmem:[%s8134_s4 + $0x2c] ss:$16 sps:$4 sm:$0xff]  }
 0xea1   : > { %v3976_v22 = vcombine.high %v3950_v61, %v3958_v17  ;;  %v3992_v43 = vcombine.high %v3966_v44, %v3974_v20  ;;  %v3975_v30 = vcombine.low %v3950_v61, %v3958_v17  ;;  %v3991_v15 = vcombine.low %v3966_v44, %v3974_v20  ;;  %6436 = vmatpush3.bf16.msra.mxu0 %v6589_v19 }
 0xea2   : > { %v4018_v8 = vrot.slane %v4011_v16, %v6954_v46  ;;  %v4026_v9 = vrot.slane %v6149_v27, %v6954_v46  ;;  %v4034_v23 = vrot.slane %v4027_v38, %v6954_v46  ;;  %v4042_v25 = vrot.slane %v6150_v49, %v6954_v46  ;;  %6447 = vmatprep.subr.bf16.mxu0 %v6761_v2  ;;  %v6155_v49 = vld [vmem:[%s8135_s5 + $0x3] ss:$0 sm:$0xff] }
 0xea3   : > { %v3990_v14 = vrot.slane %v3976_v22, %v6964_v51  ;;  %v4006_v26 = vrot.slane %v3992_v43, %v6964_v51  ;;  %v3983_v31 = vrot.slane %v3975_v30, %v6964_v51  ;;  %v3999_v28 = vrot.slane %v3991_v15, %v6964_v51 }
 0xea4   : > { %v4044_v32 = vcombine.high %v4018_v8, %v4026_v9  ;;  %v4060_v39 = vcombine.high %v4034_v23, %v4042_v25  ;;  %v4043_v42 = vcombine.low %v4018_v8, %v4026_v9  ;;  %v4059_v37 = vcombine.low %v4034_v23, %v4042_v25 }
 0xea5   : > { %v4010_v41 = vcombine.high %v3990_v14, %v4006_v26  ;;  %v4008_v47 = vcombine.high %v3983_v31, %v3999_v28  ;;  %v4009_v53 = vcombine.low %v3990_v14, %v4006_v26  ;;  %v4007_v55 = vcombine.low %v3983_v31, %v3999_v28 }
 0xea6   : > { %v4058_v56 = vrot.slane %v4044_v32, %v6964_v51  ;;  %v4074_v50 = vrot.slane %v4060_v39, %v6964_v51  ;;  %v4051_v52 = vrot.slane %v4043_v42, %v6964_v51  ;;  %v4067_v48 = vrot.slane %v4059_v37, %v6964_v51 }
 0xea8   : > { %v4078_v57 = vcombine.high %v4058_v56, %v4074_v50  ;;  %v4076_v58 = vcombine.high %v4051_v52, %v4067_v48  ;;  %v4077_v40 = vcombine.low %v4058_v56, %v4074_v50  ;;  %v4075_v62 = vcombine.low %v4051_v52, %v4067_v48 }
 0xeaa   : > { %v6560_v35 = vpack.i.bf16 %v4078_v57, %v4010_v41  ;;  %v6550_v63 = vpack.i.bf16 %v4076_v58, %v4008_v47  ;;  %v6555_v24 = vpack.i.bf16 %v4077_v40, %v4009_v53 }
 0xeac   : > { %6561 = vrot.lane.b32.xlu0 %v6560_v35, %s6771_s14  ;;  %6551 = vrot.lane.b32.xlu1 %v6550_v63, %s6770_s10 }
 0xeb0   : > { %6556 = vrot.lane.b32.xlu1 %v6555_v24, %s6769_s9  ;;  %4136 = vrot.lane.b32.xlu0 %v6151_v6, %s6772_s29 }
 0xeb4   : > { %4132 = vrot.lane.b32.xlu1 %v6587_v0, %s6772_s29 }
 0xf1e   : > { %v6552_v21 = vpop.permute.xlu1 %6551  ;;  %v6562_v34 = vpop.permute.xlu0 %6561 }
 0xf1f   : > { %v6554_v3 = vunpack.i.h.bf16 %v6552_v21  ;;  %v6553_v60 = vunpack.i.l.bf16 %v6552_v21  ;;  %v6564_v7 = vunpack.i.h.bf16 %v6562_v34  ;;  %v6563_v13 = vunpack.i.l.bf16 %v6562_v34 }
 0xf21   : > { %v4103_v45 = vsel %vm1298_vm2, %v4007_v55, %v6553_v60  ;;  %v4104_v11 = vsel %vm1298_vm2, %v4075_v62, %v6554_v3 }
 0xf22   : > { %v6557_v4 = vpop.permute.xlu1 %6556  ;;  %v4137_v33 = vpop.permute.xlu0 %4136 }
 0xf23   : > { %v6559_v29 = vunpack.i.h.bf16 %v6557_v4  ;;  %v6558_v59 = vunpack.i.l.bf16 %v6557_v4 }
 0xf25   : > { %v4105_v12 = vsel %vm1487_vm3, %v4103_v45, %v6558_v59  ;;  %v4106_v36 = vsel %vm1487_vm3, %v4104_v11, %v6559_v29 }
 0xf26   : > { %v4107_v1 = vsel %vm2056_vm4, %v4105_v12, %v6563_v13  ;;  %v4108_v18 = vsel %vm2056_vm4, %v4106_v36, %v6564_v7  ;;  %v4133_v5 = vpop.permute.xlu1 %4132 }
 0xf27   : > { %v4109_v10 = vpack.c.bf16 %v4108_v18, %v4107_v1  ;;  %6428 = vmatpush3.bf16.msra.mxu1 %v4133_v5 }
 0xf28   : > { %6441 = vmatprep.subr.bf16.mxu1 %v6761_v2 }
 0xf2a   : > { %6430 = vmatmul.mubr.msk.bf16.vlgmr.msra.gmra.mrb[44].mxu1 %vm307_vm1, %v4109_v10 }
 0xf2b   : > { %6443 = vmatprep.mubr.msk.bf16.mxu1 %vm6762_vm0, %v6761_v2 }
 0xffd   : > { %v4176_v61 = vpop.f32.mrb[44].mxu1 }
 0xffe   : > { %v6431_v17 = vpop.f32.mrb[45].mxu1  ;;  %v4177_v20 = vadd.f32 %v4176_v61, %v4137_v33 }
 0xfff   : > { %v4179_v44 = vpop.f32.mrb[46].mxu1 }
0x1000   : > { %v4180_v16 = vadd.f32 %v4179_v44, %v4137_v33  ;;  %v6432_v27 = vpop.f32.mrb[47].mxu1 }
0x1002   : > { %v4183_v38 = vpack.c.bf16 %v4180_v16, %v4177_v20 }
0x1004   : > { %6438 = vmatmul.mubr.msk.bf16.vlgmr.msra.gmra.mrb[48].mxu0 %vm307_vm1, %v4183_v38 }
0x1005   : > { %6449 = vmatprep.mubr.msk.bf16.mxu0 %vm6762_vm0, %v6761_v2 }
0x10d7   : > { %v4244_v22 = vpop.f32.mrb[48].mxu0 }
0x10d8   : > { %v7739_v43 = vadd.f32 %v6155_v49, %v4244_v22  ;;  %v6439_v30 = vpop.f32.mrb[49].mxu0 }
0x10d9   : > { %v4247_v15 = vpop.f32.mrb[50].mxu0 }
0x10da   : > { %v7741_v8 = vadd.f32 %v6155_v49, %v4247_v15  ;;  %4253 = vrot.lane.b32.xlu1 %v7739_v43, %s6763_s18  ;;  %v6440_v9 = vpop.f32.mrb[51].mxu0 }
0x10dc   : > { %4255 = vrot.lane.b32.xlu0 %v7741_v8, %s6763_s18  ;;  %s6773_s18 = smov [#allocation2]  }
0x10de   : > { %4259 = vrot.lane.b32.xlu1 %v7739_v43, %s6764_s19 }
0x10e0   : > { %4261 = vrot.lane.b32.xlu0 %v7741_v8, %s6764_s19  ;;  %s6700_s19 = sshll.u32 %s6773_s18, 4  ;;  %s6701_s19 = int_to_ptr.vmem [resolvable:$false] %s6700_s19 }
0x10e2   : > { %4265 = vrot.lane.b32.xlu1 %v7739_v43, %s6765_s20 }
0x10e4   : > { %4267 = vrot.lane.b32.xlu0 %v7741_v8, %s6765_s20  ;;  %s6702_s20 = scalar_lea.vmem %s6701_s19, 512 }
0x10e6   : > { %4547 = vrot.lane.b32.xlu1 %v7739_v43, %s6768_s26 }
0x10e8   : > { %4549 = vrot.lane.b32.xlu0 %v7741_v8, %s6768_s26 }
0x114c   : > { %v7759_v23 = vpop.permute.xlu1 %4253 }
0x114d   : > { %4551 = vrot.lane.b32.xlu1 %v7759_v23, %s6768_s26 }
0x114e   : > { %v7763_v25 = vpop.permute.xlu0 %4255 }
0x114f   : > { %4553 = vrot.lane.b32.xlu0 %v7763_v25, %s6768_s26 }
0x1150   : > { %v7767_v14 = vpop.permute.xlu1 %4259 }
0x1151   : > { %4555 = vrot.lane.b32.xlu1 %v7767_v14, %s6768_s26  ;;  %v4271_v39 = vcombine.low %v7739_v43, %v7767_v14  ;;  %v4272_v41 = vcombine.high %v7739_v43, %v7767_v14 }
0x1152   : > { %v7771_v26 = vpop.permute.xlu0 %4261 }
0x1153   : > { %4557 = vrot.lane.b32.xlu0 %v7771_v26, %s6768_s26  ;;  %v4339_v53 = vcombine.low %v7741_v8, %v7771_v26  ;;  %v4279_v55 = vrot.slane %v4271_v39, %v6954_v46  ;;  %v4286_v57 = vrot.slane %v4272_v41, %v6954_v46  ;;  %v4340_v62 = vcombine.high %v7741_v8, %v7771_v26 }
0x1154   : > { %v7775_v31 = vpop.permute.xlu1 %4265 }
0x1155   : > { %4559 = vrot.lane.b32.xlu1 %v7775_v31, %s6768_s26  ;;  %v4287_v32 = vcombine.low %v7759_v23, %v7775_v31  ;;  %v4288_v42 = vcombine.high %v7759_v23, %v7775_v31  ;;  %v4347_v35 = vrot.slane %v4339_v53, %v6954_v46  ;;  %v4354_v4 = vrot.slane %v4340_v62, %v6954_v46 }
0x1156   : > { %v7779_v28 = vpop.permute.xlu0 %4267 }
0x1157   : > { %4561 = vrot.lane.b32.xlu0 %v7779_v28, %s6768_s26  ;;  %v4355_v37 = vcombine.low %v7763_v25, %v7779_v28  ;;  %v4295_v47 = vrot.slane %v4287_v32, %v6954_v46  ;;  %v4302_v56 = vrot.slane %v4288_v42, %v6954_v46  ;;  %v4356_v50 = vcombine.high %v7763_v25, %v7779_v28 }
0x1158   : > { %v4548_v48 = vpop.permute.xlu1 %4547 }
0x1159   : > { %v4363_v52 = vrot.slane %v4355_v37, %v6954_v46  ;;  %v4303_v58 = vcombine.low %v4279_v55, %v4295_v47  ;;  %v4304_v40 = vcombine.high %v4279_v55, %v4295_v47  ;;  %v4319_v24 = vcombine.low %v4286_v57, %v4302_v56 }
0x115a   : > { %v4550_v63 = vpop.permute.xlu0 %4549  ;;  %v4320_v54 = vcombine.high %v4286_v57, %v4302_v56  ;;  %v4370_v6 = vrot.slane %v4356_v50, %v6954_v46 }
0x115b   : > { %v4371_v0 = vcombine.low %v4347_v35, %v4363_v52  ;;  %v4372_v21 = vcombine.high %v4347_v35, %v4363_v52  ;;  %v4311_v60 = vrot.slane %v4303_v58, %v6964_v51  ;;  %v4318_v34 = vrot.slane %v4304_v40, %v6964_v51 }
0x115c   : > { %v7810_v59 = vrot.slane %v4319_v24, %v6964_v51  ;;  %v7813_v7 = vrot.slane %v4320_v54, %v6964_v51  ;;  %v4387_v11 = vcombine.low %v4354_v4, %v4370_v6  ;;  %v4388_v12 = vcombine.high %v4354_v4, %v4370_v6 }
0x115d   : > { %v4379_v13 = vrot.slane %v4371_v0, %v6964_v51  ;;  %v4386_v45 = vrot.slane %v4372_v21, %v6964_v51  ;;  %v4407_v1 = vcombine.low %v4311_v60, %v4318_v34  ;;  %v6159_v18 = vcombine.high %v4311_v60, %v4318_v34 }
0x115e   : > { %v4423_v33 = vcombine.low %v7810_v59, %v7813_v7  ;;  %v6160_v61 = vcombine.high %v7810_v59, %v7813_v7  ;;  %v4395_v17 = vrot.slane %v4387_v11, %v6964_v51  ;;  %v4402_v44 = vrot.slane %v4388_v12, %v6964_v51 }
0x115f   : > { %v4475_v20 = vcombine.low %v4379_v13, %v4386_v45  ;;  %v6161_v16 = vcombine.high %v4379_v13, %v4386_v45  ;;  %v7824_v38 = vrot.slane %v4407_v1, %v6954_v46  ;;  %v7827_v49 = vrot.slane %v6159_v18, %v6954_v46 }
0x1160   : > { %v4491_v50 = vcombine.low %v4395_v17, %v4402_v44  ;;  %v6162_v52 = vcombine.high %v4395_v17, %v4402_v44 }
0x1161   : > { %v7834_v55 = vrot.slane %v4475_v20, %v6954_v46  ;;  %v7837_v56 = vrot.slane %v6161_v16, %v6954_v46  ;;  %v4439_v59 = vcombine.low %v7824_v38, %v7827_v49 }
0x11bf   : > { %v4552_v3 = vpop.permute.xlu1 %4551 }
0x11c1   : > { %v4554_v29 = vpop.permute.xlu0 %4553 }
0x11c3   : > { %v4556_v36 = vpop.permute.xlu1 %4555 }
0x11c4   : > { %v4571_v5 = vcombine.low %v4548_v48, %v4556_v36  ;;  %v4572_v10 = vcombine.high %v4548_v48, %v4556_v36 }
0x11c5   : > { %v4558_v19 = vpop.permute.xlu0 %4557 }
0x11c6   : > { %v4579_v15 = vrot.slane %v4571_v5, %v6954_v46  ;;  %v4586_v9 = vrot.slane %v4572_v10, %v6954_v46  ;;  %v4639_v32 = vcombine.low %v4550_v63, %v4558_v19  ;;  %v4640_v39 = vcombine.high %v4550_v63, %v4558_v19 }
0x11c7   : > { %v4560_v27 = vpop.permute.xlu1 %4559 }
0x11c8   : > { %v4587_v22 = vcombine.low %v4552_v3, %v4560_v27  ;;  %v4588_v30 = vcombine.high %v4552_v3, %v4560_v27  ;;  %v4647_v62 = vrot.slane %v4639_v32, %v6954_v46  ;;  %v4654_v35 = vrot.slane %v4640_v39, %v6954_v46 }
0x11c9   : > { %v4562_v42 = vpop.permute.xlu0 %4561 }
0x11ca   : > { %v4595_v37 = vrot.slane %v4587_v22, %v6954_v46  ;;  %v4602_v41 = vrot.slane %v4588_v30, %v6954_v46  ;;  %v4655_v47 = vcombine.low %v4554_v29, %v4562_v42  ;;  %v4656_v53 = vcombine.high %v4554_v29, %v4562_v42 }
0x11cb   : > { %v4498_v22 = vrot.slane %v4491_v50, %v6954_v46  ;;  %v4506_v30 = vrot.slane %v6162_v52, %v6954_v46 }
0x11cc   : > { %v4603_v48 = vcombine.low %v4579_v15, %v4595_v37  ;;  %v4604_v57 = vcombine.high %v4579_v15, %v4595_v37  ;;  %v4619_v58 = vcombine.low %v4586_v9, %v4602_v41  ;;  %v4620_v40 = vcombine.high %v4586_v9, %v4602_v41 }
0x11cd   : > { %v4663_v63 = vrot.slane %v4655_v47, %v6954_v46  ;;  %v4670_v24 = vrot.slane %v4656_v53, %v6954_v46  ;;  %v4430_v41 = vrot.slane %v4423_v33, %v6954_v46  ;;  %v4438_v47 = vrot.slane %v6160_v61, %v6954_v46 }
0x11ce   : > { %v4611_v54 = vrot.slane %v4603_v48, %v6964_v51  ;;  %v4618_v6 = vrot.slane %v4604_v57, %v6964_v51  ;;  %v4627_v0 = vrot.slane %v4619_v58, %v6964_v51  ;;  %v4634_v21 = vrot.slane %v4620_v40, %v6964_v51 }
0x11cf   : > { %v4671_v3 = vcombine.low %v4647_v62, %v4663_v63  ;;  %v4672_v60 = vcombine.high %v4647_v62, %v4663_v63  ;;  %v4687_v34 = vcombine.low %v4654_v35, %v4670_v24  ;;  %v4688_v4 = vcombine.high %v4654_v35, %v4670_v24 }
0x11d0   : > { %v4707_v29 = vcombine.low %v4611_v54, %v4618_v6  ;;  %v6163_v13 = vcombine.high %v4611_v54, %v4618_v6  ;;  %v4723_v45 = vcombine.low %v4627_v0, %v4634_v21  ;;  %v6164_v11 = vcombine.high %v4627_v0, %v4634_v21 }
0x11d1   : > { %v4679_v12 = vrot.slane %v4671_v3, %v6964_v51  ;;  %v4686_v36 = vrot.slane %v4672_v60, %v6964_v51  ;;  %v4695_v1 = vrot.slane %v4687_v34, %v6964_v51  ;;  %v4702_v18 = vrot.slane %v4688_v4, %v6964_v51 }
0x11d2   : > { %v4714_v5 = vrot.slane %v4707_v29, %v6954_v46  ;;  %v4722_v10 = vrot.slane %v6163_v13, %v6954_v46  ;;  %v4730_v19 = vrot.slane %v4723_v45, %v6954_v46  ;;  %v4738_v17 = vrot.slane %v6164_v11, %v6954_v46 }
0x11d3   : > { %v4775_v44 = vcombine.low %v4679_v12, %v4686_v36  ;;  %v6165_v20 = vcombine.high %v4679_v12, %v4686_v36  ;;  %v4791_v16 = vcombine.low %v4695_v1, %v4702_v18  ;;  %v6166_v27 = vcombine.high %v4695_v1, %v4702_v18 }
0x11d4   : > { %v4739_v15 = vcombine.low %v4714_v5, %v4722_v10  ;;  %v4755_v9 = vcombine.low %v4730_v19, %v4738_v17  ;;  %v4507_v40 = vcombine.low %v7834_v55, %v7837_v56  ;;  %v4523_v62 = vcombine.low %v4498_v22, %v4506_v30 }
0x11d5   : > { %v4782_v32 = vrot.slane %v4775_v44, %v6954_v46  ;;  %v4790_v39 = vrot.slane %v6165_v20, %v6954_v46  ;;  %v4798_v42 = vrot.slane %v4791_v16, %v6954_v46  ;;  %v4806_v37 = vrot.slane %v6166_v27, %v6954_v46 }
0x11d6   : > { %v4747_v53 = vrot.slane %v4739_v15, %v6964_v51  ;;  %v4763_v50 = vrot.slane %v4755_v9, %v6964_v51  ;;  %v4740_v63 = vcombine.high %v4714_v5, %v4722_v10  ;;  %v4756_v24 = vcombine.high %v4730_v19, %v4738_v17 }
0x11d7   : > { %v4807_v52 = vcombine.low %v4782_v32, %v4790_v39  ;;  %v4823_v48 = vcombine.low %v4798_v42, %v4806_v37  ;;  %v4808_v57 = vcombine.high %v4782_v32, %v4790_v39  ;;  %v4824_v58 = vcombine.high %v4798_v42, %v4806_v37 }
0x11d8   : > { %v4455_v7 = vcombine.low %v4430_v41, %v4438_v47  ;;  %v4771_v61 = vcombine.low %v4747_v53, %v4763_v50  ;;  %v4772_v54 = vcombine.high %v4747_v53, %v4763_v50  ;;  %v4515_v60 = vrot.slane %v4507_v40, %v6964_v51 }
0x11d9   : > { %v4815_v35 = vrot.slane %v4807_v52, %v6964_v51  ;;  %v4831_v33 = vrot.slane %v4823_v48, %v6964_v51  ;;  %v4822_v21 = vrot.slane %v4808_v57, %v6964_v51  ;;  %v4838_v3 = vrot.slane %v4824_v58, %v6964_v51 }
0x11da   : > { %v4531_v34 = vrot.slane %v4523_v62, %v6964_v51  ;;  %v4754_v13 = vrot.slane %v4740_v63, %v6964_v51  ;;  %v4770_v45 = vrot.slane %v4756_v24, %v6964_v51  ;;  %v4447_v11 = vrot.slane %v4439_v59, %v6964_v51 }
0x11db   : > { %v4839_v6 = vcombine.low %v4815_v35, %v4831_v33  ;;  %v4840_v0 = vcombine.high %v4815_v35, %v4831_v33  ;;  %v4463_v12 = vrot.slane %v4455_v7, %v6964_v51  ;;  %v4841_v18 = vcombine.low %v4822_v21, %v4838_v3 }
0x11dc   : > { %v4842_v5 = vcombine.high %v4822_v21, %v4838_v3  ;;  %v4508_v10 = vcombine.high %v7834_v55, %v7837_v56  ;;  %v4524_v19 = vcombine.high %v4498_v22, %v4506_v30  ;;  %v4539_v17 = vcombine.low %v4515_v60, %v4531_v34 }
0x11dd   : > { %v4843_v4 = vpack.c.bf16 %v4839_v6, %v4771_v61  ;;  %v4844_v29 = vpack.c.bf16 %v4840_v0, %v4772_v54  ;;  %v4540_v44 = vcombine.high %v4515_v60, %v4531_v34  ;;  %v4773_v20 = vcombine.low %v4754_v13, %v4770_v45 }
0x11de   : > { %v4774_v16 = vcombine.high %v4754_v13, %v4770_v45  ;;  %v4440_v27 = vcombine.high %v7824_v38, %v7827_v49  ;;  %v4456_v15 = vcombine.high %v4430_v41, %v4438_v47  ;;  %v4471_v9 = vcombine.low %v4447_v11, %v4463_v12 }
0x11df   : > { %v5151_v36 = vsel %vm1298_vm2, %v4843_v4, 0  ;;  %v5198_v1 = vsel %vm1298_vm2, %v4844_v29, 0  ;;  %v4472_v32 = vcombine.high %v4447_v11, %v4463_v12  ;;  %v4845_v39 = vpack.c.bf16 %v4841_v18, %v4773_v20 }
0x11e0   : > { %6442 = vmatpush3.bf16.xpose.msra.mxu1 %v5151_v36  ;;  %6448 = vmatpush3.bf16.xpose.msra.mxu0 %v5198_v1  ;;  %v4846_v42 = vpack.c.bf16 %v4842_v5, %v4774_v16  ;;  %v4543_v55 = vpack.c.bf16 %v4539_v17, %v4471_v9  ;;  %v4522_v22 = vrot.slane %v4508_v10, %v6964_v51 }
0x11e1   : > { %6453 = vmatprep.subr.bf16.mxu1 %v6761_v2  ;;  %6459 = vmatprep.subr.bf16.mxu0 %v6761_v2  ;;  %v4544_v56 = vpack.c.bf16 %v4540_v44, %v4472_v32  ;;  %v4538_v30 = vrot.slane %v4524_v19, %v6964_v51  ;;  %v5245_v37 = vsel %vm1298_vm2, %v4845_v39, 0  ;;  %v4454_v38 = vrot.slane %v4440_v27, %v6964_v51 }
0x11e2   : > { %v5292_v53 = vsel %vm1298_vm2, %v4846_v42, 0  ;;  %v4470_v49 = vrot.slane %v4456_v15, %v6964_v51 }
0x11e3   : > { %v4541_v41 = vcombine.low %v4522_v22, %v4538_v30  ;;  %v4542_v47 = vcombine.high %v4522_v22, %v4538_v30 }
0x11e4   : > { %v4473_v50 = vcombine.low %v4454_v38, %v4470_v49  ;;  %v4474_v52 = vcombine.high %v4454_v38, %v4470_v49 }
0x11e6   : > { %v4545_v48 = vpack.c.bf16 %v4541_v41, %v4473_v50  ;;  %v4546_v57 = vpack.c.bf16 %v4542_v47, %v4474_v52 }
0x11e7   : > { %6444 = vmatmul.mubr.msk.bf16.vlgmr.msra.gmra.mrb[48].mxu1 %vm1298_vm2, %v4543_v55  ;;  %6450 = vmatmul.mubr.msk.bf16.vlgmr.msra.gmra.mrb[52].mxu0 %vm1298_vm2, %v4544_v56 }
0x11e8   : > { %6454 = vmatpush3.bf16.xpose.msra.mxu1 %v5245_v37  ;;  %6460 = vmatpush3.bf16.xpose.msra.mxu0 %v5292_v53 }
0x11e9   : > { %6455 = vmatprep.mubr.msk.bf16.mxu1 %vm6762_vm0, %v6761_v2  ;;  %6461 = vmatprep.mubr.msk.bf16.mxu0 %vm6762_vm0, %v6761_v2 }
0x11ea   : > { %6465 = vmatprep.subr.bf16.mxu1 %v6761_v2  ;;  %6471 = vmatprep.subr.bf16.mxu0 %v6761_v2 }
0x11ef   : > { %6456 = vmatmul.mubr.msk.bf16.vlgmr.msra.gmra.mrb[52].mxu1 %vm1298_vm2, %v4545_v48  ;;  %6462 = vmatmul.mubr.msk.bf16.vlgmr.msra.gmra.mrb[56].mxu0 %vm1298_vm2, %v4546_v57 }
0x11f0   : > { %6467 = vmatprep.mubr.msk.bf16.mxu1 %vm6762_vm0, %v6761_v2  ;;  %6473 = vmatprep.mubr.msk.bf16.mxu0 %vm6762_vm0, %v6761_v2 }
0x12ba   : > { %v5187_v58 = vpop.f32.mrb[48].mxu1  ;;  %v5234_v40 = vpop.f32.mrb[52].mxu0 }
0x12bb   : > { %v5335_v62 = vmul.f32 0.35355338, %v5187_v58  ;;  %v5337_v35 = vmul.f32 0.35355338, %v5234_v40  ;;  %v6445_v33 = vpop.f32.mrb[49].mxu1  ;;  %v6451_v63 = vpop.f32.mrb[53].mxu0 }
0x12bc   : > { %v5190_v24 = vpop.f32.mrb[50].mxu1  ;;  %v5237_v59 = vpop.f32.mrb[54].mxu0 }
0x12bd   : > { %v6446_v7 = vpop.f32.mrb[51].mxu1  ;;  %v6452_v61 = vpop.f32.mrb[55].mxu0  ;;  %v5336_v54 = vmul.f32 0.35355338, %v5190_v24  ;;  %v5338_v6 = vmul.f32 0.35355338, %v5237_v59 }
0x12be   : > { %v5343_v0 = vsel %vm1487_vm3, %v5335_v62, -inf  ;;  %v5349_v21 = vsel %vm1487_vm3, %v5337_v35, -inf }
0x12bf   : > { %5344 = vmax.xlane.f32.xlu1 %v5343_v0  ;;  %5350 = vmax.xlane.f32.xlu0 %v5349_v21  ;;  %v5346_v60 = vsel %vm1487_vm3, %v5336_v54, -inf  ;;  %v5352_v34 = vsel %vm1487_vm3, %v5338_v6, -inf }
0x12c2   : > { %v5281_v3 = vpop.f32.mrb[52].mxu1  ;;  %v5328_v4 = vpop.f32.mrb[56].mxu0 }
0x12c3   : > { %v5339_v29 = vmul.f32 0.35355338, %v5281_v3  ;;  %5347 = vmax.xlane.f32.xlu0 %v5346_v60  ;;  %5353 = vmax.xlane.f32.xlu1 %v5352_v34  ;;  %v6457_v13 = vpop.f32.mrb[53].mxu1  ;;  %v6463_v45 = vpop.f32.mrb[57].mxu0  ;;  %v5341_v5 = vmul.f32 0.35355338, %v5328_v4 }
0x12c4   : > { %v5284_v11 = vpop.f32.mrb[54].mxu1  ;;  %v5331_v12 = vpop.f32.mrb[58].mxu0 }
0x12c5   : > { %v5340_v36 = vmul.f32 0.35355338, %v5284_v11  ;;  %v6458_v1 = vpop.f32.mrb[55].mxu1  ;;  %v6464_v18 = vpop.f32.mrb[59].mxu0  ;;  %v5355_v10 = vsel %vm1487_vm3, %v5339_v29, -inf  ;;  %v5361_v44 = vsel %vm1487_vm3, %v5341_v5, -inf }
0x12c6   : > { %v5342_v19 = vmul.f32 0.35355338, %v5331_v12 }
0x12c7   : > { %5356 = vmax.xlane.f32.xlu0 %v5355_v10  ;;  %v5358_v17 = vsel %vm1487_vm3, %v5340_v36, -inf }
0x12c8   : > { %5359 = vmax.xlane.f32.xlu1 %v5358_v17  ;;  %v5364_v20 = vsel %vm1487_vm3, %v5342_v19, -inf }
0x12cb   : > { %5362 = vmax.xlane.f32.xlu0 %v5361_v44 }
0x12cc   : > { %5365 = vmax.xlane.f32.xlu1 %v5364_v20 }
0x12dd   : > { %4849 = vrot.lane.b32.xlu1 %v7741_v8, %s6760_s11 }
0x12e1   : > { %4847 = vrot.lane.b32.xlu0 %v7739_v43, %s6760_s11  ;;  %4851 = vrot.lane.b32.xlu1 %v7759_v23, %s6760_s11 }
0x12e5   : > { %4853 = vrot.lane.b32.xlu0 %v7763_v25, %s6760_s11  ;;  %4855 = vrot.lane.b32.xlu1 %v7767_v14, %s6760_s11 }
0x12e9   : > { %4857 = vrot.lane.b32.xlu0 %v7771_v26, %s6760_s11  ;;  %4859 = vrot.lane.b32.xlu1 %v7775_v31, %s6760_s11 }
0x12ed   : > { %4861 = vrot.lane.b32.xlu0 %v7779_v28, %s6760_s11 }
0x134c   : > { %v5345_v8 = vpop.xlane.xlu1 %5344  ;;  %v5351_v43 = vpop.xlane.xlu0 %5350 }
0x134d   : > { %v5367_v16 = vsub.f32 %v5335_v62, %v5345_v8  ;;  %v5369_v27 = vsub.f32 %v5337_v35, %v5351_v43 }
0x134f   : > { %v5375_v23 = vmul.f32 1.442695, %v5367_v16  ;;  %v5379_v15 = vmul.f32 1.442695, %v5369_v27 }
0x1350   : > { %v5348_v9 = vpop.xlane.xlu0 %5347  ;;  %v5354_v25 = vpop.xlane.xlu1 %5353 }
0x1351   : > { %6664 = vpow2.f32 %v5375_v23  ;;  %v5368_v32 = vsub.f32 %v5336_v54, %v5348_v9  ;;  %v5370_v14 = vsub.f32 %v5338_v6, %v5354_v25 }
0x1352   : > { %6666 = vpow2.f32 %v5379_v15 }
0x1353   : > { %v5377_v39 = vmul.f32 1.442695, %v5368_v32  ;;  %v5381_v26 = vmul.f32 1.442695, %v5370_v14 }
0x1354   : > { %v5357_v42 = vpop.xlane.xlu0 %5356 }
0x1355   : > { %6668 = vpow2.f32 %v5377_v39  ;;  %v5371_v31 = vsub.f32 %v5339_v29, %v5357_v42  ;;  %v5360_v55 = vpop.xlane.xlu1 %5359 }
0x1356   : > { %v5372_v56 = vsub.f32 %v5340_v36, %v5360_v55  ;;  %6670 = vpow2.f32 %v5381_v26 }
0x1357   : > { %v5383_v28 = vmul.f32 1.442695, %v5371_v31 }
0x1358   : > { %v5385_v22 = vmul.f32 1.442695, %v5372_v56  ;;  %v5363_v30 = vpop.xlane.xlu0 %5362 }
0x1359   : > { %v5373_v37 = vsub.f32 %v5341_v5, %v5363_v30  ;;  %v5366_v53 = vpop.xlane.xlu1 %5365 }
0x135a   : > { %6672 = vpow2.f32 %v5385_v22  ;;  %v5374_v38 = vsub.f32 %v5342_v19, %v5366_v53 }
0x135b   : > { %v7937_v49 = vpop.eup %6664  ;;  %6674 = vpow2.f32 %v5383_v28  ;;  %v5387_v41 = vmul.f32 1.442695, %v5373_v37 }
0x135c   : > { %v5389_v47 = vmul.f32 1.442695, %v5374_v38  ;;  %v4848_v50 = vpop.permute.xlu0 %4847  ;;  %v5391_v52 = vsel %vm1487_vm3, %v7937_v49, 0.0  ;;  %v7941_v48 = vpop.eup %6666 }
0x135d   : > { %6676 = vpow2.f32 %v5387_v41  ;;  %5392 = vadd.xlane.f32.xlu0 %v5391_v52  ;;  %v4850_v57 = vpop.permute.xlu1 %4849  ;;  %v5397_v62 = vsel %vm1487_vm3, %v7941_v48, 0.0 }
0x135e   : > { %6678 = vpow2.f32 %v5389_v47 }
0x135f   : > { %v7943_v58 = vpop.eup %6668 }
0x1360   : > { %v4854_v40 = vpop.permute.xlu0 %4853  ;;  %v5394_v35 = vsel %vm1487_vm3, %v7943_v58, 0.0  ;;  %v7949_v33 = vpop.eup %6670 }
0x1361   : > { %5398 = vadd.xlane.f32.xlu0 %v5397_v62  ;;  %5395 = vadd.xlane.f32.xlu1 %v5394_v35  ;;  %v4852_v63 = vpop.permute.xlu1 %4851  ;;  %v5400_v7 = vsel %vm1487_vm3, %v7949_v33, 0.0 }
0x1364   : > { %v7951_v24 = vpop.eup %6672  ;;  %v4858_v59 = vpop.permute.xlu0 %4857 }
0x1365   : > { %v7955_v61 = vpop.eup %6674  ;;  %5401 = vadd.xlane.f32.xlu1 %v5400_v7  ;;  %v4856_v54 = vpop.permute.xlu1 %4855  ;;  %v5406_v6 = vsel %vm1487_vm3, %v7951_v24, 0.0  ;;  %v4939_v0 = vcombine.low %v4850_v57, %v4858_v59  ;;  %v4940_v3 = vcombine.high %v4850_v57, %v4858_v59 }
0x1366   : > { %5407 = vadd.xlane.f32.xlu0 %v5406_v6  ;;  %v4871_v60 = vcombine.low %v4848_v50, %v4856_v54  ;;  %v4872_v34 = vcombine.high %v4848_v50, %v4856_v54  ;;  %v5403_v29 = vsel %vm1487_vm3, %v7955_v61, 0.0 }
0x1367   : > { %v7959_v21 = vpop.eup %6676  ;;  %v4947_v1 = vrot.slane %v4939_v0, %v6954_v46  ;;  %v4954_v10 = vrot.slane %v4940_v3, %v6954_v46 }
0x1368   : > { %v4862_v4 = vpop.permute.xlu0 %4861  ;;  %v7963_v13 = vpop.eup %6678  ;;  %v5409_v36 = vsel %vm1487_vm3, %v7959_v21, 0.0  ;;  %v4879_v19 = vrot.slane %v4871_v60, %v6954_v46  ;;  %v4886_v20 = vrot.slane %v4872_v34, %v6954_v46 }
0x1369   : > { %v4955_v45 = vcombine.low %v4854_v40, %v4862_v4  ;;  %v4956_v11 = vcombine.high %v4854_v40, %v4862_v4  ;;  %5404 = vadd.xlane.f32.xlu1 %v5403_v29  ;;  %v4860_v12 = vpop.permute.xlu1 %4859  ;;  %v5412_v16 = vsel %vm1487_vm3, %v7963_v13, 0.0 }
0x136a   : > { %v4887_v18 = vcombine.low %v4852_v63, %v4860_v12  ;;  %v4888_v5 = vcombine.high %v4852_v63, %v4860_v12  ;;  %5410 = vadd.xlane.f32.xlu0 %v5409_v36 }
0x136b   : > { %v4963_v17 = vrot.slane %v4955_v45, %v6954_v46  ;;  %v4970_v44 = vrot.slane %v4956_v11, %v6954_v46 }
0x136c   : > { %v4895_v8 = vrot.slane %v4887_v18, %v6954_v46  ;;  %v4902_v43 = vrot.slane %v4888_v5, %v6954_v46 }
0x136d   : > { %v4971_v27 = vcombine.low %v4947_v1, %v4963_v17  ;;  %v4972_v23 = vcombine.high %v4947_v1, %v4963_v17  ;;  %v4987_v15 = vcombine.low %v4954_v10, %v4970_v44  ;;  %v4988_v9 = vcombine.high %v4954_v10, %v4970_v44  ;;  %5413 = vadd.xlane.f32.xlu1 %v5412_v16 }
0x136e   : > { %v4903_v25 = vcombine.low %v4879_v19, %v4895_v8  ;;  %v4904_v32 = vcombine.high %v4879_v19, %v4895_v8  ;;  %v4919_v14 = vcombine.low %v4886_v20, %v4902_v43  ;;  %v4920_v39 = vcombine.high %v4886_v20, %v4902_v43 }
0x136f   : > { %v4979_v26 = vrot.slane %v4971_v27, %v6964_v51  ;;  %v4986_v42 = vrot.slane %v4972_v23, %v6964_v51  ;;  %v4995_v31 = vrot.slane %v4987_v15, %v6964_v51  ;;  %v5002_v55 = vrot.slane %v4988_v9, %v6964_v51 }
0x1370   : > { %v4911_v56 = vrot.slane %v4903_v25, %v6964_v51  ;;  %v4918_v28 = vrot.slane %v4904_v32, %v6964_v51  ;;  %v4927_v22 = vrot.slane %v4919_v14, %v6964_v51  ;;  %v4934_v30 = vrot.slane %v4920_v39, %v6964_v51 }
0x1371   : > { %v5075_v37 = vcombine.low %v4979_v26, %v4986_v42  ;;  %v6169_v53 = vcombine.high %v4979_v26, %v4986_v42  ;;  %v5091_v38 = vcombine.low %v4995_v31, %v5002_v55  ;;  %v6170_v41 = vcombine.high %v4995_v31, %v5002_v55 }
0x1372   : > { %v5007_v47 = vcombine.low %v4911_v56, %v4918_v28  ;;  %v6167_v50 = vcombine.high %v4911_v56, %v4918_v28  ;;  %v5023_v52 = vcombine.low %v4927_v22, %v4934_v30  ;;  %v6168_v57 = vcombine.high %v4927_v22, %v4934_v30 }
0x1373   : > { %v5082_v40 = vrot.slane %v5075_v37, %v6954_v46  ;;  %v5090_v62 = vrot.slane %v6169_v53, %v6954_v46  ;;  %v5098_v35 = vrot.slane %v5091_v38, %v6954_v46  ;;  %v5106_v63 = vrot.slane %v6170_v41, %v6954_v46 }
0x1374   : > { %v5014_v59 = vrot.slane %v5007_v47, %v6954_v46  ;;  %v5022_v7 = vrot.slane %v6167_v50, %v6954_v46  ;;  %v5030_v54 = vrot.slane %v5023_v52, %v6954_v46  ;;  %v5038_v6 = vrot.slane %v6168_v57, %v6954_v46 }
0x1375   : > { %v5107_v0 = vcombine.low %v5082_v40, %v5090_v62  ;;  %v5123_v3 = vcombine.low %v5098_v35, %v5106_v63  ;;  %v5108_v60 = vcombine.high %v5082_v40, %v5090_v62  ;;  %v5124_v34 = vcombine.high %v5098_v35, %v5106_v63 }
0x1376   : > { %v5039_v4 = vcombine.low %v5014_v59, %v5022_v7  ;;  %v5055_v29 = vcombine.low %v5030_v54, %v5038_v6  ;;  %v5040_v45 = vcombine.high %v5014_v59, %v5022_v7  ;;  %v5056_v11 = vcombine.high %v5030_v54, %v5038_v6 }
0x1377   : > { %v5115_v12 = vrot.slane %v5107_v0, %v6964_v51  ;;  %v5131_v36 = vrot.slane %v5123_v3, %v6964_v51  ;;  %v5122_v1 = vrot.slane %v5108_v60, %v6964_v51  ;;  %v5138_v18 = vrot.slane %v5124_v34, %v6964_v51 }
0x1378   : > { %v5047_v5 = vrot.slane %v5039_v4, %v6964_v51  ;;  %v5063_v10 = vrot.slane %v5055_v29, %v6964_v51  ;;  %v5054_v19 = vrot.slane %v5040_v45, %v6964_v51  ;;  %v5070_v17 = vrot.slane %v5056_v11, %v6964_v51 }
0x1379   : > { %v5139_v44 = vcombine.low %v5115_v12, %v5131_v36  ;;  %v5140_v20 = vcombine.high %v5115_v12, %v5131_v36  ;;  %v5141_v8 = vcombine.low %v5122_v1, %v5138_v18  ;;  %v5142_v43 = vcombine.high %v5122_v1, %v5138_v18 }
0x137a   : > { %v5071_v16 = vcombine.low %v5047_v5, %v5063_v10  ;;  %v5072_v27 = vcombine.high %v5047_v5, %v5063_v10  ;;  %v5073_v23 = vcombine.low %v5054_v19, %v5070_v17  ;;  %v5074_v15 = vcombine.high %v5054_v19, %v5070_v17 }
0x137c   : > { %v5143_v9 = vpack.c.bf16 %v5139_v44, %v5071_v16  ;;  %v5144_v25 = vpack.c.bf16 %v5140_v20, %v5072_v27  ;;  %v5145_v32 = vpack.c.bf16 %v5141_v8, %v5073_v23  ;;  %v5146_v14 = vpack.c.bf16 %v5142_v43, %v5074_v15 }
0x137e   : > { %6466 = vmatpush3.bf16.msra.mxu1 %v5143_v9  ;;  %6472 = vmatpush3.bf16.msra.mxu0 %v5144_v25 }
0x137f   : > { %6477 = vmatprep.subr.bf16.mxu1 %v6761_v2  ;;  %6483 = vmatprep.subr.bf16.mxu0 %v6761_v2 }
0x13ea   : > { %v5393_v39 = vpop.xlane.xlu0 %5392 }
0x13eb   : > { %6680 = vrcp.f32 %v5393_v39 }
0x13ee   : > { %v5399_v26 = vpop.xlane.xlu0 %5398  ;;  %v5396_v42 = vpop.xlane.xlu1 %5395 }
0x13ef   : > { %6682 = vrcp.f32 %v5396_v42 }
0x13f0   : > { %6684 = vrcp.f32 %v5399_v26 }
0x13f2   : > { %v5402_v31 = vpop.xlane.xlu1 %5401 }
0x13f3   : > { %6686 = vrcp.f32 %v5402_v31  ;;  %v5408_v55 = vpop.xlane.xlu0 %5407 }
0x13f4   : > { %6688 = vrcp.f32 %v5408_v55 }
0x13f5   : > { %v6681_v22 = vpop.eup %6680 }
0x13f6   : > { %v5405_v56 = vpop.xlane.xlu1 %5404  ;;  %v5423_v38 = vmul.f32 %v6681_v22, %v7937_v49 }
0x13f7   : > { %6690 = vrcp.f32 %v5405_v56  ;;  %v5411_v28 = vpop.xlane.xlu0 %5410 }
0x13f8   : > { %6692 = vrcp.f32 %v5411_v28 }
0x13f9   : > { %v6683_v30 = vpop.eup %6682 }
0x13fa   : > { %v5414_v37 = vpop.xlane.xlu1 %5413  ;;  %v6685_v53 = vpop.eup %6684  ;;  %v5424_v41 = vmul.f32 %v6683_v30, %v7943_v58 }
0x13fb   : > { %6694 = vrcp.f32 %v5414_v37  ;;  %v5425_v52 = vmul.f32 %v6685_v53, %v7941_v48 }
0x13fc   : > { %v5431_v50 = vpack.c.bf16 %v5424_v41, %v5423_v38 }
0x13fd   : > { %v6687_v47 = vpop.eup %6686 }
0x13fe   : > { %v5426_v57 = vmul.f32 %v6687_v47, %v7949_v33  ;;  %v6689_v40 = vpop.eup %6688  ;;  %6468 = vmatmul.mubr.msk.bf16.vlgmr.msra.gmra.mrb[56].mxu1 %vm1487_vm3, %v5431_v50 }
0x13ff   : > { %6478 = vmatpush3.bf16.msra.mxu1 %v5145_v32  ;;  %6479 = vmatprep.mubr.msk.bf16.mxu1 %vm6762_vm0, %v6761_v2  ;;  %v5428_v49 = vmul.f32 %v6689_v40, %v7951_v24  ;;  %v6590_v24 = vld [vmem:[%s8134_s4 + $0xc] ss:$16 sps:$4 sm:$0xff]  }
0x1400   : > { %v5432_v62 = vpack.c.bf16 %v5426_v57, %v5425_v52  ;;  %6489 = vmatprep.subr.bf16.mxu1 %v6761_v2  ;;  %5934 = vrot.lane.b32.xlu0 %v6590_v24, %s6772_s29 }
0x1401   : > { %v6691_v35 = vpop.eup %6690 }
0x1402   : > { %v5427_v58 = vmul.f32 %v6691_v35, %v7955_v61  ;;  %6474 = vmatmul.mubr.msk.bf16.vlgmr.msra.gmra.mrb[60].mxu0 %vm1487_vm3, %v5432_v62  ;;  %v6693_v48 = vpop.eup %6692 }
0x1403   : > { %6484 = vmatpush3.bf16.msra.mxu0 %v5146_v14  ;;  %6485 = vmatprep.mubr.msk.bf16.mxu0 %vm6762_vm0, %v6761_v2  ;;  %v5429_v59 = vmul.f32 %v6693_v48, %v7959_v21 }
0x1404   : > { %v5433_v33 = vpack.c.bf16 %v5428_v49, %v5427_v58 }
0x1405   : > { %v6695_v63 = vpop.eup %6694 }
0x1406   : > { %v5430_v7 = vmul.f32 %v6695_v63, %v7963_v13  ;;  %6480 = vmatmul.mubr.msk.bf16.vlgmr.msra.gmra.mrb[60].mxu1 %vm1487_vm3, %v5433_v33 }
0x1407   : > { %6493 = vmatprep.mubr.msk.bf16.mxu1 %vm6762_vm0, %v6761_v2 }
0x1408   : > { %v5434_v54 = vpack.c.bf16 %v5430_v7, %v5429_v59 }
0x140a   : > { %6486 = vmatmul.mubr.msk.bf16.vlgmr.msra.gmra.mrb[64].mxu0 %vm1487_vm3, %v5434_v54 }
0x1472   : > { %v5935_v43 = vpop.permute.xlu0 %5934 }
0x1473   : > { %6490 = vmatpush3.bf16.msra.mxu1 %v5935_v43 }
0x1474   : > { %6491 = vmatprep.subr.bf16.mxu1 %v6761_v2 }
0x14d1   : > { %v5472_v61 = vpop.f32.mrb[56].mxu1 }
0x14d2   : > { %v6469_v6 = vpop.f32.mrb[57].mxu1 }
0x14d3   : > { %v5475_v0 = vpop.f32.mrb[58].mxu1 }
0x14d4   : > { %v6470_v21 = vpop.f32.mrb[59].mxu1 }
0x14d5   : > { %v5516_v3 = vpop.f32.mrb[60].mxu0 }
0x14d6   : > { %v6475_v13 = vpop.f32.mrb[61].mxu0 }
0x14d7   : > { %v5519_v60 = vpop.f32.mrb[62].mxu0 }
0x14d8   : > { %v6476_v34 = vpop.f32.mrb[63].mxu0 }
0x14d9   : > { %v5560_v4 = vpop.f32.mrb[60].mxu1 }
0x14da   : > { %v5611_v29 = vcombine.low %v5472_v61, %v5560_v4  ;;  %v5612_v45 = vcombine.high %v5472_v61, %v5560_v4  ;;  %v6481_v11 = vpop.f32.mrb[61].mxu1 }
0x14db   : > { %v5563_v12 = vpop.f32.mrb[62].mxu1 }
0x14dc   : > { %v5679_v36 = vcombine.low %v5475_v0, %v5563_v12  ;;  %v5680_v1 = vcombine.high %v5475_v0, %v5563_v12  ;;  %v6482_v18 = vpop.f32.mrb[63].mxu1  ;;  %v5619_v44 = vrot.slane %v5611_v29, %v6954_v46  ;;  %v5626_v20 = vrot.slane %v5612_v45, %v6954_v46 }
0x14dd   : > { %v5604_v5 = vpop.f32.mrb[64].mxu0 }
0x14de   : > { %v5627_v10 = vcombine.low %v5516_v3, %v5604_v5  ;;  %v5628_v19 = vcombine.high %v5516_v3, %v5604_v5  ;;  %v6487_v17 = vpop.f32.mrb[65].mxu0  ;;  %v5687_v26 = vrot.slane %v5679_v36, %v6954_v46  ;;  %v5694_v42 = vrot.slane %v5680_v1, %v6954_v46 }
0x14df   : > { %v5607_v8 = vpop.f32.mrb[66].mxu0 }
0x14e0   : > { %v5635_v16 = vrot.slane %v5627_v10, %v6954_v46  ;;  %v5642_v27 = vrot.slane %v5628_v19, %v6954_v46  ;;  %v5695_v23 = vcombine.low %v5519_v60, %v5607_v8  ;;  %v5696_v15 = vcombine.high %v5519_v60, %v5607_v8  ;;  %v6488_v9 = vpop.f32.mrb[67].mxu0 }
0x14e2   : > { %v5643_v25 = vcombine.low %v5619_v44, %v5635_v16  ;;  %v5644_v32 = vcombine.high %v5619_v44, %v5635_v16  ;;  %v5659_v14 = vcombine.low %v5626_v20, %v5642_v27  ;;  %v5660_v39 = vcombine.high %v5626_v20, %v5642_v27 }
0x14e3   : > { %v5703_v31 = vrot.slane %v5695_v23, %v6954_v46  ;;  %v5710_v55 = vrot.slane %v5696_v15, %v6954_v46 }
0x14e4   : > { %v5651_v56 = vrot.slane %v5643_v25, %v6964_v51  ;;  %v5658_v28 = vrot.slane %v5644_v32, %v6964_v51  ;;  %v5667_v22 = vrot.slane %v5659_v14, %v6964_v51  ;;  %v5674_v2 = vrot.slane %v5660_v39, %v6964_v51  ;;  %v6183_v25 = vld [vmem:[%s8135_s5 + $0x3] ss:$0 sm:$0xff] }
0x14e5   : > { %v5711_v30 = vcombine.low %v5687_v26, %v5703_v31  ;;  %v5712_v37 = vcombine.high %v5687_v26, %v5703_v31  ;;  %v5727_v53 = vcombine.low %v5694_v42, %v5710_v55  ;;  %v5728_v38 = vcombine.high %v5694_v42, %v5710_v55 }
0x14e6   : > { %v5747_v41 = vcombine.low %v5651_v56, %v5658_v28  ;;  %v6179_v47 = vcombine.high %v5651_v56, %v5658_v28  ;;  %v5763_v50 = vcombine.low %v5667_v22, %v5674_v2  ;;  %v6180_v52 = vcombine.high %v5667_v22, %v5674_v2 }
0x14e7   : > { %v5719_v57 = vrot.slane %v5711_v30, %v6964_v51  ;;  %v5726_v40 = vrot.slane %v5712_v37, %v6964_v51  ;;  %v5735_v62 = vrot.slane %v5727_v53, %v6964_v51  ;;  %v5742_v35 = vrot.slane %v5728_v38, %v6964_v51 }
0x14e8   : > { %v5754_v49 = vrot.slane %v5747_v41, %v6954_v46  ;;  %v5762_v58 = vrot.slane %v6179_v47, %v6954_v46  ;;  %v5770_v48 = vrot.slane %v5763_v50, %v6954_v46  ;;  %v5778_v33 = vrot.slane %v6180_v52, %v6954_v46 }
0x14e9   : > { %v5815_v63 = vcombine.low %v5719_v57, %v5726_v40  ;;  %v6181_v59 = vcombine.high %v5719_v57, %v5726_v40  ;;  %v5831_v7 = vcombine.low %v5735_v62, %v5742_v35  ;;  %v6182_v54 = vcombine.high %v5735_v62, %v5742_v35 }
0x14ea   : > { %v5780_v24 = vcombine.high %v5754_v49, %v5762_v58  ;;  %v5796_v61 = vcombine.high %v5770_v48, %v5778_v33  ;;  %v5779_v6 = vcombine.low %v5754_v49, %v5762_v58  ;;  %v5795_v0 = vcombine.low %v5770_v48, %v5778_v33 }
0x14eb   : > { %v5822_v21 = vrot.slane %v5815_v63, %v6954_v46  ;;  %v5830_v3 = vrot.slane %v6181_v59, %v6954_v46  ;;  %v5838_v13 = vrot.slane %v5831_v7, %v6954_v46  ;;  %v5846_v60 = vrot.slane %v6182_v54, %v6954_v46 }
0x14ec   : > { %v5794_v34 = vrot.slane %v5780_v24, %v6964_v51  ;;  %v5810_v4 = vrot.slane %v5796_v61, %v6964_v51  ;;  %v5787_v29 = vrot.slane %v5779_v6, %v6964_v51  ;;  %v5803_v45 = vrot.slane %v5795_v0, %v6964_v51 }
0x14ed   : > { %v5848_v11 = vcombine.high %v5822_v21, %v5830_v3  ;;  %v5864_v12 = vcombine.high %v5838_v13, %v5846_v60  ;;  %v5847_v36 = vcombine.low %v5822_v21, %v5830_v3  ;;  %v5863_v1 = vcombine.low %v5838_v13, %v5846_v60 }
0x14ee   : > { %v5814_v18 = vcombine.high %v5794_v34, %v5810_v4  ;;  %v5812_v5 = vcombine.high %v5787_v29, %v5803_v45  ;;  %v5813_v10 = vcombine.low %v5794_v34, %v5810_v4  ;;  %v5811_v19 = vcombine.low %v5787_v29, %v5803_v45 }
0x14ef   : > { %v5862_v17 = vrot.slane %v5848_v11, %v6964_v51  ;;  %v5878_v46 = vrot.slane %v5864_v12, %v6964_v51  ;;  %v5855_v44 = vrot.slane %v5847_v36, %v6964_v51  ;;  %v5871_v20 = vrot.slane %v5863_v1, %v6964_v51  ;;  %v6591_v51 = vld [vmem:[%s8134_s4 + $0x2c] ss:$16 sps:$4 sm:$0xff]  }
0x14f1   : > { %v5882_v8 = vcombine.high %v5862_v17, %v5878_v46  ;;  %v5880_v43 = vcombine.high %v5855_v44, %v5871_v20  ;;  %v5881_v16 = vcombine.low %v5862_v17, %v5878_v46  ;;  %v5879_v27 = vcombine.low %v5855_v44, %v5871_v20 }
0x14f3   : > { %v6575_v23 = vpack.i.bf16 %v5882_v8, %v5814_v18  ;;  %v6565_v15 = vpack.i.bf16 %v5880_v43, %v5812_v5  ;;  %v6570_v9 = vpack.i.bf16 %v5881_v16, %v5813_v10 }
0x14f5   : > { %6576 = vrot.lane.b32.xlu0 %v6575_v23, %s6771_s14  ;;  %6566 = vrot.lane.b32.xlu1 %v6565_v15, %s6770_s10 }
0x14f9   : > { %6571 = vrot.lane.b32.xlu1 %v6570_v9, %s6769_s9  ;;  %5940 = vrot.lane.b32.xlu0 %v6183_v25, %s6772_s29  ;;  %s257_s9 = sand.u32 1, %s6750_s22  }
0x14fa   : > { %s6081_s14 = sshll.u32 %s257_s9, 4  ;;  %s8088_s25 = scalar_lea.sflag [#allocation3], %s257_s9 }
0x14fd   : > { %5936 = vrot.lane.b32.xlu1 %v6591_v51, %s6772_s29  ;;  %s259_s29 = scalar_lea.vmem [#allocation2], %s6081_s14 }
0x14fe   : > { %s6003_s13 = sshll.u32 %s259_s29, 4  ;;  %s8079_s13 = int_to_ptr.vmem [resolvable:$true] %s6003_s13 }
0x14ff   : > { %s6696_s11 = scalar_lea.vmem %s8079_s13, 256  ;;  %p6703_p0 = scmp.lt.s32.totalorder %s8079_s13, %s6701_s19 }
0x1500   : > { %p6697_p11 = scmp.ne.s32.totalorder %s8079_s13, %s6696_s11  ;;  %p6704_p1 = scmp.lt.s32.totalorder %s6702_s20, %s6696_s11 }
0x1502   : > { %p6698_p12 = pnand %p6697_p11, %p6848_p5  ;;  %p6705_p2 = por %p6704_p1, %p6703_p0 }
0x1504   : > { %p6699_p13 = pneg %p6698_p12 }
0x1506   : > { %p6706_p3 = pnand %p6705_p2, %p6699_p13 }
0x1567   : > { %v6567_v32 = vpop.permute.xlu1 %6566  ;;  %v6577_v26 = vpop.permute.xlu0 %6576 }
0x1568   : > { %v6569_v14 = vunpack.i.h.bf16 %v6567_v32  ;;  %v6568_v39 = vunpack.i.l.bf16 %v6567_v32  ;;  %v6579_v56 = vunpack.i.h.bf16 %v6577_v26  ;;  %v6578_v28 = vunpack.i.l.bf16 %v6577_v26 }
0x156a   : > { %v5907_v22 = vsel %vm1298_vm2, %v5811_v19, %v6568_v39  ;;  %v5908_v2 = vsel %vm1298_vm2, %v5879_v27, %v6569_v14 }
0x156b   : > { %v6572_v42 = vpop.permute.xlu1 %6571  ;;  %v5941_v50 = vpop.permute.xlu0 %5940 }
0x156c   : > { %v6574_v31 = vunpack.i.h.bf16 %v6572_v42  ;;  %v6573_v55 = vunpack.i.l.bf16 %v6572_v42 }
0x156e   : > { %v5909_v30 = vsel %vm1487_vm3, %v5907_v22, %v6573_v55  ;;  %v5910_v37 = vsel %vm1487_vm3, %v5908_v2, %v6574_v31 }
0x156f   : > { %v5911_v53 = vsel %vm2056_vm4, %v5909_v30, %v6578_v28  ;;  %v5912_v38 = vsel %vm2056_vm4, %v5910_v37, %v6579_v56  ;;  %v5937_v41 = vpop.permute.xlu1 %5936 }
0x1570   : > { %v5913_v47 = vpack.c.bf16 %v5912_v38, %v5911_v53  ;;  %6492 = vmatpush3.bf16.msra.mxu1 %v5937_v41 }
0x1573   : > { %6494 = vmatmul.mubr.msk.bf16.vlgmr.msra.gmra.mrb[64].mxu1 %vm307_vm1, %v5913_v47 }
0x1646   : > { %v5980_v52 = vpop.f32.mrb[64].mxu1 }
0x1647   : > { %v5981_v57 = vadd.f32 %v5980_v52, %v5941_v50  ;;  %v6495_v40 = vpop.f32.mrb[65].mxu1 }
0x1648   : > { %v5983_v62 = vpop.f32.mrb[66].mxu1 }
0x1649   : > { %5987 = vst.msk [vmem:[%s259_s29] sm:$0xff] %vm307_vm1, %v5981_v57  ;;  %v5984_v35 = vadd.f32 %v5983_v62, %v5941_v50  ;;  %v6496_v49 = vpop.f32.mrb[67].mxu1 }
0x164b   : > { %5988 = vst.msk [vmem:[%s259_s29 + $0x8] sm:$0xff] %vm307_vm1, %v5984_v35 }
0x164c   : > { %6709 = shalt.err (!%p6706_p3)
}
0x164d   : > { %s6710_s26 = scalar_lea.hbm %s8085_s28, 256  ;;  %s6714_s14 = scalar_lea.hbm %s8136_s6, 512 }
0x164e   : > { %p6711_p4 = scmp.ne.s32.totalorder %s8085_s28, %s6710_s26  ;;  %p6715_p9 = scmp.lt.u32.totalorder %s8085_s28, %s8136_s6 }
0x164f   : > { %p6716_p10 = scmp.lt.u32.totalorder %s6714_s14, %s6710_s26  ;;  %p6718_p12 = scmp.lt.u32.totalorder %s6710_s26, %s8085_s28 }
0x1650   : > { %p6712_p7 = pnand %p6711_p4, %p6848_p5 }
0x1651   : > { %p6717_p11 = por %p6716_p10, %p6715_p9 }
0x1652   : > { %p6713_p8 = pneg %p6712_p7 }
0x1653   : > { %p6719_p13 = por %p6718_p12, %p6717_p11 }
0x1655   : > { %p6720_p0 = pnand %p6719_p13, %p6713_p8 }
0x1657   : > { %6723 = shalt.err (!%p6720_p0)
}
0x1658   : > { %s6774_s16 = smov 128  }
0x1659   : > { %6497 = dma.vmem_to_hbm [thread:$0]  (%p6848_p5), %s8079_s13, 256, %s8085_s28, %s8088_s25, %s6774_s16, %s6774_s16, %s6770_s10  }
0x165a PF: > { %p6503_p1 = scmp.ge.s32.totalorder %s6758_s24, 2  ;;  %s6018_s17 = sand.u32 1, %s6746_s21  }
0x165b   : > { %s6019_s11 = scalar_lea.sflag [#allocation3], %s6018_s17 }
0x165c   : > { %p6500_p2 = pnand %p6503_p1, %p6852_p6 }
0x165e   : > { %6741 = dma.done.wait (!%p6500_p2), %s6019_s11, 256  }
0x165f   : > { %6743 = vsyncadd (!%p6500_p2), %s6019_s11, 4294967040  ;;  %p16_p3 = scmp.ge.s32.totalorder %s6835_s27, 4   ;;  %s8139_s21 = smov %s6750_s22 }
0x1660   : > { %s8140_s22 = smov %s6754_s23  ;;  %s8141_s23 = smov %s6846_s30 }
0x1661   : > { %s8142_s24 = smov %s6835_s27  ;;  %18 = sbr.rel (!%p16_p3) target bundleno = 3 (0x3), region = 82 }
0x1668   :  { %6024 = vsyncpa [#allocation3], 1 }
0x1669   :  { %6026 = vsyncpa [#allocation3 + $0x1], 1 }

</bundles_post_ra>
